<compile_context>
chip_gen: v5e
topology: v5e:2x2
jax: 0.10.0
libtpu: 0.0.40
codegen_flags: <defaults>
</compile_context>

<pallas_src>
import functools

import jax
import jax.numpy as jnp
from jax.experimental import pallas as pl
from jax.experimental.pallas import tpu as pltpu

D_MODEL = 768          # ViT-base / BERT-base hidden size (fixed by the module)
H1, H2, H_OUT = 512, 256, 1
OUT_PAD = 128          # lane-dense padded width for the final layer / output


def _leaky_relu(x, slope=0.2):
    return jnp.where(x > 0, x, slope * x)


def _round_up(x, m):
    return -(-x // m) * m


def _disc_kernel(img_ref, txt_ref,
                 w1i_ref, w1t_ref, b1_ref, w2_ref, b2_ref, w3_ref, b3_ref,
                 out_ref, img_acc, txt_acc, *,
                 s_img, s_txt, img_tile, txt_tile, n_img, n_txt, n_steps):
    s = pl.program_id(1)

    @pl.when(s == 0)
    def _init():
        img_acc[...] = jnp.zeros_like(img_acc)
        txt_acc[...] = jnp.zeros_like(txt_acc)

    def _accumulate(acc_ref, x_ref, true_s, tile, n_blocks):
        def _add():
            x = x_ref[...]                               # (B_tile, tile, 768)
            if true_s % tile != 0:
                # Partial last tile: rows >= valid hold unspecified OOB data
                # (mandatory now that the wrapper no longer zero-pads).
                valid = true_s - s * tile
                row = jax.lax.broadcasted_iota(jnp.int32, x.shape, 1)
                x = jnp.where(row < valid, x, jnp.zeros_like(x))
            # dtype=f32 fuses the upcast into the reduction (no f32 tile copy).
            acc_ref[...] += jnp.sum(x, axis=1, dtype=jnp.float32)

        if n_blocks == n_steps:
            _add()
        else:
            # Shorter modality: skip steps past its last block (its seq block
            # index is clamped in the index_map, so nothing is re-DMA'd).
            pl.when(s < n_blocks)(_add)

    _accumulate(img_acc, img_ref, s_img, img_tile, n_img)
    _accumulate(txt_acc, txt_ref, s_txt, txt_tile, n_txt)

    @pl.when(s == n_steps - 1)
    def _finalize():
        # TODO(synk): mean is over all S positions, exactly torch .mean(dim=1);
        #             no attention-mask-aware pooling (module does not do it).
        img_mean = img_acc[...] * (1.0 / s_img)          # (B_tile, 768)
        txt_mean = txt_acc[...] * (1.0 / s_txt)          # (B_tile, 768)
        # Concat-free first layer: W1 split at row 768, summed in f32.
        h = (jnp.dot(img_mean, w1i_ref[...], preferred_element_type=jnp.float32)
             + jnp.dot(txt_mean, w1t_ref[...], preferred_element_type=jnp.float32)
             + b1_ref[...])
        h = _leaky_relu(h)                               # (B_tile, 512)
        h = jnp.dot(h, w2_ref[...], preferred_element_type=jnp.float32) + b2_ref[...]
        h = _leaky_relu(h)                               # (B_tile, 256)
        h = jnp.dot(h, w3_ref[...], preferred_element_type=jnp.float32) + b3_ref[...]
        # Lanes 1..127 hold sigmoid(0)=0.5 from padded W3/b3 cols; wrapper slices.
        out_ref[...] = jax.nn.sigmoid(h)                 # (B_tile, 128)


def _pick_seq_tile(seq_len, desired, dtype):
    """Sequence tile obeying the (8,128)/(16,128) sublane rule, no padding."""
    itemsize = jnp.dtype(dtype).itemsize
    sublane = 8 * max(1, 4 // itemsize)                  # 8 for f32, 16 for bf16
    if desired is None:
        desired = 256 if itemsize == 2 else 128          # ~6 MiB / input buffer
    if seq_len <= desired:
        return seq_len                                   # full-extent block (legal)
    return max(sublane, (desired // sublane) * sublane)


def discriminator_forward(img_hidden, txt_hidden, params, *,
                          batch_tile=None, seq_tile=None,
                          vmem_limit_bytes=48 * 1024 * 1024):
    """img_hidden: (B, S_img, 768), txt_hidden: (B, S_txt, 768); f32 or bf16.

    Fast path: pass the encoder outputs as bf16 (halves HBM traffic).  Do NOT
    pre-cast in the wrapper -- that would add another HBM pass; the kernel
    accumulates in f32 regardless of the input dtype.
    """
    B, S_img, D = img_hidden.shape
    B2, S_txt, D2 = txt_hidden.shape
    assert D == D_MODEL and D2 == D_MODEL and B2 == B

    w1, b1, w2, b2, w3, b3 = params
    # Split W1 (concat-free first layer); pad last layer to lane-dense 128.
    w1_img, w1_txt = w1[:D_MODEL], w1[D_MODEL:]
    w3p = jnp.pad(w3, ((0, 0), (0, OUT_PAD - H_OUT)))
    b3p = jnp.pad(b3, ((0, 0), (0, OUT_PAD - H_OUT)))

    # ---- tiling (no padding of the big tensors; edge tiles masked in-kernel) ----
    if batch_tile is None:
        if B <= 8:
            batch_tile = B                       # single full-extent block
        else:
            # >=2 batch tiles whenever B allows, so the "parallel" batch axis
            # can shard across v7x's two TensorCores.
            batch_tile = min(16, _round_up(pl.cdiv(B, 2), 8))
    assert batch_tile == B or batch_tile % 8 == 0, "batch_tile must be B or 8-aligned"
    n_batch = pl.cdiv(B, batch_tile)

    img_tile = _pick_seq_tile(S_img, seq_tile, img_hidden.dtype)
    txt_tile = _pick_seq_tile(S_txt, seq_tile, txt_hidden.dtype)
    n_img = pl.cdiv(S_img, img_tile)
    n_txt = pl.cdiv(S_txt, txt_tile)
    n_steps = max(n_img, n_txt)

    kernel = functools.partial(
        _disc_kernel, s_img=S_img, s_txt=S_txt,
        img_tile=img_tile, txt_tile=txt_tile,
        n_img=n_img, n_txt=n_txt, n_steps=n_steps)

    def seq_map(n_blocks):
        if n_blocks == n_steps:
            return lambda b, s: (b, s, 0)
        # Clamp: repeated block index is not re-DMA'd; accumulation is gated.
        return lambda b, s: (b, jnp.minimum(s, n_blocks - 1), 0)

    def const_spec(shape):
        return pl.BlockSpec(shape, lambda b, s: (0,) * len(shape))

    def nbytes(x):
        return int(x.size) * jnp.dtype(x.dtype).itemsize

    weight_bytes = sum(nbytes(w) for w in (w1_img, w1_txt, b1, w2, b2, w3p, b3p))
    cost = pl.CostEstimate(
        flops=2 * B * (2 * D_MODEL * H1 + H1 * H2 + H2 * OUT_PAD)
              + B * (S_img + S_txt) * D_MODEL,
        transcendentals=B * OUT_PAD,
        bytes_accessed=nbytes(img_hidden) + nbytes(txt_hidden)
                       + weight_bytes + B * OUT_PAD * 4,
    )

    out = pl.pallas_call(
        kernel,
        out_shape=jax.ShapeDtypeStruct((B, OUT_PAD), jnp.float32),
        grid=(n_batch, n_steps),
        in_specs=[
            pl.BlockSpec((batch_tile, img_tile, D_MODEL), seq_map(n_img)),
            pl.BlockSpec((batch_tile, txt_tile, D_MODEL), seq_map(n_txt)),
            const_spec((D_MODEL, H1)),     # W1[:768]  -- resident, DMA'd once
            const_spec((D_MODEL, H1)),     # W1[768:]
            const_spec((1, H1)),
            const_spec((H1, H2)),
            const_spec((1, H2)),
            const_spec((H2, OUT_PAD)),
            const_spec((1, OUT_PAD)),
        ],
        out_specs=pl.BlockSpec((batch_tile, OUT_PAD), lambda b, s: (b, 0)),
        scratch_shapes=[
            pltpu.VMEM((batch_tile, D_MODEL), jnp.float32),   # img pooled sum
            pltpu.VMEM((batch_tile, D_MODEL), jnp.float32),   # txt pooled sum
        ],
        compiler_params=pltpu.CompilerParams(
            dimension_semantics=("parallel", "arbitrary"),
            # 48 MiB fits v7x's 64 MiB VMEM; on v6e/v5e (128 MiB physical) this
            # may be raised toward ~100 MiB together with larger tiles.
            vmem_limit_bytes=vmem_limit_bytes,
        ),
        cost_estimate=cost,
    )(img_hidden, txt_hidden, w1_img, w1_txt, b1, w2, b2, w3p, b3p)

    return out[:, :H_OUT]


def init_params(key):
    ks = jax.random.split(key, 6)
    scale = 0.02
    w1 = scale * jax.random.normal(ks[0], (2 * D_MODEL, H1), jnp.float32)
    b1 = scale * jax.random.normal(ks[1], (1, H1), jnp.float32)
    w2 = scale * jax.random.normal(ks[2], (H1, H2), jnp.float32)
    b2 = scale * jax.random.normal(ks[3], (1, H2), jnp.float32)
    w3 = scale * jax.random.normal(ks[4], (H2, H_OUT), jnp.float32)
    b3 = scale * jax.random.normal(ks[5], (1, H_OUT), jnp.float32)
    return (w1, b1, w2, b2, w3, b3)


def reference_forward(img_hidden, txt_hidden, params):
    w1, b1, w2, b2, w3, b3 = params
    f = jnp.concatenate([img_hidden.astype(jnp.float32).mean(axis=1),
                         txt_hidden.astype(jnp.float32).mean(axis=1)], axis=1)
    h = _leaky_relu(f @ w1 + b1)
    h = _leaky_relu(h @ w2 + b2)
    return jax.nn.sigmoid(h @ w3 + b3)


if __name__ == "__main__":
    key = jax.random.PRNGKey(0)
    k_img, k_txt, k_par = jax.random.split(key, 3)

    # Small synthetic "encoder output" shapes chosen so every edge path is
    # exercised: partial last seq tiles for BOTH modalities (40%16, 19%16) and
    # unequal block counts (img: 3 blocks, txt: 2 -> clamped index + gating).
    B, S_IMG, S_TXT = 2, 40, 19
    img_hidden = jax.random.normal(k_img, (B, S_IMG, D_MODEL), jnp.float32)
    txt_hidden = jax.random.normal(k_txt, (B, S_TXT, D_MODEL), jnp.float32)
    params = init_params(k_par)

    # f32 path.
    out = discriminator_forward(img_hidden, txt_hidden, params, seq_tile=16)
    out = jax.block_until_ready(out)
    ref = reference_forward(img_hidden, txt_hidden, params)
    assert out.shape == (B, 1)
    assert jnp.allclose(out, ref, atol=2e-5, rtol=2e-5)

    # bf16 encoder outputs (the fast path: half the HBM bytes, f32 accumulate).
    img_bf16 = img_hidden.astype(jnp.bfloat16)
    txt_bf16 = txt_hidden.astype(jnp.bfloat16)
    out_bf16 = discriminator_forward(img_bf16, txt_bf16, params, seq_tile=16)
    out_bf16 = jax.block_until_ready(out_bf16)
    ref_bf16 = reference_forward(img_bf16, txt_bf16, params)
    assert out_bf16.shape == (B, 1)
    assert jnp.allclose(out_bf16, ref_bf16, atol=2e-3, rtol=2e-3)

    print("KERNEL_OK")
</pallas_src>

<mosaic_0001>
module attributes {stable_mosaic.version = 11 : i64} {
  func.func @_disc_kernel(%arg0: i32, %arg1: i32, %arg2: memref<2x16x768xf32, #tpu.memory_space<vmem>>, %arg3: memref<2x16x768xf32, #tpu.memory_space<vmem>>, %arg4: memref<768x512xf32, #tpu.memory_space<vmem>>, %arg5: memref<768x512xf32, #tpu.memory_space<vmem>>, %arg6: memref<1x512xf32, #tpu.memory_space<vmem>>, %arg7: memref<512x256xf32, #tpu.memory_space<vmem>>, %arg8: memref<1x256xf32, #tpu.memory_space<vmem>>, %arg9: memref<256x128xf32, #tpu.memory_space<vmem>>, %arg10: memref<1x128xf32, #tpu.memory_space<vmem>>, %arg11: memref<2x128xf32, #tpu.memory_space<vmem>>, %arg12: memref<2x768xf32, #tpu.memory_space<vmem>>, %arg13: memref<2x768xf32, #tpu.memory_space<vmem>>) attributes {dimension_semantics = [#tpu.dimension_semantics<parallel>, #tpu.dimension_semantics<arbitrary>], iteration_bounds = array<i64: 1, 3>, scalar_prefetch = 0 : i64, scratch_operands = 2 : i64, tpu.core_type = #tpu.core_type<tc>, window_params = [{transform_indices = @transform_0, window_bounds = array<i64: 2, 16, 768>}, {transform_indices = @transform_1, window_bounds = array<i64: 2, 16, 768>}, {pipeline_mode = #tpu.pipeline_mode<synchronous>, transform_indices = @transform_2, window_bounds = array<i64: 768, 512>}, {pipeline_mode = #tpu.pipeline_mode<synchronous>, transform_indices = @transform_3, window_bounds = array<i64: 768, 512>}, {pipeline_mode = #tpu.pipeline_mode<synchronous>, transform_indices = @transform_4, window_bounds = array<i64: 1, 512>}, {pipeline_mode = #tpu.pipeline_mode<synchronous>, transform_indices = @transform_5, window_bounds = array<i64: 512, 256>}, {pipeline_mode = #tpu.pipeline_mode<synchronous>, transform_indices = @transform_6, window_bounds = array<i64: 1, 256>}, {pipeline_mode = #tpu.pipeline_mode<synchronous>, transform_indices = @transform_7, window_bounds = array<i64: 256, 128>}, {pipeline_mode = #tpu.pipeline_mode<synchronous>, transform_indices = @transform_8, window_bounds = array<i64: 1, 128>}, {transform_indices = @transform_9, window_bounds = array<i64: 2, 128>}]} {
    %c0_i32 = arith.constant 0 : i32
    %0 = arith.cmpi eq, %arg1, %c0_i32 : i32
    %1 = arith.extui %0 : i1 to i32
    %c0_i32_0 = arith.constant 0 : i32
    %2 = arith.cmpi ne, %1, %c0_i32_0 : i32
    scf.if %2 {
      %cst_11 = arith.constant 0.000000e+00 : f32
      %21 = vector.broadcast %cst_11 : f32 to vector<2x768xf32>
      %c0_12 = arith.constant 0 : index
      %c0_13 = arith.constant 0 : index
      %22 = vector.load %arg12[%c0_12, %c0_13] : memref<2x768xf32, #tpu.memory_space<vmem>>, vector<2x768xf32>
      tpu.vector_store %arg12[%c0_12, %c0_13], %21 {strides = array<i32>} : memref<2x768xf32, #tpu.memory_space<vmem>>, vector<2x768xf32>,
      %cst_14 = arith.constant 0.000000e+00 : f32
      %23 = vector.broadcast %cst_14 : f32 to vector<2x768xf32>
      %c0_15 = arith.constant 0 : index
      %c0_16 = arith.constant 0 : index
      %24 = vector.load %arg13[%c0_15, %c0_16] : memref<2x768xf32, #tpu.memory_space<vmem>>, vector<2x768xf32>
      tpu.vector_store %arg13[%c0_15, %c0_16], %23 {strides = array<i32>} : memref<2x768xf32, #tpu.memory_space<vmem>>, vector<2x768xf32>,
    } else {
    }
    %c0 = arith.constant 0 : index
    %c0_1 = arith.constant 0 : index
    %c0_2 = arith.constant 0 : index
    %3 = vector.load %arg2[%c0, %c0_1, %c0_2] : memref<2x16x768xf32, #tpu.memory_space<vmem>>, vector<2x16x768xf32>
    %c16_i32 = arith.constant 16 : i32
    %4 = arith.muli %arg1, %c16_i32 : i32
    %c40_i32 = arith.constant 40 : i32
    %5 = arith.subi %c40_i32, %4 : i32
    %6 = tpu.iota {dimensions = array<i32: 1>} : vector<2x16x768xi32>
    %7 = vector.broadcast %5 : i32 to vector<2x16x768xi32>
    %8 = arith.cmpi slt, %6, %7 : vector<2x16x768xi32>
    %cst = arith.constant 0.000000e+00 : f32
    %9 = vector.broadcast %cst : f32 to vector<2x16x768xf32>
    %10 = arith.select %8, %3, %9 : vector<2x16x768xi1>, vector<2x16x768xf32>
    %c0_3 = arith.constant 0 : index
    %c0_4 = arith.constant 0 : index
    %11 = vector.load %arg12[%c0_3, %c0_4] : memref<2x768xf32, #tpu.memory_space<vmem>>, vector<2x768xf32>
    %cst_5 = arith.constant dense<0.000000e+00> : vector<2x768xf32>
    %12 = vector.multi_reduction <add>, %10, %cst_5 [1] : vector<2x16x768xf32> to vector<2x768xf32>
    %13 = arith.addf %11, %12 : vector<2x768xf32>
    %c0_6 = arith.constant 0 : index
    %c0_7 = arith.constant 0 : index
    %14 = vector.load %arg12[%c0_6, %c0_7] : memref<2x768xf32, #tpu.memory_space<vmem>>, vector<2x768xf32>
    tpu.vector_store %arg12[%c0_6, %c0_7], %13 {strides = array<i32>} : memref<2x768xf32, #tpu.memory_space<vmem>>, vector<2x768xf32>,
    %c2_i32 = arith.constant 2 : i32
    %15 = arith.cmpi slt, %arg1, %c2_i32 : i32
    %16 = arith.extui %15 : i1 to i32
    %c0_i32_8 = arith.constant 0 : i32
    %17 = arith.cmpi ne, %16, %c0_i32_8 : i32
    scf.if %17 {
      %c0_11 = arith.constant 0 : index
      %c0_12 = arith.constant 0 : index
      %c0_13 = arith.constant 0 : index
      %21 = vector.load %arg3[%c0_11, %c0_12, %c0_13] : memref<2x16x768xf32, #tpu.memory_space<vmem>>, vector<2x16x768xf32>
      %c16_i32_14 = arith.constant 16 : i32
      %22 = arith.muli %arg1, %c16_i32_14 : i32
      %c19_i32 = arith.constant 19 : i32
      %23 = arith.subi %c19_i32, %22 : i32
      %24 = tpu.iota {dimensions = array<i32: 1>} : vector<2x16x768xi32>
      %25 = vector.broadcast %23 : i32 to vector<2x16x768xi32>
      %26 = arith.cmpi slt, %24, %25 : vector<2x16x768xi32>
      %cst_15 = arith.constant 0.000000e+00 : f32
      %27 = vector.broadcast %cst_15 : f32 to vector<2x16x768xf32>
      %28 = arith.select %26, %21, %27 : vector<2x16x768xi1>, vector<2x16x768xf32>
      %c0_16 = arith.constant 0 : index
      %c0_17 = arith.constant 0 : index
      %29 = vector.load %arg13[%c0_16, %c0_17] : memref<2x768xf32, #tpu.memory_space<vmem>>, vector<2x768xf32>
      %cst_18 = arith.constant dense<0.000000e+00> : vector<2x768xf32>
      %30 = vector.multi_reduction <add>, %28, %cst_18 [1] : vector<2x16x768xf32> to vector<2x768xf32>
      %31 = arith.addf %29, %30 : vector<2x768xf32>
      %c0_19 = arith.constant 0 : index
      %c0_20 = arith.constant 0 : index
      %32 = vector.load %arg13[%c0_19, %c0_20] : memref<2x768xf32, #tpu.memory_space<vmem>>, vector<2x768xf32>
      tpu.vector_store %arg13[%c0_19, %c0_20], %31 {strides = array<i32>} : memref<2x768xf32, #tpu.memory_space<vmem>>, vector<2x768xf32>,
    } else {
    }
    %c2_i32_9 = arith.constant 2 : i32
    %18 = arith.cmpi eq, %arg1, %c2_i32_9 : i32
    %19 = arith.extui %18 : i1 to i32
    %c0_i32_10 = arith.constant 0 : i32
    %20 = arith.cmpi ne, %19, %c0_i32_10 : i32
    scf.if %20 {
      %c0_11 = arith.constant 0 : index
      %c0_12 = arith.constant 0 : index
      %21 = vector.load %arg12[%c0_11, %c0_12] : memref<2x768xf32, #tpu.memory_space<vmem>>, vector<2x768xf32>
      %cst_13 = arith.constant 2.500000e-02 : f32
      %22 = vector.broadcast %cst_13 : f32 to vector<2x768xf32>
      %23 = arith.mulf %21, %22 : vector<2x768xf32>
      %c0_14 = arith.constant 0 : index
      %c0_15 = arith.constant 0 : index
      %24 = vector.load %arg13[%c0_14, %c0_15] : memref<2x768xf32, #tpu.memory_space<vmem>>, vector<2x768xf32>
      %cst_16 = arith.constant 0.0526315793 : f32
      %25 = vector.broadcast %cst_16 : f32 to vector<2x768xf32>
      %26 = arith.mulf %24, %25 : vector<2x768xf32>
      %c0_17 = arith.constant 0 : index
      %c0_18 = arith.constant 0 : index
      %27 = vector.load %arg4[%c0_17, %c0_18] : memref<768x512xf32, #tpu.memory_space<vmem>>, vector<768x512xf32>
      %cst_19 = arith.constant dense<0.000000e+00> : vector<2x512xf32>
      %28 = tpu.matmul %23, %27, %cst_19 {dimension_numbers = #tpu.dot_dimension_numbers<[1], [0], [0], [1], [0, 0, 1, 1], [], []>} : vector<2x768xf32>, vector<768x512xf32>, vector<2x512xf32> -> vector<2x512xf32>
      %c0_20 = arith.constant 0 : index
      %c0_21 = arith.constant 0 : index
      %29 = vector.load %arg5[%c0_20, %c0_21] : memref<768x512xf32, #tpu.memory_space<vmem>>, vector<768x512xf32>
      %cst_22 = arith.constant dense<0.000000e+00> : vector<2x512xf32>
      %30 = tpu.matmul %26, %29, %cst_22 {dimension_numbers = #tpu.dot_dimension_numbers<[1], [0], [0], [1], [0, 0, 1, 1], [], []>} : vector<2x768xf32>, vector<768x512xf32>, vector<2x512xf32> -> vector<2x512xf32>
      %31 = arith.addf %28, %30 : vector<2x512xf32>
      %c0_23 = arith.constant 0 : index
      %c0_24 = arith.constant 0 : index
      %32 = vector.load %arg6[%c0_23, %c0_24] : memref<1x512xf32, #tpu.memory_space<vmem>>, vector<1x512xf32>
      %33 = vector.broadcast %32 : vector<1x512xf32> to vector<2x512xf32>
      %34 = arith.addf %31, %33 : vector<2x512xf32>
      %cst_25 = arith.constant 0.000000e+00 : f32
      %35 = vector.broadcast %cst_25 : f32 to vector<2x512xf32>
      %36 = arith.cmpf ogt, %34, %35 : vector<2x512xf32>
      %cst_26 = arith.constant 2.000000e-01 : f32
      %37 = vector.broadcast %cst_26 : f32 to vector<2x512xf32>
      %38 = arith.mulf %37, %34 : vector<2x512xf32>
      %39 = arith.select %36, %34, %38 : vector<2x512xi1>, vector<2x512xf32>
      %c0_27 = arith.constant 0 : index
      %c0_28 = arith.constant 0 : index
      %40 = vector.load %arg7[%c0_27, %c0_28] : memref<512x256xf32, #tpu.memory_space<vmem>>, vector<512x256xf32>
      %cst_29 = arith.constant dense<0.000000e+00> : vector<2x256xf32>
      %41 = tpu.matmul %39, %40, %cst_29 {dimension_numbers = #tpu.dot_dimension_numbers<[1], [0], [0], [1], [0, 0, 1, 1], [], []>} : vector<2x512xf32>, vector<512x256xf32>, vector<2x256xf32> -> vector<2x256xf32>
      %c0_30 = arith.constant 0 : index
      %c0_31 = arith.constant 0 : index
      %42 = vector.load %arg8[%c0_30, %c0_31] : memref<1x256xf32, #tpu.memory_space<vmem>>, vector<1x256xf32>
      %43 = vector.broadcast %42 : vector<1x256xf32> to vector<2x256xf32>
      %44 = arith.addf %41, %43 : vector<2x256xf32>
      %cst_32 = arith.constant 0.000000e+00 : f32
      %45 = vector.broadcast %cst_32 : f32 to vector<2x256xf32>
      %46 = arith.cmpf ogt, %44, %45 : vector<2x256xf32>
      %cst_33 = arith.constant 2.000000e-01 : f32
      %47 = vector.broadcast %cst_33 : f32 to vector<2x256xf32>
      %48 = arith.mulf %47, %44 : vector<2x256xf32>
      %49 = arith.select %46, %44, %48 : vector<2x256xi1>, vector<2x256xf32>
      %c0_34 = arith.constant 0 : index
      %c0_35 = arith.constant 0 : index
      %50 = vector.load %arg9[%c0_34, %c0_35] : memref<256x128xf32, #tpu.memory_space<vmem>>, vector<256x128xf32>
      %cst_36 = arith.constant dense<0.000000e+00> : vector<2x128xf32>
      %51 = tpu.matmul %49, %50, %cst_36 {dimension_numbers = #tpu.dot_dimension_numbers<[1], [0], [0], [1], [0, 0, 1, 1], [], []>} : vector<2x256xf32>, vector<256x128xf32>, vector<2x128xf32> -> vector<2x128xf32>
      %c0_37 = arith.constant 0 : index
      %c0_38 = arith.constant 0 : index
      %52 = vector.load %arg10[%c0_37, %c0_38] : memref<1x128xf32, #tpu.memory_space<vmem>>, vector<1x128xf32>
      %53 = vector.broadcast %52 : vector<1x128xf32> to vector<2x128xf32>
      %54 = arith.addf %51, %53 : vector<2x128xf32>
      %55 = arith.negf %54 : vector<2x128xf32>
      %56 = math.exp %55 : vector<2x128xf32>
      %cst_39 = arith.constant 1.000000e+00 : f32
      %57 = vector.broadcast %cst_39 : f32 to vector<2x128xf32>
      %58 = arith.addf %57, %56 : vector<2x128xf32>
      %59 = arith.divf %57, %58 : vector<2x128xf32>
      %c0_40 = arith.constant 0 : index
      %c0_41 = arith.constant 0 : index
      %60 = vector.load %arg11[%c0_40, %c0_41] : memref<2x128xf32, #tpu.memory_space<vmem>>, vector<2x128xf32>
      tpu.vector_store %arg11[%c0_40, %c0_41], %59 {strides = array<i32>} : memref<2x128xf32, #tpu.memory_space<vmem>>, vector<2x128xf32>,
    } else {
    }
    return
  }
  func.func @transform_0(%arg0: i32, %arg1: i32) -> (i32, i32, i32) {
    %c0_i32 = arith.constant 0 : i32
    %c0_i32_0 = arith.constant 0 : i32
    return %arg0, %arg1, %c0_i32 : i32, i32, i32
  }
  func.func @transform_1(%arg0: i32, %arg1: i32) -> (i32, i32, i32) {
    %c1_i32 = arith.constant 1 : i32
    %0 = arith.minsi %arg1, %c1_i32 : i32
    %c0_i32 = arith.constant 0 : i32
    %c0_i32_0 = arith.constant 0 : i32
    return %arg0, %0, %c0_i32 : i32, i32, i32
  }
  func.func @transform_2(%arg0: i32, %arg1: i32) -> (i32, i32) {
    %c0_i32 = arith.constant 0 : i32
    %c0_i32_0 = arith.constant 0 : i32
    %c0_i32_1 = arith.constant 0 : i32
    return %c0_i32, %c0_i32_0 : i32, i32
  }
  func.func @transform_3(%arg0: i32, %arg1: i32) -> (i32, i32) {
    %c0_i32 = arith.constant 0 : i32
    %c0_i32_0 = arith.constant 0 : i32
    %c0_i32_1 = arith.constant 0 : i32
    return %c0_i32, %c0_i32_0 : i32, i32
  }
  func.func @transform_4(%arg0: i32, %arg1: i32) -> (i32, i32) {
    %c0_i32 = arith.constant 0 : i32
    %c0_i32_0 = arith.constant 0 : i32
    %c0_i32_1 = arith.constant 0 : i32
    return %c0_i32, %c0_i32_0 : i32, i32
  }
  func.func @transform_5(%arg0: i32, %arg1: i32) -> (i32, i32) {
    %c0_i32 = arith.constant 0 : i32
    %c0_i32_0 = arith.constant 0 : i32
    %c0_i32_1 = arith.constant 0 : i32
    return %c0_i32, %c0_i32_0 : i32, i32
  }
  func.func @transform_6(%arg0: i32, %arg1: i32) -> (i32, i32) {
    %c0_i32 = arith.constant 0 : i32
    %c0_i32_0 = arith.constant 0 : i32
    %c0_i32_1 = arith.constant 0 : i32
    return %c0_i32, %c0_i32_0 : i32, i32
  }
  func.func @transform_7(%arg0: i32, %arg1: i32) -> (i32, i32) {
    %c0_i32 = arith.constant 0 : i32
    %c0_i32_0 = arith.constant 0 : i32
    %c0_i32_1 = arith.constant 0 : i32
    return %c0_i32, %c0_i32_0 : i32, i32
  }
  func.func @transform_8(%arg0: i32, %arg1: i32) -> (i32, i32) {
    %c0_i32 = arith.constant 0 : i32
    %c0_i32_0 = arith.constant 0 : i32
    %c0_i32_1 = arith.constant 0 : i32
    return %c0_i32, %c0_i32_0 : i32, i32
  }
  func.func @transform_9(%arg0: i32, %arg1: i32) -> (i32, i32) {
    %c0_i32 = arith.constant 0 : i32
    %c0_i32_0 = arith.constant 0 : i32
    return %arg0, %c0_i32 : i32, i32
  }
}

</mosaic_0001>

<bundles_post_ra>
// kernel: tpu_custom_call.1
= control target key start
LH: loop header
LB: loop body
LE: loop exit
PB: predicated region body
PF: predicated region fallthrough
CT: control target
= control target key end

     0   :  { %s4936_s0 = inlined_call_operand.hbm [shape: f32[2,40,768], index: 0, kind: input, shape index: {}]   ;;  %s4937_s1 = inlined_call_operand.vmem [shape: f32[2,19,768], index: 1, kind: input, shape index: {}]   ;;  %s4938_s2 = inlined_call_operand.hbm [shape: f32[768,512], index: 2, kind: input, shape index: {}]   ;;  %s4939_s3 = inlined_call_operand.hbm [shape: f32[768,512], index: 3, kind: input, shape index: {}]   ;;  %s4940_s4 = inlined_call_operand.hbm [shape: f32[1,512], index: 4, kind: input, shape index: {}]   ;;  %s4941_s5 = inlined_call_operand.hbm [shape: f32[512,256], index: 5, kind: input, shape index: {}]   ;;  %s4942_s6 = inlined_call_operand.hbm [shape: f32[1,256], index: 6, kind: input, shape index: {}]   ;;  %s4943_s7 = inlined_call_operand.hbm [shape: f32[256,128], index: 7, kind: input, shape index: {}]   ;;  %s4944_s8 = inlined_call_operand.hbm [shape: f32[1,128], index: 8, kind: input, shape index: {}]   ;;  %s4945_s9 = inlined_call_operand.hbm [shape: f32[2,128], index: 9, kind: output, shape index: {}]  }
   0x1   :  { %4955 = sst [smem:[#allocation36_spill]] %s4938_s2 }
   0x2   :  { %4956 = sst [smem:[#allocation37_spill]] %s4939_s3 }
   0x3   :  { %4957 = sst [smem:[#allocation38_spill]] %s4940_s4 }
   0x4   :  { %4958 = sst [smem:[#allocation39_spill]] %s4945_s9 }
   0x5   :  { %14 = vsyncpa [#allocation5], 0 }
   0x6   :  { %16 = vsyncpa [#allocation5 + $0x1], 0 }
   0x7   :  { %17 = vsyncpa [#allocation9], 0 }
   0x8   :  { %18 = vsyncpa [#allocation12], 0 }
   0x9   :  { %19 = vsyncpa [#allocation15], 0 }
   0xa   :  { %20 = vsyncpa [#allocation18], 0 }
   0xb   :  { %21 = vsyncpa [#allocation6], 0  ;;  %s4222_s30 = smov 0   ;;  %s4224_s10 = smov 0  }
   0xc   :  { %s4226_s11 = smov 0   ;;  %s4228_s12 = smov 0  }
   0xd   :  { %s4230_s13 = smov 0   ;;  %s4232_s14 = smov 0  }
   0xe   :  { %s4234_s15 = smov 0   ;;  %s4236_s16 = smov 0  }
   0xf LB: > { %4959 = sst [smem:[#allocation28_spill]] %s4090_s30  ;;  %s4946_s17 = sadd.s32 4294967295, %s4118_s16   ;;  %s4118_s16 = sphi %s4236_s16, %s27_s16   ;;  %s4114_s15 = sphi %s4234_s15, %s5014_s15   ;;  %s4110_s14 = sphi %s4232_s14, %s5013_s14   ;;  %s4106_s13 = sphi %s4230_s13, %s5012_s13   ;;  %s4102_s12 = sphi %s4228_s12, %s5011_s12   ;;  %s4098_s11 = sphi %s4226_s11, %s5006_s11   ;;  %s4094_s10 = sphi %s4224_s10, %s5010_s10   ;;  %s4090_s30 = sphi %s4222_s30, %s5009_s30  }
  0x10   : > { %4960 = sst [smem:[#allocation29_spill]] %s4102_s12  ;;  %s36_s18 = sadd.s32 1, %s4114_s15 }
  0x11   : > { %4961 = sst [smem:[#allocation30_spill]] %s4110_s14  ;;  %p37_p0 = scmp.ge.s32.totalorder %s36_s18, 3 }
  0x12   : > { %s48_s19 = sadd.s32 1, %s4106_s13  ;;  %p55_p1 = scmp.ne.s32.totalorder %s4106_s13, %s4102_s12 }
  0x13   : > { %p56_p2 = scmp.eq.s32.totalorder %s4118_s16, 0  ;;  %s5016_s18 = smov (%p37_p0, %s36_s18), 0 }
  0x14   : > { %4962 = sst [smem:[#allocation31_spill]] %s5016_s18  ;;  %p61_p4 = scmp.ne.s32.totalorder %s4102_s12, %s4098_s11 }
  0x15   : > { %p4270_p3 = por %p56_p2, %p55_p1  ;;  %s44_s21 = ssub.s32 %s4114_s15, %s5016_s18 }
  0x16   : > { %p4279_p5 = scmp.eq.s32.totalorder %s4946_s17, 0  ;;  %p46_p6 = scmp.eq.s32.totalorder %s44_s21, 0 }
  0x17   : > { %p71_p7 = scmp.lt.s32.totalorder %s4114_s15, 1  ;;  %p73_p9 = scmp.lt.s32.totalorder %s5016_s18, 1 }
  0x18   : > { %s4964_s22 = scalar_select %p4279_p5, 1, 0 }
  0x19   : > { %p4286_p8 = por %p4279_p5, %p61_p4  ;;  %s80_s27 = sadd.s32 1, %s4094_s10 }
  0x1a   : > { %4965 = sst [smem:[#allocation32_spill]] %s4964_s22  ;;  %p87_p10 = scmp.ne.s32.totalorder %s4094_s10, %s4090_s30 }
  0x1b   : > { %s4966_s23 = scalar_select %p4286_p8, 1, 0 }
  0x1c   : > { %s4292_s24 = scalar_select %p46_p6, %s4106_s13, %s48_s19  }
  0x1d   : > { %4967 = sst [smem:[#allocation33_spill]] %s4966_s23  ;;  %p3478_p11 = scmp.ge.s32.totalorder %s4118_s16, 1 }
  0x1e   : > { %4968 = sst [smem:[#allocation34_spill]] %s4292_s24  ;;  %p4305_p13 = por %p87_p10, %p56_p2 }
  0x1f   : > { %s4295_s25 = scalar_select %p71_p7, %s4114_s15, 1 }
  0x20   : > { %s74_s26 = scalar_select %p73_p9, %s5016_s18, 1 }
  0x21   : > { %p277_p0 = scmp.lt.s32.totalorder %s4118_s16, 4  ;;  %s4972_s2 = sld [smem:[#allocation36_spill]] }
  0x22   : > { %s76_s28 = ssub.s32 %s4295_s25, %s74_s26  ;;  %s4152_s26 = smov [#allocation8]  }
  0x23   : > { %p78_p12 = scmp.eq.s32.totalorder %s76_s28, 0  ;;  %p4313_p1 = pnand %p3478_p11, %p277_p0 }
  0x24   : > { %s290_s28 = sshll.u32 %s4152_s26, 4  ;;  %s4974_s4 = sld [smem:[#allocation38_spill]]  ;;  %s291_s28 = int_to_ptr.vmem [resolvable:$true] %s290_s28 }
  0x25   : > { %s4311_s11 = scalar_select %p78_p12, %s4094_s10, %s80_s27  }
  0x26   : > { %p3565_p4 = pneg %p4313_p1  ;;  %s4153_s17 = smov 512  }
  0x27   : > { %4970 = sst [smem:[#allocation35_spill]] %s4311_s11  ;;  %s288_s18 = sshll.u32 %s4972_s2, 4  ;;  %s289_s18 = int_to_ptr.hbm [resolvable:$true] %s288_s18 }
  0x28   : > { %p4324_p2 = pnand %p3565_p4, %p4279_p5  ;;  %s4154_s21 = smov 32  }
  0x29   : > { %s4155_s2 = smov [#allocation11]   ;;  %s343_s30 = sshll.u32 %s4942_s6, 4  ;;  %s344_s30 = int_to_ptr.hbm [resolvable:$true] %s343_s30 }
  0x2a   : > { %s317_s9 = sshll.u32 %s4974_s4, 4  ;;  %s319_s26 = sshll.u32 %s4155_s2, 4  ;;  %s318_s9 = int_to_ptr.hbm [resolvable:$true] %s317_s9  ;;  %s320_s26 = int_to_ptr.vmem [resolvable:$true] %s319_s26 }
  0x2b   : > { %3568 = dma.hbm_to_vmem [thread:$0]  (!%p4324_p2), %s289_s18, 49152, %s291_s28, [#allocation9], %s4153_s17, %s4153_s17, %s4154_s21  }
  0x2c   : > { %3574 = dma.hbm_to_vmem [thread:$0]  (!%p4324_p2), %s318_s9, 64, %s320_s26, [#allocation12]  }
  0x2d   : > { %s4975_s3 = sld [smem:[#allocation37_spill]]  ;;  %s4156_s23 = smov [#allocation14]  }
  0x2e   : > { %s345_s12 = sshll.u32 %s4156_s23, 4  ;;  %s4157_s2 = smov [#allocation10]   ;;  %s346_s12 = int_to_ptr.vmem [resolvable:$true] %s345_s12 }
  0x2f   : > { %3580 = dma.hbm_to_vmem [thread:$0]  (!%p4324_p2), %s344_s30, 32, %s346_s12, [#allocation15]  }
  0x30   : > { %s304_s18 = sshll.u32 %s4157_s2, 4  ;;  %s328_s28 = sshll.u32 %s4941_s5, 4  ;;  %s305_s18 = int_to_ptr.vmem [resolvable:$true] %s304_s18  ;;  %s329_s28 = int_to_ptr.hbm [resolvable:$true] %s328_s28 }
  0x31   : > { %s4158_s9 = smov [#allocation13]   ;;  %s354_s27 = sshll.u32 %s4943_s7, 4  ;;  %s355_s27 = int_to_ptr.hbm [resolvable:$true] %s354_s27 }
  0x32   : > { %s330_s26 = sshll.u32 %s4158_s9, 4  ;;  %s4159_s30 = smov 256   ;;  %s331_s26 = int_to_ptr.vmem [resolvable:$true] %s330_s26 }
  0x33   : > { %s302_s4 = sshll.u32 %s4975_s3, 4  ;;  %s4160_s12 = smov 16   ;;  %s303_s4 = int_to_ptr.hbm [resolvable:$true] %s302_s4 }
  0x34   : > { %3571 = dma.hbm_to_vmem [thread:$0]  (!%p4324_p2), %s303_s4, 49152, %s305_s18, [#allocation9], %s4153_s17, %s4153_s17, %s4154_s21  }
  0x35   : > { %3577 = dma.hbm_to_vmem [thread:$0]  (!%p4324_p2), %s329_s28, 16384, %s331_s26, [#allocation12], %s4159_s30, %s4159_s30, %s4160_s12  }
  0x36   : > { %s4161_s2 = smov [#allocation16]   ;;  %s4162_s22 = smov 128  }
  0x37   : > { %s356_s14 = sshll.u32 %s4161_s2, 4  ;;  %s4163_s3 = smov 8   ;;  %s357_s14 = int_to_ptr.vmem [resolvable:$true] %s356_s14 }
  0x38   : > { %3583 = dma.hbm_to_vmem [thread:$0]  (!%p4324_p2), %s355_s27, 4096, %s357_s14, [#allocation15], %s4162_s22, %s4162_s22, %s4163_s3  }
  0x39   : > { %s369_s21 = sshll.u32 %s4944_s8, 4  ;;  %s4164_s18 = smov [#allocation17]   ;;  %s370_s21 = int_to_ptr.hbm [resolvable:$true] %s369_s21 }
  0x3a   : > { %s371_s9 = sshll.u32 %s4164_s18, 4  ;;  %p3486_p6 = scmp.ge.s32.totalorder %s4118_s16, 3  ;;  %s372_s9 = int_to_ptr.vmem [resolvable:$true] %s371_s9 }
  0x3b   : > { %3586 = dma.hbm_to_vmem [thread:$0]  (!%p4324_p2), %s370_s21, 16, %s372_s9, [#allocation18]  }
  0x3c   : > { %378 = sbr.rel (%p3486_p6) target bundleno = 156 (0x9c), region = 44 }
  0x41   : > { %381 = sbr.rel (!%p4270_p3) target bundleno = 90 (0x5a), region = 48 }
  0x46   : > { %s382_s28 = sand.u32 1, %s4106_s13   ;;  %s3487_s3 = sshll.u32 %s4114_s15, 1 }
  0x47   : > { %s3526_s26 = smul.u32 192, %s382_s28  ;;  %s389_s23 = ssub.s32 5, %s3487_s3 }
  0x48   : > { %p390_p7 = scmp.lt.s32.totalorder %s389_s23, 2  ;;  %s4368_s30 = scalar_lea.sflag [#allocation5], %s382_s28 }
  0x49   : > { %s386_s12 = scalar_lea.vmem [#allocation4], %s3526_s26 }
  0x4a   : > { %s5018_s23 = smov (!%p390_p7, %s389_s23), 2 }
  0x4b   : > { %s3489_s11 = smul.u32 96, %s5018_s23 }
  0x4d   : > { %s394_s27 = ssub.s32 192, %s3489_s11 }
  0x4e   : > { %s395_s24 = sshll.u32 %s394_s27, 4 }
  0x4f   : > { %396 = vsyncadd %s4368_s30, %s395_s24  ;;  %p4371_p3 = scmp.ne.s32.totalorder %s3489_s11, 0  ;;  %s3527_s2 = smul.u32 96, %s4114_s15 }
  0x50   : > { %s409_s14 = sld [smem:[#allocation0]]   ;;  %s419_s22 = sshll.u32 %s386_s12, 4  ;;  %s420_s22 = int_to_ptr.vmem [resolvable:$true] %s419_s22 }
  0x51   : > { %s402_s21 = scalar_lea.hbm %s4936_s0, %s3527_s2  ;;  %s3496_s9 = smul.u32 1536, %s5018_s23 }
  0x52   : > { %s417_s18 = sshll.u32 %s402_s21, 4  ;;  %s4165_s28 = smov 3840   ;;  %s418_s18 = int_to_ptr.hbm [resolvable:$true] %s417_s18 }
  0x53   : > { %426 = sst [smem:[#allocation21]] %s4165_s28  ;;  %s4166_s3 = smov 1536  }
  0x54   : > { %428 = sst [smem:[#allocation21 + $0x1]] %s4166_s3  ;;  %s4167_s27 = smov 768  }
  0x55   : > { %430 = sst [smem:[#allocation21 + $0x2]] %s5018_s23  ;;  %s4168_s24 = smov 48  }
  0x56   : > { %s3494_s26 = sshll.u32 %s409_s14, 26  ;;  %432 = sst [smem:[#allocation21 + $0x3]] %s4167_s27 }
  0x57   : > { %s3495_s11 = sadd.s32 134217728, %s3494_s26  ;;  %434 = sst [smem:[#allocation21 + $0x4]] %s4167_s27 }
  0x58   : > { %436 = sst [smem:[#allocation21 + $0x5]] %s4168_s24  ;;  %s4169_s12 = smov [#allocation20]  }
  0x59   : > { %438 = dma.general (%p4371_p3), %s418_s18, %s3496_s9, %s420_s22, %s4368_s30, %s4169_s12, [#allocation21], %s3495_s11, 0  }
  0x5a PF: > { %441 = sbr.rel (!%p4305_p13) target bundleno = 156 (0x9c), region = 52  ;;  %s443_s2 = sand.u32 (%p4305_p13), 1, %s4094_s10  }
  0x5b   : > { %s3497_s4 = sshll.u32 (%p4305_p13), %s4295_s25, 1  ;;  %s3528_s14 = smul.u32 (%p4305_p13), 192, %s443_s2 }
  0x5c   : > { %s450_s23 = ssub.s32 (%p4305_p13), 3, %s3497_s4  ;;  %s3529_s17 = smul.u32 (%p4305_p13), 96, %s4295_s25 }
  0x5d   : > { %p451_p9 = scmp.lt.s32.totalorder (%p4305_p13), %s450_s23, 2  ;;  %s4397_s29 = scalar_lea.vmem (%p4305_p13), [#allocation7], %s3528_s14  }
  0x5e   : > { %s4394_s30 = scalar_lea.vmem (%p4305_p13), %s4937_s1, %s3529_s17  }
  0x5f   : > { %s5020_s23 = smov (!%p451_p9, %s450_s23), 2 }
  0x60   : > { %s3499_s20 = smul.u32 96, %s5020_s23 }
  0x62   : > { %p3503_p10 = scmp.eq.s32.totalorder %s3499_s20, 0 }
  0x63   : > { %s4400_s22 = sshrl.u32 (!%p3503_p10), %s5020_s23, 1 }
  0x64   : > { %463 = sbr.rel (%p3503_p10) target bundleno = 156 (0x9c), region = 56  ;;  %p3504_p11 = scmp.le.s32.totalorder (!%p3503_p10), %s4400_s22, 0 }
  0x69   : > { %3356 = sbr.rel (%p3504_p11) target bundleno = 135 (0x87), region = 175  ;;  %s4977_s25 = smov (!%p3504_p11), %s4397_s29 }
  0x6a   : > { %s4978_s18 = smov (!%p3504_p11), %s4394_s30  ;;  %s4409_s9 = smov (!%p3504_p11), 0  }
  0x6b   : > { %s4411_s3 = smov (!%p3504_p11), 0  }
  0x6e LB: >> { %v476_v0 = vld [vmem:[%s4126_s18] sm:$0xff]  ;;  %v478_v1 = vld [vmem:[%s4126_s18 + $0x30] sm:$0xff]  ;;  %v480_v2 = vld [vmem:[%s4126_s18 + $0x8] sm:$0xff]  ;;  %s524_s26 = sadd.s32 1, %s4130_s9  ;;  %s470_s3 = sadd.s32 1, %s4134_s3   ;;  %s4134_s3 = sphi %s4411_s3, %s470_s3   ;;  %s4130_s9 = sphi %s4409_s9, %s4981_s9   ;;  %s4126_s18 = sphi %s4978_s18, %s4980_s18   ;;  %s4122_s25 = sphi %s4977_s25, %s4979_s25  }
  0x6f   : >> { %477 = vst [vmem:[%s4122_s25] sm:$0xff] %v476_v0  ;;  %v482_v3 = vld [vmem:[%s4126_s18 + $0x38] sm:$0xff]  ;;  %p525_p12 = scmp.ge.s32.totalorder %s524_s26, %s4400_s22  ;;  %v484_v4 = vld [vmem:[%s4126_s18 + $0x10] sm:$0xff]  ;;  %v486_v5 = vld [vmem:[%s4126_s18 + $0x40] sm:$0xff]  ;;  %p469_p13 = scmp.ge.s32.totalorder %s470_s3, %s4400_s22 }
  0x70   : >> { %479 = vst [vmem:[%s4122_s25 + $0x30] sm:$0xff] %v478_v1  ;;  %v488_v6 = vld [vmem:[%s4126_s18 + $0x18] sm:$0xff]  ;;  %v490_v7 = vld [vmem:[%s4126_s18 + $0x48] sm:$0xff]  ;;  %v492_v8 = vld [vmem:[%s4126_s18 + $0x20] sm:$0xff] }
  0x71   : >> { %481 = vst [vmem:[%s4122_s25 + $0x8] sm:$0xff] %v480_v2  ;;  %s5022_s26 = smov (%p525_p12, %s524_s26), 0  ;;  %v494_v9 = vld [vmem:[%s4126_s18 + $0x50] sm:$0xff]  ;;  %v496_v10 = vld [vmem:[%s4126_s18 + $0x28] sm:$0xff]  ;;  %v498_v11 = vld [vmem:[%s4126_s18 + $0x58] sm:$0xff] }
  0x72   : >> { %483 = vst [vmem:[%s4122_s25 + $0x38] sm:$0xff] %v482_v3  ;;  %s527_s11 = smul.u32 96, %s5022_s26  ;;  %v500_v12 = vld [vmem:[%s4126_s18 + $0x90] sm:$0xff]  ;;  %v502_v13 = vld [vmem:[%s4126_s18 + $0xc0] sm:$0xff]  ;;  %v504_v14 = vld [vmem:[%s4126_s18 + $0x98] sm:$0xff]  ;;  %s4981_s9 = smov %s5022_s26 }
  0x73   : >> { %485 = vst [vmem:[%s4122_s25 + $0x10] sm:$0xff] %v484_v4  ;;  %v506_v15 = vld [vmem:[%s4126_s18 + $0xc8] sm:$0xff]  ;;  %v508_v16 = vld [vmem:[%s4126_s18 + $0xa0] sm:$0xff]  ;;  %v510_v17 = vld [vmem:[%s4126_s18 + $0xd0] sm:$0xff] }
  0x74   : >> { %487 = vst [vmem:[%s4122_s25 + $0x40] sm:$0xff] %v486_v5  ;;  %s4445_s27 = scalar_lea.vmem %s4394_s30, %s527_s11   ;;  %s4448_s24 = scalar_lea.vmem %s4397_s29, %s527_s11 [#allocation7]   ;;  %v512_v18 = vld [vmem:[%s4126_s18 + $0xa8] sm:$0xff]  ;;  %v514_v19 = vld [vmem:[%s4126_s18 + $0xd8] sm:$0xff]  ;;  %v516_v20 = vld [vmem:[%s4126_s18 + $0xb0] sm:$0xff] }
  0x75   : >> { %489 = vst [vmem:[%s4122_s25 + $0x18] sm:$0xff] %v488_v6  ;;  %v518_v21 = vld [vmem:[%s4126_s18 + $0xe0] sm:$0xff]  ;;  %v520_v22 = vld [vmem:[%s4126_s18 + $0xb8] sm:$0xff]  ;;  %v522_v23 = vld [vmem:[%s4126_s18 + $0xe8] sm:$0xff]  ;;  %s4980_s18 = smov %s4445_s27 }
  0x76   : >> { %491 = vst [vmem:[%s4122_s25 + $0x48] sm:$0xff] %v490_v7 }
  0x77   : >> { %493 = vst [vmem:[%s4122_s25 + $0x20] sm:$0xff] %v492_v8 }
  0x78   : >> { %495 = vst [vmem:[%s4122_s25 + $0x50] sm:$0xff] %v494_v9 }
  0x79   : >> { %497 = vst [vmem:[%s4122_s25 + $0x28] sm:$0xff] %v496_v10 }
  0x7a   : >> { %499 = vst [vmem:[%s4122_s25 + $0x58] sm:$0xff] %v498_v11 }
  0x7b   : >> { %501 = vst [vmem:[%s4122_s25 + $0x60] sm:$0xff] %v500_v12 }
  0x7c   : >> { %503 = vst [vmem:[%s4122_s25 + $0x90] sm:$0xff] %v502_v13 }
  0x7d   : >> { %505 = vst [vmem:[%s4122_s25 + $0x68] sm:$0xff] %v504_v14 }
  0x7e   : >> { %507 = vst [vmem:[%s4122_s25 + $0x98] sm:$0xff] %v506_v15 }
  0x7f   : >> { %509 = vst [vmem:[%s4122_s25 + $0x70] sm:$0xff] %v508_v16 }
  0x80   : >> { %511 = vst [vmem:[%s4122_s25 + $0xa0] sm:$0xff] %v510_v17 }
  0x81   : >> { %513 = vst [vmem:[%s4122_s25 + $0x78] sm:$0xff] %v512_v18 }
  0x82   : >> { %515 = vst [vmem:[%s4122_s25 + $0xa8] sm:$0xff] %v514_v19  ;;  %472 = sbr.rel (!%p469_p13) target bundleno = 110 (0x6e), region = 181 }
  0x83   : >> { %517 = vst [vmem:[%s4122_s25 + $0x80] sm:$0xff] %v516_v20 }
  0x84   : >> { %519 = vst [vmem:[%s4122_s25 + $0xb0] sm:$0xff] %v518_v21 }
  0x85   : >> { %521 = vst [vmem:[%s4122_s25 + $0x88] sm:$0xff] %v520_v22 }
  0x86   : >> { %523 = vst [vmem:[%s4122_s25 + $0xb8] sm:$0xff] %v522_v23  ;;  %s4979_s25 = smov %s4448_s24 }
  0x87 PF: > { %s4495_s12 = sand.u32 1, %s5020_s23   ;;  %s3506_s2 = smul.u32 96, %s4400_s22 }
  0x88   : > { %p3508_p0 = scmp.le.s32.totalorder %s4495_s12, 0 }
  0x89   : > { %s4499_s4 = scalar_lea.vmem %s4394_s30, %s3506_s2   ;;  %s4502_s14 = scalar_lea.vmem %s4397_s29, %s3506_s2 [#allocation7]  }
  0x8a   : > { %3370 = sbr.rel (%p3508_p0) target bundleno = 156 (0x9c), region = 186  ;;  %s4982_s17 = smov (!%p3508_p0), %s4502_s14 }
  0x8b   : > { %s4983_s21 = smov (!%p3508_p0), %s4499_s4  ;;  %s4511_s28 = smov (!%p3508_p0), 0  }
  0x8c   : > { %s4513_s20 = smov (!%p3508_p0), 0  }
  0x8f LB: >> { %v547_v24 = vld [vmem:[%s4142_s21] sm:$0xff]  ;;  %v549_v25 = vld [vmem:[%s4142_s21 + $0x8] sm:$0xff]  ;;  %v551_v26 = vld [vmem:[%s4142_s21 + $0x10] sm:$0xff]  ;;  %s571_s23 = sadd.s32 1, %s4146_s28  ;;  %s541_s20 = sadd.s32 1, %s4150_s20   ;;  %s4150_s20 = sphi %s4513_s20, %s541_s20   ;;  %s4146_s28 = sphi %s4511_s28, %s4986_s28   ;;  %s4142_s21 = sphi %s4983_s21, %s4985_s21   ;;  %s4138_s17 = sphi %s4982_s17, %s4984_s17  }
  0x90   : >> { %548 = vst [vmem:[%s4138_s17] sm:$0xff] %v547_v24  ;;  %v553_v27 = vld [vmem:[%s4142_s21 + $0x18] sm:$0xff]  ;;  %p572_p4 = scmp.ge.s32.totalorder %s571_s23, %s4495_s12  ;;  %v555_v28 = vld [vmem:[%s4142_s21 + $0x20] sm:$0xff]  ;;  %v557_v29 = vld [vmem:[%s4142_s21 + $0x28] sm:$0xff]  ;;  %p540_p2 = scmp.ge.s32.totalorder %s541_s20, %s4495_s12 }
  0x91   : >> { %550 = vst [vmem:[%s4138_s17 + $0x8] sm:$0xff] %v549_v25  ;;  %v559_v30 = vld [vmem:[%s4142_s21 + $0x90] sm:$0xff]  ;;  %v561_v31 = vld [vmem:[%s4142_s21 + $0x98] sm:$0xff]  ;;  %v563_v32 = vld [vmem:[%s4142_s21 + $0xa0] sm:$0xff] }
  0x92   : >> { %552 = vst [vmem:[%s4138_s17 + $0x10] sm:$0xff] %v551_v26  ;;  %s5024_s23 = smov (%p572_p4, %s571_s23), 0  ;;  %v565_v33 = vld [vmem:[%s4142_s21 + $0xa8] sm:$0xff]  ;;  %v567_v34 = vld [vmem:[%s4142_s21 + $0xb0] sm:$0xff]  ;;  %v569_v35 = vld [vmem:[%s4142_s21 + $0xb8] sm:$0xff] }
  0x93   : >> { %554 = vst [vmem:[%s4138_s17 + $0x18] sm:$0xff] %v553_v27  ;;  %s574_s30 = smul.u32 48, %s5024_s23  ;;  %s4986_s28 = smov %s5024_s23 }
  0x94   : >> { %556 = vst [vmem:[%s4138_s17 + $0x20] sm:$0xff] %v555_v28 }
  0x95   : >> { %558 = vst [vmem:[%s4138_s17 + $0x28] sm:$0xff] %v557_v29  ;;  %s576_s29 = scalar_lea.vmem %s4499_s4, %s574_s30   ;;  %s577_s22 = scalar_lea.vmem %s4502_s14, %s574_s30 [#allocation7]  }
  0x96   : >> { %560 = vst [vmem:[%s4138_s17 + $0x60] sm:$0xff] %v559_v30  ;;  %s4985_s21 = smov %s576_s29 }
  0x97   : >> { %562 = vst [vmem:[%s4138_s17 + $0x68] sm:$0xff] %v561_v31  ;;  %543 = sbr.rel (!%p540_p2) target bundleno = 143 (0x8f), region = 192 }
  0x98   : >> { %564 = vst [vmem:[%s4138_s17 + $0x70] sm:$0xff] %v563_v32 }
  0x99   : >> { %566 = vst [vmem:[%s4138_s17 + $0x78] sm:$0xff] %v565_v33 }
  0x9a   : >> { %568 = vst [vmem:[%s4138_s17 + $0x80] sm:$0xff] %v567_v34 }
  0x9b   : >> { %570 = vst [vmem:[%s4138_s17 + $0x88] sm:$0xff] %v569_v35  ;;  %s4984_s17 = smov %s577_s22 }
  0x9c PF: > { %586 = sbr.rel (%p4313_p1) target bundleno = 1226 (0x4ca), region = 82  ;;  %s4987_s25 = sld [smem:[#allocation29_spill]] (!%p4313_p1) }
  0xa2   : > { %s588_s9 = sand.u32 1, %s4987_s25  }
  0xa3   : > { %s3530_s3 = smul.u32 192, %s588_s9  ;;  %s589_s26 = scalar_lea.sflag [#allocation5], %s588_s9 }
  0xa5   : > { %s4551_s11 = scalar_lea.vmem [#allocation4], %s3530_s3 }
  0xa6   : > { %4065 = dma.done.wait (%p4286_p8), %s589_s26, 3072  }
  0xa7   : > { %4067 = vsyncadd (%p4286_p8), %s589_s26, 4294964224  ;;  %s4989_s27 = sld [smem:[#allocation28_spill]] }
  0xad   : > { %s599_s12 = sand.u32 1, %s4989_s27  }
  0xae   : > { %s3531_s2 = smul.u32 192, %s599_s12 }
  0xb0   : > { %s4558_s4 = scalar_lea.vmem [#allocation7], %s3531_s2 }
  0xb1   : > { %4069 = dma.done.wait (%p4279_p5), [#allocation9], 98304  }
  0xb2   : > { %4071 = vsyncadd (%p4279_p5), [#allocation9], 4294868992 }
  0xb3   : > { %4073 = dma.done.wait (%p4279_p5), [#allocation12], 16448  }
  0xb4   : > { %4075 = vsyncadd (%p4279_p5), [#allocation12], 4294950848 }
  0xb5   : > { %4077 = dma.done.wait (%p4279_p5), [#allocation15], 4128  }
  0xb6   : > { %4079 = vsyncadd (%p4279_p5), [#allocation15], 4294963168 }
  0xb7   : > { %4081 = dma.done.wait (%p4279_p5), [#allocation18], 16  }
  0xb8   : > { %4083 = vsyncadd (%p4279_p5), [#allocation18], 4294967280  ;;  %s4991_s19 = sld [smem:[#allocation30_spill]] }
  0xbe   : > { %p3517_p8 = scmp.ne.s32.totalorder %s4991_s19, 0 }
  0xc0   : > { %688 = sbr.rel (%p3517_p8) target bundleno = 202 (0xca), region = 122 }
  0xc5   : > { %v4170_v36 = vmov 0.0  }
  0xc6   : > { %689 = vst [vmem:[#allocation2] sm:$0xff] %v4170_v36 }
  0xc7   : > { %690 = vst [vmem:[#allocation2 + $0x8] sm:$0xf] %v4170_v36 }
  0xc8   : > { %691 = vst [vmem:[#allocation3] sm:$0xff] %v4170_v36 }
  0xc9   : > { %692 = vst [vmem:[#allocation3 + $0x8] sm:$0xf] %v4170_v36 }
  0xca PF: > { %s4992_s14 = sld [smem:[#allocation30_spill]]  ;;  %v719_v37 = vlaneseq  ;;  %v693_v38 = vld [vmem:[%s4551_s11] sm:$0xff]  ;;  %v694_v41 = vld [vmem:[%s4551_s11 + $0x8] sm:$0xff]  ;;  %v695_v42 = vld [vmem:[%s4551_s11 + $0x10] sm:$0xff]  ;;  %vm855_vm2 = vcmask 1041408   ;;  %vm857_vm3 = vcmask 1045508  }
  0xcb   : > { %v696_v43 = vld [vmem:[%s4551_s11 + $0x18] sm:$0xff]  ;;  %v697_v44 = vld [vmem:[%s4551_s11 + $0x20] sm:$0xff]  ;;  %v698_v45 = vld [vmem:[%s4551_s11 + $0x28] sm:$0xff]  ;;  %vm859_vm4 = vcmask 1043456   ;;  %vm871_vm5 = vcmask 1041409   ;;  %vm873_vm6 = vcmask 1043459  }
  0xcc   : > { %v4581_v39 = vshrl.u32 %v719_v37, 7  ;;  %v699_v46 = vld [vmem:[%s4551_s11 + $0x30] sm:$0xff]  ;;  %v700_v48 = vld [vmem:[%s4551_s11 + $0x38] sm:$0xff]  ;;  %v701_v49 = vld [vmem:[%s4551_s11 + $0x40] sm:$0xff]  ;;  %vm875_vm7 = vcmask 1045509   ;;  %vm877_vm8 = vcmask 1047559  }
  0xcd   : > { %v702_v50 = vld [vmem:[%s4551_s11 + $0x48] sm:$0xff]  ;;  %v703_v52 = vld [vmem:[%s4551_s11 + $0x50] sm:$0xff]  ;;  %v704_v53 = vld [vmem:[%s4551_s11 + $0x58] sm:$0xff] }
  0xce   : > { %v4590_v47 = vadd.s32 8, %v4581_v39  ;;  %v705_v54 = vld [vmem:[%s4551_s11 + $0x60] sm:$0xff]  ;;  %v706_v56 = vld [vmem:[%s4551_s11 + $0x68] sm:$0xff]  ;;  %v711_v57 = vld [vmem:[%s4551_s11 + $0x90] sm:$0xff] }
  0xcf   : > { %v712_v58 = vld [vmem:[%s4551_s11 + $0x98] sm:$0xff]  ;;  %v707_v29 = vld [vmem:[%s4551_s11 + $0x70] sm:$0xff]  ;;  %v709_v31 = vld [vmem:[%s4551_s11 + $0x80] sm:$0xff] }
  0xd0   : > { %s3518_s17 = sshll.u32 %s4992_s14, 4  ;;  %v708_v30 = vld [vmem:[%s4551_s11 + $0x78] sm:$0xff]  ;;  %v710_v36 = vld [vmem:[%s4551_s11 + $0x88] sm:$0xff]  ;;  %p3519_p5 = scmp.ge.s32.totalorder %s4992_s14, 2 }
  0xd1   : > { %s718_s21 = ssub.s32 40, %s3518_s17  ;;  %s920_s20 = ssub.s32 (!%p3519_p5), 19, %s3518_s17 }
  0xd2   : > { %v722_v40 = vstv %s718_s21 }
  0xd3   : > { %vm4596_vm0 = vcmp.lt.s32.totalorder %v4581_v39, %v722_v40  ;;  %vm4609_vm1 = vcmp.lt.s32.totalorder %v4590_v47, %v722_v40  ;;  %v714_v40 = vld [vmem:[%s4551_s11 + $0xa8] sm:$0xff] }
  0xd4   : > { %v725_v55 = vsel %vm4596_vm0, %v693_v38, 0.0  ;;  %v726_v60 = vsel %vm4596_vm0, %v694_v41, 0.0  ;;  %v727_v61 = vsel %vm4596_vm0, %v695_v42, 0.0  ;;  %v728_v62 = vsel %vm4596_vm0, %v696_v43, 0.0  ;;  %v713_v38 = vld [vmem:[%s4551_s11 + $0xa0] sm:$0xff]  ;;  %v715_v41 = vld [vmem:[%s4551_s11 + $0xb0] sm:$0xff] }
  0xd5   : > { %v729_v63 = vsel %vm4596_vm0, %v697_v44, 0.0  ;;  %v730_v0 = vsel %vm4596_vm0, %v698_v45, 0.0  ;;  %v731_v1 = vsel %vm4609_vm1, %v699_v46, 0.0  ;;  %v732_v2 = vsel %vm4609_vm1, %v700_v48, 0.0  ;;  %v716_v45 = vld [vmem:[%s4551_s11 + $0xb8] sm:$0xff] }
  0xd6   : > { %v733_v3 = vsel %vm4609_vm1, %v701_v49, 0.0  ;;  %v734_v4 = vsel %vm4609_vm1, %v702_v50, 0.0  ;;  %v735_v5 = vsel %vm4609_vm1, %v703_v52, 0.0  ;;  %v736_v6 = vsel %vm4609_vm1, %v704_v53, 0.0 }
  0xd7   : > { %v737_v7 = vsel %vm4596_vm0, %v705_v54, 0.0  ;;  %v738_v8 = vsel %vm4596_vm0, %v706_v56, 0.0  ;;  %v743_v9 = vsel %vm4609_vm1, %v711_v57, 0.0  ;;  %v744_v10 = vsel %vm4609_vm1, %v712_v58, 0.0 }
  0xd8   : > { %v751_v11 = vadd.f32 %v731_v1, %v725_v55  ;;  %v758_v12 = vadd.f32 %v732_v2, %v726_v60  ;;  %v765_v13 = vadd.f32 %v733_v3, %v727_v61  ;;  %v772_v14 = vadd.f32 %v734_v4, %v728_v62 }
  0xd9   : > { %v779_v15 = vadd.f32 %v735_v5, %v729_v63  ;;  %v786_v17 = vadd.f32 %v736_v6, %v730_v0  ;;  %v793_v18 = vadd.f32 %v743_v9, %v737_v7  ;;  %v800_v19 = vadd.f32 %v744_v10, %v738_v8 }
  0xda   : > { %v752_v16 = vrot.slane %v751_v11, 4  ;;  %v759_v20 = vrot.slane %v758_v12, 4  ;;  %v766_v21 = vrot.slane %v765_v13, 4  ;;  %v773_v22 = vrot.slane %v772_v14, 4 }
  0xdb   : > { %v787_v23 = vrot.slane %v786_v17, 4  ;;  %v794_v24 = vrot.slane %v793_v18, 4  ;;  %v801_v25 = vrot.slane %v800_v19, 4  ;;  %v780_v33 = vrot.slane %v779_v15, 4 }
  0xdc   : > { %v760_v26 = vadd.f32 %v759_v20, %v758_v12  ;;  %v767_v27 = vadd.f32 %v766_v21, %v765_v13  ;;  %v774_v28 = vadd.f32 %v773_v22, %v772_v14  ;;  %v753_v32 = vadd.f32 %v752_v16, %v751_v11 }
  0xdd   : > { %v788_v34 = vadd.f32 %v787_v23, %v786_v17  ;;  %v802_v35 = vadd.f32 %v801_v25, %v800_v19  ;;  %v795_v37 = vadd.f32 %v794_v24, %v793_v18  ;;  %v739_v46 = vsel %vm4596_vm0, %v707_v29, 0.0 }
  0xde   : > { %v761_v42 = vrot.slane %v760_v26, 2  ;;  %v768_v43 = vrot.slane %v767_v27, 2  ;;  %v775_v44 = vrot.slane %v774_v28, 2  ;;  %v740_v48 = vsel %vm4596_vm0, %v708_v30, 0.0 }
  0xdf   : > { %v741_v49 = vsel %vm4596_vm0, %v709_v31, 0.0  ;;  %v803_v50 = vrot.slane %v802_v35, 2  ;;  %v742_v52 = vsel %vm4596_vm0, %v710_v36, 0.0  ;;  %v754_v53 = vrot.slane %v753_v32, 2 }
  0xe0   : > { %v781_v54 = vadd.f32 %v780_v33, %v779_v15  ;;  %v789_v55 = vrot.slane %v788_v34, 2  ;;  %v745_v56 = vsel %vm4609_vm1, %v713_v38, 0.0  ;;  %v746_v57 = vsel %vm4609_vm1, %v714_v40, 0.0 }
  0xe1   : > { %v747_v58 = vsel %vm4609_vm1, %v715_v41, 0.0  ;;  %v796_v60 = vrot.slane %v795_v37, 2  ;;  %v748_v61 = vsel %vm4609_vm1, %v716_v45, 0.0  ;;  %v762_v62 = vadd.f32 %v761_v42, %v760_v26 }
  0xe2   : > { %v769_v63 = vadd.f32 %v768_v43, %v767_v27  ;;  %v776_v51 = vadd.f32 %v775_v44, %v774_v28  ;;  %v804_v0 = vadd.f32 %v803_v50, %v802_v35  ;;  %v755_v1 = vadd.f32 %v754_v53, %v753_v32 }
  0xe3   : > { %v782_v2 = vrot.slane %v781_v54, 2  ;;  %v790_v3 = vadd.f32 %v789_v55, %v788_v34  ;;  %v807_v4 = vadd.f32 %v745_v56, %v739_v46  ;;  %v797_v5 = vadd.f32 %v796_v60, %v795_v37 }
  0xe4   : > { %v814_v6 = vadd.f32 %v746_v57, %v740_v48  ;;  %v821_v7 = vadd.f32 %v747_v58, %v741_v49  ;;  %v828_v8 = vadd.f32 %v748_v61, %v742_v52  ;;  %v763_v9 = vrot.slane %v762_v62, 1 }
  0xe5   : > { %v770_v10 = vrot.slane %v769_v63, 1  ;;  %v777_v11 = vrot.slane %v776_v51, 1  ;;  %v808_v12 = vrot.slane %v807_v4, 4  ;;  %v805_v13 = vrot.slane %v804_v0, 1 }
  0xe6   : > { %v815_v14 = vrot.slane %v814_v6, 4  ;;  %v822_v59 = vrot.slane %v821_v7, 4  ;;  %v829_v15 = vrot.slane %v828_v8, 4  ;;  %v756_v16 = vrot.slane %v755_v1, 1 }
  0xe7   : > { %v783_v17 = vadd.f32 %v782_v2, %v781_v54  ;;  %v791_v18 = vrot.slane %v790_v3, 1  ;;  %v809_v19 = vadd.f32 %v808_v12, %v807_v4  ;;  %v798_v20 = vrot.slane %v797_v5, 1 }
  0xe8   : > { %v816_v21 = vadd.f32 %v815_v14, %v814_v6  ;;  %v823_v22 = vadd.f32 %v822_v59, %v821_v7  ;;  %v830_v23 = vadd.f32 %v829_v15, %v828_v8  ;;  %v764_v24 = vadd.f32 %v763_v9, %v762_v62  ;;  %v750_v7 = vld [vmem:[#allocation2 + $0x8] sm:$0xf] }
  0xe9   : > { %v771_v25 = vadd.f32 %v770_v10, %v769_v63  ;;  %v778_v26 = vadd.f32 %v777_v11, %v776_v51  ;;  %v810_v27 = vrot.slane %v809_v19, 2  ;;  %v806_v28 = vadd.f32 %v805_v13, %v804_v0  ;;  %v749_v10 = vld [vmem:[#allocation2] sm:$0xff] }
  0xea   : > { %v817_v29 = vrot.slane %v816_v21, 2  ;;  %v824_v30 = vrot.slane %v823_v22, 2  ;;  %v831_v31 = vrot.slane %v830_v23, 2  ;;  %v757_v32 = vadd.f32 %v756_v16, %v755_v1 }
  0xeb   : > { %v784_v33 = vrot.slane %v783_v17, 1  ;;  %v792_v34 = vadd.f32 %v791_v18, %v790_v3  ;;  %v811_v35 = vadd.f32 %v810_v27, %v809_v19  ;;  %v799_v36 = vadd.f32 %v798_v20, %v797_v5 }
  0xec   : > { %v818_v37 = vadd.f32 %v817_v29, %v816_v21  ;;  %v825_v38 = vadd.f32 %v824_v30, %v823_v22  ;;  %v832_v40 = vadd.f32 %v831_v31, %v830_v23  ;;  %v847_v42 = vrot.slane %v764_v24, 6 }
  0xed   : > { %v812_v41 = vrot.slane %v811_v35, 1  ;;  %v848_v43 = vrot.slane %v771_v25, 4  ;;  %v849_v44 = vrot.slane %v778_v26, 2  ;;  %v851_v49 = vrot.slane %v806_v28, 6 }
  0xee   : > { %v819_v45 = vrot.slane %v818_v37, 1  ;;  %v826_v46 = vrot.slane %v825_v38, 1  ;;  %v833_v48 = vrot.slane %v832_v40, 1  ;;  %v785_v50 = vadd.f32 %v784_v33, %v783_v17 }
  0xef   : > { %v813_v52 = vadd.f32 %v812_v41, %v811_v35  ;;  %v850_v56 = vrot.slane %v792_v34, 6  ;;  %v856_v58 = vsel %vm855_vm2, %v757_v32, %v847_v42  ;;  %v858_v62 = vsel %vm857_vm3, %v848_v43, %v849_v44 }
  0xf0   : > { %v820_v53 = vadd.f32 %v819_v45, %v818_v37  ;;  %v827_v54 = vadd.f32 %v826_v46, %v825_v38  ;;  %v834_v55 = vadd.f32 %v833_v48, %v832_v40  ;;  %v862_v63 = vsel %vm855_vm2, %v799_v36, %v851_v49 }
  0xf1   : > { %v852_v57 = vrot.slane %v813_v52, 4  ;;  %v861_v51 = vsel %vm855_vm2, %v785_v50, %v850_v56  ;;  %v860_v2 = vsel %vm859_vm4, %v856_v58, %v858_v62 }
  0xf2   : > { %v853_v60 = vrot.slane %v820_v53, 2  ;;  %v854_v61 = vrot.slane %v834_v55, 6 }
  0xf4   : > { %v863_v0 = vsel %vm857_vm3, %v852_v57, %v853_v60  ;;  %v865_v1 = vsel %vm855_vm2, %v827_v54, %v854_v61 }
  0xf5   : > { %v864_v3 = vsel %vm859_vm4, %v862_v63, %v863_v0  ;;  %v881_v4 = vrot.slane %v865_v1, 7 }
  0xf6   : > { %v870_v5 = vrot.slane %v864_v3, 7 }
  0xf7   : > { %v882_v6 = vsel %vm871_vm5, %v881_v4, %v861_v51 }
  0xf8   : > { %v872_v8 = vsel %vm871_vm5, %v870_v5, %v860_v2  ;;  %v883_v9 = vsel %vm873_vm6, %v881_v4, %v882_v6 }
  0xf9   : > { %v874_v11 = vsel %vm873_vm6, %v870_v5, %v872_v8  ;;  %v884_v12 = vsel %vm875_vm7, %v881_v4, %v883_v9 }
  0xfa   : > { %v876_v13 = vsel %vm875_vm7, %v870_v5, %v874_v11  ;;  %v885_v14 = vsel %vm877_vm8, %v881_v4, %v884_v12  ;;  %895 = sbr.rel (%p3519_p5) target bundleno = 301 (0x12d), region = 126 }
  0xfb   : > { %v878_v59 = vsel %vm877_vm8, %v870_v5, %v876_v13  ;;  %v889_v15 = vadd.f32 %v885_v14, %v750_v7 }
  0xfc   : > { %v888_v16 = vadd.f32 %v878_v59, %v749_v10 }
  0xfd   : > { %891 = vst [vmem:[#allocation2 + $0x8] sm:$0xf] %v889_v15 }
  0xfe   : > { %890 = vst [vmem:[#allocation2] sm:$0xff] %v888_v16 }
  0xff   : > { %v896_v17 = vld [vmem:[%s4558_s4] sm:$0xff]  ;;  %v897_v18 = vld [vmem:[%s4558_s4 + $0x8] sm:$0xff]  ;;  %v921_v19 = vstv %s920_s20  ;;  %v902_v20 = vld [vmem:[%s4558_s4 + $0x30] sm:$0xff] }
 0x100   : > { %v903_v21 = vld [vmem:[%s4558_s4 + $0x38] sm:$0xff]  ;;  %vm4691_vm9 = vcmp.lt.s32.totalorder %v4581_v39, %v921_v19  ;;  %v898_v23 = vld [vmem:[%s4558_s4 + $0x10] sm:$0xff]  ;;  %v900_v26 = vld [vmem:[%s4558_s4 + $0x20] sm:$0xff]  ;;  %vm4704_vm10 = vcmp.lt.s32.totalorder %v4590_v47, %v921_v19 }
 0x101   : > { %v899_v24 = vld [vmem:[%s4558_s4 + $0x18] sm:$0xff]  ;;  %v924_v25 = vsel %vm4691_vm9, %v896_v17, 0.0  ;;  %v901_v27 = vld [vmem:[%s4558_s4 + $0x28] sm:$0xff]  ;;  %v904_v28 = vld [vmem:[%s4558_s4 + $0x40] sm:$0xff]  ;;  %v925_v39 = vsel %vm4691_vm9, %v897_v18, 0.0  ;;  %v930_v34 = vsel %vm4704_vm10, %v902_v20, 0.0 }
 0x102   : > { %v905_v29 = vld [vmem:[%s4558_s4 + $0x48] sm:$0xff]  ;;  %v906_v31 = vld [vmem:[%s4558_s4 + $0x50] sm:$0xff]  ;;  %v907_v32 = vld [vmem:[%s4558_s4 + $0x58] sm:$0xff]  ;;  %v931_v35 = vsel %vm4704_vm10, %v903_v21, 0.0  ;;  %v926_v47 = vsel %vm4691_vm9, %v898_v23, 0.0  ;;  %v950_v40 = vadd.f32 %v930_v34, %v924_v25  ;;  %v927_v41 = vsel %vm4691_vm9, %v899_v24, 0.0 }
 0x103   : > { %v908_v33 = vld [vmem:[%s4558_s4 + $0x60] sm:$0xff]  ;;  %v909_v36 = vld [vmem:[%s4558_s4 + $0x68] sm:$0xff]  ;;  %v914_v37 = vld [vmem:[%s4558_s4 + $0x90] sm:$0xff]  ;;  %v929_v42 = vsel %vm4691_vm9, %v901_v27, 0.0  ;;  %v932_v43 = vsel %vm4704_vm10, %v904_v28, 0.0  ;;  %v957_v44 = vadd.f32 %v931_v35, %v925_v39  ;;  %v933_v45 = vsel %vm4704_vm10, %v905_v29, 0.0 }
 0x104   : > { %v915_v38 = vld [vmem:[%s4558_s4 + $0x98] sm:$0xff]  ;;  %v935_v46 = vsel %vm4704_vm10, %v907_v32, 0.0  ;;  %v936_v48 = vsel %vm4691_vm9, %v908_v33, 0.0  ;;  %v942_v49 = vsel %vm4704_vm10, %v914_v37, 0.0  ;;  %v928_v50 = vsel %vm4691_vm9, %v900_v26, 0.0  ;;  %v910_v1 = vld [vmem:[%s4558_s4 + $0x70] sm:$0xff] }
 0x105   : > { %v934_v52 = vsel %vm4704_vm10, %v906_v31, 0.0  ;;  %v937_v53 = vsel %vm4691_vm9, %v909_v36, 0.0  ;;  %v943_v54 = vsel %vm4704_vm10, %v915_v38, 0.0  ;;  %v951_v55 = vrot.slane %v950_v40, 4  ;;  %v911_v8 = vld [vmem:[%s4558_s4 + $0x78] sm:$0xff]  ;;  %v916_v9 = vld [vmem:[%s4558_s4 + $0xa0] sm:$0xff] }
 0x106   : > { %v958_v56 = vrot.slane %v957_v44, 4  ;;  %v964_v57 = vadd.f32 %v932_v43, %v926_v47  ;;  %v971_v58 = vadd.f32 %v933_v45, %v927_v41  ;;  %v985_v60 = vadd.f32 %v935_v46, %v929_v42  ;;  %v917_v13 = vld [vmem:[%s4558_s4 + $0xa8] sm:$0xff]  ;;  %v912_v16 = vld [vmem:[%s4558_s4 + $0x80] sm:$0xff]  ;;  %v918_v23 = vld [vmem:[%s4558_s4 + $0xb0] sm:$0xff] }
 0x107   : > { %v992_v61 = vadd.f32 %v942_v49, %v936_v48  ;;  %v978_v51 = vadd.f32 %v934_v52, %v928_v50  ;;  %v999_v0 = vadd.f32 %v943_v54, %v937_v53  ;;  %v952_v2 = vadd.f32 %v951_v55, %v950_v40  ;;  %v913_v17 = vld [vmem:[%s4558_s4 + $0x88] sm:$0xff]  ;;  %v919_v28 = vld [vmem:[%s4558_s4 + $0xb8] sm:$0xff] }
 0x108   : > { %v959_v62 = vadd.f32 %v958_v56, %v957_v44  ;;  %v965_v63 = vrot.slane %v964_v57, 4  ;;  %v972_v3 = vrot.slane %v971_v58, 4  ;;  %v986_v4 = vrot.slane %v985_v60, 4 }
 0x109   : > { %v993_v5 = vrot.slane %v992_v61, 4  ;;  %v1000_v7 = vrot.slane %v999_v0, 4  ;;  %v938_v14 = vsel %vm4691_vm9, %v910_v1, 0.0  ;;  %v953_v18 = vrot.slane %v952_v2, 2 }
 0x10a   : > { %v966_v6 = vadd.f32 %v965_v63, %v964_v57  ;;  %v960_v10 = vrot.slane %v959_v62, 2  ;;  %v973_v11 = vadd.f32 %v972_v3, %v971_v58  ;;  %v979_v20 = vrot.slane %v978_v51, 4 }
 0x10b   : > { %v994_v12 = vadd.f32 %v993_v5, %v992_v61  ;;  %v1001_v15 = vadd.f32 %v1000_v7, %v999_v0  ;;  %v987_v21 = vadd.f32 %v986_v4, %v985_v60  ;;  %v939_v24 = vsel %vm4691_vm9, %v911_v8, 0.0 }
 0x10c   : > { %v967_v59 = vrot.slane %v966_v6, 2  ;;  %v974_v19 = vrot.slane %v973_v11, 2  ;;  %v944_v25 = vsel %vm4704_vm10, %v916_v9, 0.0  ;;  %v945_v29 = vsel %vm4704_vm10, %v917_v13, 0.0 }
 0x10d   : > { %v995_v26 = vrot.slane %v994_v12, 2  ;;  %v1002_v27 = vrot.slane %v1001_v15, 2  ;;  %v961_v39 = vadd.f32 %v960_v10, %v959_v62  ;;  %v940_v33 = vsel %vm4691_vm9, %v912_v16, 0.0 }
 0x10e   : > { %v968_v31 = vadd.f32 %v967_v59, %v966_v6  ;;  %v975_v32 = vadd.f32 %v974_v19, %v973_v11  ;;  %v941_v34 = vsel %vm4691_vm9, %v913_v17, 0.0  ;;  %v946_v36 = vsel %vm4704_vm10, %v918_v23, 0.0 }
 0x10f   : > { %v1003_v35 = vadd.f32 %v1002_v27, %v1001_v15  ;;  %v954_v37 = vadd.f32 %v953_v18, %v952_v2  ;;  %v980_v38 = vadd.f32 %v979_v20, %v978_v51  ;;  %v988_v47 = vrot.slane %v987_v21, 2 }
 0x110   : > { %v947_v40 = vsel %vm4704_vm10, %v919_v28, 0.0  ;;  %v996_v41 = vadd.f32 %v995_v26, %v994_v12  ;;  %v1006_v42 = vadd.f32 %v944_v25, %v938_v14  ;;  %v1013_v43 = vadd.f32 %v945_v29, %v939_v24 }
 0x111   : > { %v962_v44 = vrot.slane %v961_v39, 1  ;;  %v969_v45 = vrot.slane %v968_v31, 1  ;;  %v976_v46 = vrot.slane %v975_v32, 1  ;;  %v1004_v48 = vrot.slane %v1003_v35, 1 }
 0x112   : > { %v1007_v49 = vrot.slane %v1006_v42, 4  ;;  %v1014_v22 = vrot.slane %v1013_v43, 4  ;;  %v1020_v50 = vadd.f32 %v946_v36, %v940_v33  ;;  %v955_v52 = vrot.slane %v954_v37, 1 }
 0x113   : > { %v981_v53 = vrot.slane %v980_v38, 2  ;;  %v989_v54 = vadd.f32 %v988_v47, %v987_v21  ;;  %v1027_v55 = vadd.f32 %v947_v40, %v941_v34  ;;  %v997_v56 = vrot.slane %v996_v41, 1 }
 0x114   : > { %v1008_v57 = vadd.f32 %v1007_v49, %v1006_v42  ;;  %v1015_v58 = vadd.f32 %v1014_v22, %v1013_v43  ;;  %v1021_v60 = vrot.slane %v1020_v50, 4  ;;  %v963_v30 = vadd.f32 %v962_v44, %v961_v39  ;;  %v948_v44 = vld [vmem:[#allocation3] sm:$0xff]  ;;  %v949_v49 = vld [vmem:[#allocation3 + $0x8] sm:$0xf] }
 0x115   : > { %v970_v61 = vadd.f32 %v969_v45, %v968_v31  ;;  %v977_v62 = vadd.f32 %v976_v46, %v975_v32  ;;  %v1028_v63 = vrot.slane %v1027_v55, 4  ;;  %v1005_v51 = vadd.f32 %v1004_v48, %v1003_v35 }
 0x116   : > { %v1009_v0 = vrot.slane %v1008_v57, 2  ;;  %v1016_v1 = vrot.slane %v1015_v58, 2  ;;  %v1022_v2 = vadd.f32 %v1021_v60, %v1020_v50  ;;  %v956_v3 = vadd.f32 %v955_v52, %v954_v37 }
 0x117   : > { %v982_v4 = vadd.f32 %v981_v53, %v980_v38  ;;  %v990_v5 = vrot.slane %v989_v54, 1  ;;  %v1029_v6 = vadd.f32 %v1028_v63, %v1027_v55  ;;  %v998_v7 = vadd.f32 %v997_v56, %v996_v41 }
 0x118   : > { %v1010_v8 = vadd.f32 %v1009_v0, %v1008_v57  ;;  %v1017_v9 = vadd.f32 %v1016_v1, %v1015_v58  ;;  %v1023_v10 = vrot.slane %v1022_v2, 2  ;;  %v1046_v12 = vrot.slane %v963_v30, 6 }
 0x119   : > { %v1030_v11 = vrot.slane %v1029_v6, 2  ;;  %v1047_v13 = vrot.slane %v970_v61, 4  ;;  %v1048_v14 = vrot.slane %v977_v62, 2  ;;  %v1050_v17 = vrot.slane %v1005_v51, 6 }
 0x11a   : > { %v1011_v59 = vrot.slane %v1010_v8, 1  ;;  %v1018_v15 = vrot.slane %v1017_v9, 1  ;;  %v1024_v16 = vadd.f32 %v1023_v10, %v1022_v2  ;;  %v983_v18 = vrot.slane %v982_v4, 1 }
 0x11b   : > { %v991_v19 = vadd.f32 %v990_v5, %v989_v54  ;;  %v1031_v20 = vadd.f32 %v1030_v11, %v1029_v6  ;;  %v1054_v26 = vsel %vm855_vm2, %v956_v3, %v1046_v12  ;;  %v1055_v29 = vsel %vm857_vm3, %v1047_v13, %v1048_v14 }
 0x11c   : > { %v1012_v21 = vadd.f32 %v1011_v59, %v1010_v8  ;;  %v1019_v23 = vadd.f32 %v1018_v15, %v1017_v9  ;;  %v1025_v24 = vrot.slane %v1024_v16, 1  ;;  %v1058_v39 = vsel %vm855_vm2, %v998_v7, %v1050_v17 }
 0x11d   : > { %v1032_v25 = vrot.slane %v1031_v20, 1  ;;  %v984_v31 = vadd.f32 %v983_v18, %v982_v4  ;;  %v1049_v34 = vrot.slane %v991_v19, 6  ;;  %v1056_v37 = vsel %vm859_vm4, %v1054_v26, %v1055_v29 }
 0x11e   : > { %v1051_v27 = vrot.slane %v1012_v21, 4  ;;  %v1052_v28 = vrot.slane %v1019_v23, 2  ;;  %v1026_v32 = vadd.f32 %v1025_v24, %v1024_v16 }
 0x11f   : > { %v1033_v33 = vadd.f32 %v1032_v25, %v1031_v20  ;;  %v1057_v40 = vsel %vm855_vm2, %v984_v31, %v1049_v34 }
 0x120   : > { %v1059_v35 = vsel %vm857_vm3, %v1051_v27, %v1052_v28 }
 0x121   : > { %v1053_v36 = vrot.slane %v1033_v33, 6  ;;  %v1060_v38 = vsel %vm859_vm4, %v1058_v39, %v1059_v35 }
 0x122   : > { %v1064_v47 = vrot.slane %v1060_v38, 7 }
 0x123   : > { %v1061_v41 = vsel %vm855_vm2, %v1026_v32, %v1053_v36 }
 0x124   : > { %v1065_v42 = vsel %vm871_vm5, %v1064_v47, %v1056_v37  ;;  %v1071_v43 = vrot.slane %v1061_v41, 7 }
 0x125   : > { %v1066_v45 = vsel %vm873_vm6, %v1064_v47, %v1065_v42 }
 0x126   : > { %v1067_v46 = vsel %vm875_vm7, %v1064_v47, %v1066_v45  ;;  %v1072_v48 = vsel %vm871_vm5, %v1071_v43, %v1057_v40 }
 0x127   : > { %v1068_v22 = vsel %vm877_vm8, %v1064_v47, %v1067_v46  ;;  %v1073_v50 = vsel %vm873_vm6, %v1071_v43, %v1072_v48 }
 0x128   : > { %v1074_v52 = vsel %vm875_vm7, %v1071_v43, %v1073_v50  ;;  %v1078_v53 = vadd.f32 %v1068_v22, %v948_v44 }
 0x129   : > { %v1075_v54 = vsel %vm877_vm8, %v1071_v43, %v1074_v52 }
 0x12a   : > { %v1079_v55 = vadd.f32 %v1075_v54, %v949_v49  ;;  %1080 = vst [vmem:[#allocation3] sm:$0xff] %v1078_v53 }
 0x12c   : > { %1081 = vst [vmem:[#allocation3 + $0x8] sm:$0xf] %v1079_v55 }
 0x12d PF: > { %s5002_s23 = sld [smem:[#allocation30_spill]] }
 0x133   : > { %p3520_p1 = scmp.ne.s32.totalorder %s5002_s23, 2 }
 0x135   : > { %1085 = sbr.rel (%p3520_p1) target bundleno = 1216 (0x4c0), region = 130 }
 0x13a   : > { %v1538_v56 = vld [vmem:[#allocation10 + $0x1e0] sm:$0xff] }
 0x13b   : > { %v1602_v57 = vld [vmem:[#allocation10 + $0x3e0] sm:$0xff]  ;;  %1879 = vmatpush.msra.mxu0 %v1538_v56 }
 0x13c   : > { %v1666_v58 = vld [vmem:[#allocation10 + $0x5e0] sm:$0xff]  ;;  %1899 = vmatpush.msra.mxu1 %v1602_v57  ;;  %v1539_v57 = vld [vmem:[#allocation10 + $0x1e8] sm:$0xff] }
 0x13d   : > { %v1534_v60 = vld [vmem:[#allocation10 + $0x1c0] sm:$0xff]  ;;  %1919 = vmatpush.msra.mxu2 %v1666_v58 }
 0x13e   : > { %v1598_v30 = vld [vmem:[#allocation10 + $0x3c0] sm:$0xff]  ;;  %1880 = vmatpush.msra.mxu0 %v1534_v60 }
 0x13f   : > { %v1662_v61 = vld [vmem:[#allocation10 + $0x5c0] sm:$0xff]  ;;  %1900 = vmatpush.msra.mxu1 %v1598_v30 }
 0x140   : > { %v1730_v62 = vld [vmem:[#allocation10 + $0x7e0] sm:$0xff]  ;;  %1920 = vmatpush.msra.mxu2 %v1662_v61  ;;  %v1535_v61 = vld [vmem:[#allocation10 + $0x1c8] sm:$0xff] }
 0x141   : > { %v1530_v63 = vld [vmem:[#allocation10 + $0x1a0] sm:$0xff]  ;;  %1939 = vmatpush.msra.mxu3 %v1730_v62  ;;  %v1603_v62 = vld [vmem:[#allocation10 + $0x3e8] sm:$0xff] }
 0x142   : > { %v1594_v51 = vld [vmem:[#allocation10 + $0x3a0] sm:$0xff]  ;;  %1881 = vmatpush.msra.mxu0 %v1530_v63 }
 0x143   : > { %v1658_v0 = vld [vmem:[#allocation10 + $0x5a0] sm:$0xff]  ;;  %1901 = vmatpush.msra.mxu1 %v1594_v51 }
 0x144   : > { %v1726_v1 = vld [vmem:[#allocation10 + $0x7c0] sm:$0xff]  ;;  %1921 = vmatpush.msra.mxu2 %v1658_v0  ;;  %v1531_v0 = vld [vmem:[#allocation10 + $0x1a8] sm:$0xff] }
 0x145   : > { %v1526_v2 = vld [vmem:[#allocation10 + $0x180] sm:$0xff]  ;;  %1940 = vmatpush.msra.mxu3 %v1726_v1  ;;  %v1599_v1 = vld [vmem:[#allocation10 + $0x3c8] sm:$0xff] }
 0x146   : > { %v1590_v3 = vld [vmem:[#allocation10 + $0x380] sm:$0xff]  ;;  %1882 = vmatpush.msra.mxu0 %v1526_v2 }
 0x147   : > { %v1654_v4 = vld [vmem:[#allocation10 + $0x580] sm:$0xff]  ;;  %1902 = vmatpush.msra.mxu1 %v1590_v3 }
 0x148   : > { %v1722_v5 = vld [vmem:[#allocation10 + $0x7a0] sm:$0xff]  ;;  %1922 = vmatpush.msra.mxu2 %v1654_v4  ;;  %v1527_v4 = vld [vmem:[#allocation10 + $0x188] sm:$0xff] }
 0x149   : > { %v1522_v6 = vld [vmem:[#allocation10 + $0x160] sm:$0xff]  ;;  %1941 = vmatpush.msra.mxu3 %v1722_v5  ;;  %v1595_v5 = vld [vmem:[#allocation10 + $0x3a8] sm:$0xff] }
 0x14a   : > { %v1586_v7 = vld [vmem:[#allocation10 + $0x360] sm:$0xff]  ;;  %1883 = vmatpush.msra.mxu0 %v1522_v6 }
 0x14b   : > { %v1650_v8 = vld [vmem:[#allocation10 + $0x560] sm:$0xff]  ;;  %1903 = vmatpush.msra.mxu1 %v1586_v7 }
 0x14c   : > { %v1718_v9 = vld [vmem:[#allocation10 + $0x780] sm:$0xff]  ;;  %1923 = vmatpush.msra.mxu2 %v1650_v8  ;;  %v1523_v8 = vld [vmem:[#allocation10 + $0x168] sm:$0xff] }
 0x14d   : > { %v1518_v10 = vld [vmem:[#allocation10 + $0x140] sm:$0xff]  ;;  %1942 = vmatpush.msra.mxu3 %v1718_v9  ;;  %v1591_v9 = vld [vmem:[#allocation10 + $0x388] sm:$0xff] }
 0x14e   : > { %v1582_v11 = vld [vmem:[#allocation10 + $0x340] sm:$0xff]  ;;  %1884 = vmatpush.msra.mxu0 %v1518_v10 }
 0x14f   : > { %v1646_v12 = vld [vmem:[#allocation10 + $0x540] sm:$0xff]  ;;  %1904 = vmatpush.msra.mxu1 %v1582_v11 }
 0x150   : > { %v1714_v13 = vld [vmem:[#allocation10 + $0x760] sm:$0xff]  ;;  %1924 = vmatpush.msra.mxu2 %v1646_v12  ;;  %v1519_v12 = vld [vmem:[#allocation10 + $0x148] sm:$0xff] }
 0x151   : > { %v1514_v14 = vld [vmem:[#allocation10 + $0x120] sm:$0xff]  ;;  %1943 = vmatpush.msra.mxu3 %v1714_v13  ;;  %v1587_v13 = vld [vmem:[#allocation10 + $0x368] sm:$0xff] }
 0x152   : > { %v1578_v59 = vld [vmem:[#allocation10 + $0x320] sm:$0xff]  ;;  %1885 = vmatpush.msra.mxu0 %v1514_v14  ;;  %v1090_v14 = vld [vmem:[#allocation3] sm:$0xff] }
 0x153   : > { %v1642_v15 = vld [vmem:[#allocation10 + $0x520] sm:$0xff]  ;;  %1905 = vmatpush.msra.mxu1 %v1578_v59 }
 0x154   : > { %v1710_v16 = vld [vmem:[#allocation10 + $0x740] sm:$0xff]  ;;  %1925 = vmatpush.msra.mxu2 %v1642_v15 }
 0x155   : > { %v1510_v17 = vld [vmem:[#allocation10 + $0x100] sm:$0xff]  ;;  %1944 = vmatpush.msra.mxu3 %v1710_v16  ;;  %v1092_v16 = vmul.f32 0.05263158, %v1090_v14  ;;  %v1787_v14 = vld [vmem:[#allocation10 + $0x9a8] sm:$0xff] }
 0x156   : > { %v1574_v18 = vld [vmem:[#allocation10 + $0x300] sm:$0xff]  ;;  %1886 = vmatpush.msra.mxu0 %v1510_v17  ;;  %v1515_v17 = vld [vmem:[#allocation10 + $0x128] sm:$0xff] }
 0x157   : > { %v1638_v19 = vld [vmem:[#allocation10 + $0x500] sm:$0xff]  ;;  %1906 = vmatpush.msra.mxu1 %v1574_v18  ;;  %v1583_v18 = vld [vmem:[#allocation10 + $0x348] sm:$0xff]  ;;  %1864 = vst [vmem:[#allocation1] ss:$4 sm:$0xff] %v1092_v16 }
 0x158   : > { %v1706_v20 = vld [vmem:[#allocation10 + $0x720] sm:$0xff]  ;;  %1926 = vmatpush.msra.mxu2 %v1638_v19  ;;  %v1719_v16 = vld [vmem:[#allocation10 + $0x788] sm:$0xff] }
 0x159   : > { %v1506_v21 = vld [vmem:[#allocation10 + $0xe0] sm:$0xff]  ;;  %1945 = vmatpush.msra.mxu3 %v1706_v20 }
 0x15a   : > { %v1570_v23 = vld [vmem:[#allocation10 + $0x2e0] sm:$0xff]  ;;  %1887 = vmatpush.msra.mxu0 %v1506_v21  ;;  %v1511_v21 = vld [vmem:[#allocation10 + $0x108] sm:$0xff] }
 0x15b   : > { %v1634_v24 = vld [vmem:[#allocation10 + $0x4e0] sm:$0xff]  ;;  %1907 = vmatpush.msra.mxu1 %v1570_v23  ;;  %v1579_v23 = vld [vmem:[#allocation10 + $0x328] sm:$0xff] }
 0x15c   : > { %v1702_v25 = vld [vmem:[#allocation10 + $0x700] sm:$0xff]  ;;  %1927 = vmatpush.msra.mxu2 %v1634_v24 }
 0x15d   : > { %v1502_v26 = vld [vmem:[#allocation10 + $0xc0] sm:$0xff]  ;;  %1946 = vmatpush.msra.mxu3 %v1702_v25 }
 0x15e   : > { %v1566_v27 = vld [vmem:[#allocation10 + $0x2c0] sm:$0xff]  ;;  %1888 = vmatpush.msra.mxu0 %v1502_v26  ;;  %v1507_v26 = vld [vmem:[#allocation10 + $0xe8] sm:$0xff] }
 0x15f   : > { %v1630_v28 = vld [vmem:[#allocation10 + $0x4c0] sm:$0xff]  ;;  %1908 = vmatpush.msra.mxu1 %v1566_v27  ;;  %v1086_v27 = vld [vmem:[#allocation2] sm:$0xff] }
 0x160   : > { %v1698_v29 = vld [vmem:[#allocation10 + $0x6e0] sm:$0xff]  ;;  %1928 = vmatpush.msra.mxu2 %v1630_v28  ;;  %v1575_v28 = vld [vmem:[#allocation10 + $0x308] sm:$0xff] }
 0x161   : > { %v1498_v39 = vld [vmem:[#allocation10 + $0xa0] sm:$0xff]  ;;  %1947 = vmatpush.msra.mxu3 %v1698_v29 }
 0x162   : > { %v1562_v31 = vld [vmem:[#allocation10 + $0x2a0] sm:$0xff]  ;;  %1889 = vmatpush.msra.mxu0 %v1498_v39 }
 0x163   : > { %v1626_v32 = vld [vmem:[#allocation10 + $0x4a0] sm:$0xff]  ;;  %1909 = vmatpush.msra.mxu1 %v1562_v31  ;;  %v1503_v31 = vld [vmem:[#allocation10 + $0xc8] sm:$0xff] }
 0x164   : > { %v1694_v33 = vld [vmem:[#allocation10 + $0x6c0] sm:$0xff]  ;;  %1929 = vmatpush.msra.mxu2 %v1626_v32  ;;  %v1571_v32 = vld [vmem:[#allocation10 + $0x2e8] sm:$0xff] }
 0x165   : > { %v1494_v34 = vld [vmem:[#allocation10 + $0x80] sm:$0xff]  ;;  %1948 = vmatpush.msra.mxu3 %v1694_v33  ;;  %v1091_v33 = vld [vmem:[#allocation3 + $0x8] sm:$0xf] }
 0x166   : > { %v1558_v35 = vld [vmem:[#allocation10 + $0x280] sm:$0xff]  ;;  %1890 = vmatpush.msra.mxu0 %v1494_v34 }
 0x167   : > { %v1622_v36 = vld [vmem:[#allocation10 + $0x480] sm:$0xff]  ;;  %1910 = vmatpush.msra.mxu1 %v1558_v35 }
 0x168   : > { %v1690_v37 = vld [vmem:[#allocation10 + $0x6a0] sm:$0xff]  ;;  %1930 = vmatpush.msra.mxu2 %v1622_v36  ;;  %v1499_v36 = vld [vmem:[#allocation10 + $0xa8] sm:$0xff] }
 0x169   : > { %v1490_v38 = vld [vmem:[#allocation10 + $0x60] sm:$0xff]  ;;  %1949 = vmatpush.msra.mxu3 %v1690_v37  ;;  %v1088_v37 = vmul.f32 0.025, %v1086_v27  ;;  %v1843_v27 = vld [vmem:[#allocation10 + $0xb68] sm:$0xff] }
 0x16a   : > { %v1554_v47 = vld [vmem:[#allocation10 + $0x260] sm:$0xff]  ;;  %1891 = vmatpush.msra.mxu0 %v1490_v38  ;;  %v1567_v38 = vld [vmem:[#allocation10 + $0x2c8] sm:$0xff] }
 0x16b   : > { %v1618_v40 = vld [vmem:[#allocation10 + $0x460] sm:$0xff]  ;;  %1911 = vmatpush.msra.mxu1 %v1554_v47 }
 0x16c   : > { %v1686_v41 = vld [vmem:[#allocation10 + $0x680] sm:$0xff]  ;;  %1931 = vmatpush.msra.mxu2 %v1618_v40 }
 0x16d   : > { %v1486_v42 = vld [vmem:[#allocation10 + $0x40] sm:$0xff]  ;;  %1950 = vmatpush.msra.mxu3 %v1686_v41  ;;  %v1093_v41 = vmul.f32 0.05263158, %v1091_v33  ;;  %v1703_v33 = vld [vmem:[#allocation10 + $0x708] sm:$0xff] }
 0x16e   : > { %v1550_v43 = vld [vmem:[#allocation10 + $0x240] sm:$0xff]  ;;  %1892 = vmatpush.msra.mxu0 %v1486_v42  ;;  %v4785_v42 = vld.sshfl [vmem:[#allocation1 + $0x10] sm:$0xff pattern:$0x73625140] }
 0x16f   : > { %v1614_v44 = vld [vmem:[#allocation10 + $0x440] sm:$0xff]  ;;  %1912 = vmatpush.msra.mxu1 %v1550_v43  ;;  %1866 = vst [vmem:[#allocation1 + $0x20] ss:$4 sm:$0xff] %v1093_v41  ;;  %v1695_v41 = vld [vmem:[#allocation10 + $0x6c8] sm:$0xff] }
 0x170   : > { %v1682_v45 = vld [vmem:[#allocation10 + $0x660] sm:$0xff]  ;;  %1932 = vmatpush.msra.mxu2 %v1614_v44  ;;  %v4789_v44 = vld.sshfl [vmem:[#allocation1 + $0x8] sm:$0xff pattern:$0x73625140] }
 0x171   : > { %v1482_v46 = vld [vmem:[#allocation10 + $0x20] sm:$0xff]  ;;  %1951 = vmatpush.msra.mxu3 %v1682_v45  ;;  %v4791_v45 = vld.sshfl [vmem:[#allocation1 + $0x18] sm:$0xff pattern:$0x73625140] }
 0x172   : > { %v1546_v48 = vld [vmem:[#allocation10 + $0x220] sm:$0xff]  ;;  %1893 = vmatpush.msra.mxu0 %v1482_v46  ;;  %v1495_v46 = vld [vmem:[#allocation10 + $0x88] sm:$0xff] }
 0x173   : > { %v1610_v49 = vld [vmem:[#allocation10 + $0x420] sm:$0xff]  ;;  %1913 = vmatpush.msra.mxu1 %v1546_v48  ;;  %v1563_v48 = vld [vmem:[#allocation10 + $0x2a8] sm:$0xff] }
 0x174   : > { %v1678_v22 = vld [vmem:[#allocation10 + $0x640] sm:$0xff]  ;;  %1933 = vmatpush.msra.mxu2 %v1610_v49 }
 0x175   : > { %v1478_v50 = vld [vmem:[#allocation10] sm:$0xff]  ;;  %1952 = vmatpush.msra.mxu3 %v1678_v22 }
 0x176   : > { %v1542_v52 = vld [vmem:[#allocation10 + $0x200] sm:$0xff]  ;;  %1894 = vmatpush.msra.mxu0 %v1478_v50  ;;  %v1491_v50 = vld [vmem:[#allocation10 + $0x68] sm:$0xff] }
 0x177   : > { %v1606_v53 = vld [vmem:[#allocation10 + $0x400] sm:$0xff]  ;;  %1914 = vmatpush.msra.mxu1 %v1542_v52  ;;  %v1559_v52 = vld [vmem:[#allocation10 + $0x288] sm:$0xff] }
 0x178   : > { %v1674_v54 = vld [vmem:[#allocation10 + $0x620] sm:$0xff]  ;;  %1934 = vmatpush.msra.mxu2 %v1606_v53  ;;  %v1087_v53 = vld [vmem:[#allocation2 + $0x8] sm:$0xf]  ;;  %1915 = vmatmul.f32.vlgmr.msra.gmra.mxu1 %v4789_v44 }
 0x179   : > { %v1794_v55 = vld [vmem:[#allocation10 + $0x9e0] sm:$0xff]  ;;  %1953 = vmatpush.msra.mxu3 %v1674_v54  ;;  %1935 = vmatmul.f32.vlgmr.msra.gmra.mxu2 %v4785_v42 }
 0x17a   : > { %v1858_v56 = vld [vmem:[#allocation10 + $0xbe0] sm:$0xff]  ;;  %1959 = vmatpush.msrb.mxu0 %v1794_v55  ;;  %1999 = vmatpush.msrb.mxu2 %v1539_v57  ;;  %v1555_v57 = vld [vmem:[#allocation10 + $0x268] sm:$0xff] }
 0x17b   : > { %v1670_v58 = vld [vmem:[#allocation10 + $0x600] sm:$0xff]  ;;  %1979 = vmatpush.msrb.mxu1 %v1858_v56  ;;  %v1487_v56 = vld [vmem:[#allocation10 + $0x48] sm:$0xff] }
 0x17c   : > { %v1790_v60 = vld [vmem:[#allocation10 + $0x9c0] sm:$0xff]  ;;  %1954 = vmatpush.msra.mxu3 %v1670_v58  ;;  %2000 = vmatpush.msrb.mxu2 %v1535_v61  ;;  %v1483_v61 = vld [vmem:[#allocation10 + $0x28] sm:$0xff] }
 0x17d   : > { %v1854_v30 = vld [vmem:[#allocation10 + $0xbc0] sm:$0xff]  ;;  %1960 = vmatpush.msrb.mxu0 %v1790_v60  ;;  %1955 = vmatmul.f32.vlgmr.msra.gmra.mxu3 %v4791_v45 }
 0x17e   : > { %v1786_v63 = vld [vmem:[#allocation10 + $0x9a0] sm:$0xff]  ;;  %1980 = vmatpush.msrb.mxu1 %v1854_v30  ;;  %2019 = vmatpush.msrb.mxu3 %v1603_v62  ;;  %v1089_v30 = vmul.f32 0.025, %v1087_v53  ;;  %v1551_v62 = vld [vmem:[#allocation10 + $0x248] sm:$0xff] }
 0x17f   : > { %v1850_v51 = vld [vmem:[#allocation10 + $0xba0] sm:$0xff]  ;;  %1961 = vmatpush.msrb.mxu0 %v1786_v63  ;;  %2001 = vmatpush.msrb.mxu2 %v1531_v0  ;;  %v1479_v0 = vld [vmem:[#allocation10 + $0x8] sm:$0xff] }
 0x180   : > { %v1782_v2 = vld [vmem:[#allocation10 + $0x980] sm:$0xff]  ;;  %1981 = vmatpush.msrb.mxu1 %v1850_v51  ;;  %2020 = vmatpush.msrb.mxu3 %v1599_v1  ;;  %v1623_v53 = vld [vmem:[#allocation10 + $0x488] sm:$0xff] }
 0x181   : > { %v1846_v3 = vld [vmem:[#allocation10 + $0xb80] sm:$0xff]  ;;  %1962 = vmatpush.msrb.mxu0 %v1782_v2  ;;  %2002 = vmatpush.msrb.mxu2 %v1527_v4  ;;  %v4795_v2 = vld.sshfl [vmem:[#allocation1 + $0x28] sm:$0xff pattern:$0x73625140] }
 0x182   : > { %v1778_v6 = vld [vmem:[#allocation10 + $0x960] sm:$0xff]  ;;  %1982 = vmatpush.msrb.mxu1 %v1846_v3  ;;  %2021 = vmatpush.msrb.mxu3 %v1595_v5  ;;  %v1547_v3 = vld [vmem:[#allocation10 + $0x228] sm:$0xff] }
 0x183   : > { %v1842_v7 = vld [vmem:[#allocation10 + $0xb60] sm:$0xff]  ;;  %1963 = vmatpush.msrb.mxu0 %v1778_v6  ;;  %2003 = vmatpush.msrb.mxu2 %v1523_v8  ;;  %v1667_v4 = vld [vmem:[#allocation10 + $0x5e8] sm:$0xff] }
 0x184   : > { %v1774_v10 = vld [vmem:[#allocation10 + $0x940] sm:$0xff]  ;;  %1983 = vmatpush.msrb.mxu1 %v1842_v7  ;;  %2022 = vmatpush.msrb.mxu3 %v1591_v9  ;;  %v1731_v5 = vld [vmem:[#allocation10 + $0x7e8] sm:$0xff] }
 0x185   : > { %v1838_v11 = vld [vmem:[#allocation10 + $0xb40] sm:$0xff]  ;;  %1964 = vmatpush.msrb.mxu0 %v1774_v10  ;;  %2004 = vmatpush.msrb.mxu2 %v1519_v12  ;;  %v1795_v6 = vld [vmem:[#allocation10 + $0x9e8] sm:$0xff] }
 0x186   : > { %v1770_v59 = vld [vmem:[#allocation10 + $0x920] sm:$0xff]  ;;  %1984 = vmatpush.msrb.mxu1 %v1838_v11  ;;  %2023 = vmatpush.msrb.mxu3 %v1587_v13  ;;  %v1543_v7 = vld [vmem:[#allocation10 + $0x208] sm:$0xff] }
 0x187   : > { %v1834_v15 = vld [vmem:[#allocation10 + $0xb20] sm:$0xff]  ;;  %1965 = vmatpush.msrb.mxu0 %v1770_v59  ;;  %2005 = vmatpush.msrb.mxu2 %v1515_v17  ;;  %v1663_v8 = vld [vmem:[#allocation10 + $0x5c8] sm:$0xff] }
 0x188   : > { %v1766_v19 = vld [vmem:[#allocation10 + $0x900] sm:$0xff]  ;;  %1985 = vmatpush.msrb.mxu1 %v1834_v15  ;;  %2024 = vmatpush.msrb.mxu3 %v1583_v18  ;;  %v1727_v9 = vld [vmem:[#allocation10 + $0x7c8] sm:$0xff] }
 0x189   : > { %v1830_v20 = vld [vmem:[#allocation10 + $0xb00] sm:$0xff]  ;;  %1966 = vmatpush.msrb.mxu0 %v1766_v19  ;;  %2006 = vmatpush.msrb.mxu2 %v1511_v21  ;;  %v1791_v10 = vld [vmem:[#allocation10 + $0x9c8] sm:$0xff] }
 0x18a   : > { %v1762_v24 = vld [vmem:[#allocation10 + $0x8e0] sm:$0xff]  ;;  %1986 = vmatpush.msrb.mxu1 %v1830_v20  ;;  %2025 = vmatpush.msrb.mxu3 %v1579_v23  ;;  %v1859_v11 = vld [vmem:[#allocation10 + $0xbe8] sm:$0xff] }
 0x18b   : > { %v1826_v25 = vld [vmem:[#allocation10 + $0xae0] sm:$0xff]  ;;  %1967 = vmatpush.msrb.mxu0 %v1762_v24  ;;  %2007 = vmatpush.msrb.mxu2 %v1507_v26  ;;  %v1659_v12 = vld [vmem:[#allocation10 + $0x5a8] sm:$0xff] }
 0x18c   : > { %v1758_v29 = vld [vmem:[#allocation10 + $0x8c0] sm:$0xff]  ;;  %1987 = vmatpush.msrb.mxu1 %v1826_v25  ;;  %2026 = vmatpush.msrb.mxu3 %v1575_v28  ;;  %v1723_v13 = vld [vmem:[#allocation10 + $0x7a8] sm:$0xff] }
 0x18d   : > { %v1822_v39 = vld [vmem:[#allocation10 + $0xac0] sm:$0xff]  ;;  %1968 = vmatpush.msrb.mxu0 %v1758_v29  ;;  %2008 = vmatpush.msrb.mxu2 %v1503_v31  ;;  %v1855_v59 = vld [vmem:[#allocation10 + $0xbc8] sm:$0xff] }
 0x18e   : > { %v1754_v34 = vld [vmem:[#allocation10 + $0x8a0] sm:$0xff]  ;;  %1988 = vmatpush.msrb.mxu1 %v1822_v39  ;;  %2027 = vmatpush.msrb.mxu3 %v1571_v32  ;;  %v1655_v15 = vld [vmem:[#allocation10 + $0x588] sm:$0xff] }
 0x18f   : > { %v1818_v35 = vld [vmem:[#allocation10 + $0xaa0] sm:$0xff]  ;;  %1969 = vmatpush.msrb.mxu0 %v1754_v34  ;;  %2009 = vmatpush.msrb.mxu2 %v1499_v36  ;;  %v1783_v17 = vld [vmem:[#allocation10 + $0x988] sm:$0xff] }
 0x190   : > { %v1750_v47 = vld [vmem:[#allocation10 + $0x880] sm:$0xff]  ;;  %1989 = vmatpush.msrb.mxu1 %v1818_v35  ;;  %2028 = vmatpush.msrb.mxu3 %v1567_v38  ;;  %v1851_v18 = vld [vmem:[#allocation10 + $0xba8] sm:$0xff] }
 0x191   : > { %v1814_v40 = vld [vmem:[#allocation10 + $0xa80] sm:$0xff]  ;;  %1970 = vmatpush.msrb.mxu0 %v1750_v47  ;;  %2010 = vmatpush.msrb.mxu2 %v1495_v46  ;;  %v1715_v19 = vld [vmem:[#allocation10 + $0x768] sm:$0xff] }
 0x192   : > { %v4787_v43 = vld.sshfl [vmem:[#allocation1] sm:$0xff pattern:$0x73625140]  ;;  %1990 = vmatpush.msrb.mxu1 %v1814_v40  ;;  %2029 = vmatpush.msrb.mxu3 %v1563_v48  ;;  %v1651_v20 = vld [vmem:[#allocation10 + $0x568] sm:$0xff] }
 0x193   : > { %2361 = vst [vmem:[#allocation1] ss:$4 sm:$0xff] %v1088_v37  ;;  %v1746_v49 = vld [vmem:[#allocation10 + $0x860] sm:$0xff]  ;;  %2011 = vmatpush.msrb.mxu2 %v1491_v50  ;;  %1895 = vmatmul.f32.vlgmr.msra.gmra.mxu0 %v4787_v43  ;;  %v1779_v21 = vld [vmem:[#allocation10 + $0x968] sm:$0xff] }
 0x194   : > { %v1810_v22 = vld [vmem:[#allocation10 + $0xa60] sm:$0xff]  ;;  %1971 = vmatpush.msrb.mxu0 %v1746_v49  ;;  %2030 = vmatpush.msrb.mxu3 %v1559_v52  ;;  %v1847_v23 = vld [vmem:[#allocation10 + $0xb88] sm:$0xff] }
 0x195   : > { %v1742_v54 = vld [vmem:[#allocation10 + $0x840] sm:$0xff]  ;;  %1991 = vmatpush.msrb.mxu1 %v1810_v22  ;;  %2012 = vmatpush.msrb.mxu2 %v1487_v56  ;;  %v1647_v24 = vld [vmem:[#allocation10 + $0x548] sm:$0xff] }
 0x196   : > { %v1806_v55 = vld [vmem:[#allocation10 + $0xa40] sm:$0xff]  ;;  %1972 = vmatpush.msrb.mxu0 %v1742_v54  ;;  %2031 = vmatpush.msrb.mxu3 %v1555_v57  ;;  %v1711_v25 = vld [vmem:[#allocation10 + $0x748] sm:$0xff] }
 0x197   : > { %v1738_v58 = vld [vmem:[#allocation10 + $0x820] sm:$0xff]  ;;  %1992 = vmatpush.msrb.mxu1 %v1806_v55  ;;  %2013 = vmatpush.msrb.mxu2 %v1483_v61  ;;  %v1775_v26 = vld [vmem:[#allocation10 + $0x948] sm:$0xff] }
 0x198   : > { %v1802_v60 = vld [vmem:[#allocation10 + $0xa20] sm:$0xff]  ;;  %1973 = vmatpush.msrb.mxu0 %v1738_v58  ;;  %2032 = vmatpush.msrb.mxu3 %v1551_v62  ;;  %v1643_v28 = vld [vmem:[#allocation10 + $0x528] sm:$0xff] }
 0x199   : > { %v1734_v63 = vld [vmem:[#allocation10 + $0x800] sm:$0xff]  ;;  %1993 = vmatpush.msrb.mxu1 %v1802_v60  ;;  %2014 = vmatpush.msrb.mxu2 %v1479_v0  ;;  %v1707_v29 = vld [vmem:[#allocation10 + $0x728] sm:$0xff] }
 0x19a   : > { %v1798_v51 = vld [vmem:[#allocation10 + $0xa00] sm:$0xff]  ;;  %1974 = vmatpush.msrb.mxu0 %v1734_v63  ;;  %2033 = vmatpush.msrb.mxu3 %v1547_v3  ;;  %v1771_v39 = vld [vmem:[#allocation10 + $0x928] sm:$0xff] }
 0x19b   : > { %v4793_v1 = vld.sshfl [vmem:[#allocation1 + $0x20] sm:$0xff pattern:$0x73625140]  ;;  %1994 = vmatpush.msrb.mxu1 %v1798_v51  ;;  %2079 = vmatpush.msra.mxu2 %v1795_v6  ;;  %v1839_v31 = vld [vmem:[#allocation10 + $0xb48] sm:$0xff] }
 0x19c   : > { %2363 = vst [vmem:[#allocation1 + $0x20] ss:$4 sm:$0xff] %v1089_v30  ;;  %2039 = vmatpush.msra.mxu0 %v1667_v4  ;;  %2034 = vmatpush.msrb.mxu3 %v1543_v7  ;;  %v1639_v32 = vld [vmem:[#allocation10 + $0x508] sm:$0xff] }
 0x19d   : > { %2059 = vmatpush.msra.mxu1 %v1731_v5  ;;  %2080 = vmatpush.msra.mxu2 %v1791_v10  ;;  %v1767_v34 = vld [vmem:[#allocation10 + $0x908] sm:$0xff]  ;;  %v1540_v10 = vld [vmem:[#allocation10 + $0x1f0] sm:$0xff] }
 0x19e   : > { %2040 = vmatpush.msra.mxu0 %v1663_v8  ;;  %2099 = vmatpush.msra.mxu3 %v1859_v11  ;;  %v1835_v35 = vld [vmem:[#allocation10 + $0xb28] sm:$0xff]  ;;  %v1604_v11 = vld [vmem:[#allocation10 + $0x3f0] sm:$0xff] }
 0x19f   : > { %2060 = vmatpush.msra.mxu1 %v1727_v9  ;;  %2081 = vmatpush.msra.mxu2 %v1787_v14  ;;  %v1635_v36 = vld [vmem:[#allocation10 + $0x4e8] sm:$0xff]  ;;  %v1536_v14 = vld [vmem:[#allocation10 + $0x1d0] sm:$0xff] }
 0x1a0   : > { %2041 = vmatpush.msra.mxu0 %v1659_v12  ;;  %2100 = vmatpush.msra.mxu3 %v1855_v59  ;;  %v1699_v37 = vld [vmem:[#allocation10 + $0x6e8] sm:$0xff]  ;;  %v1668_v12 = vld [vmem:[#allocation10 + $0x5f0] sm:$0xff] }
 0x1a1   : > { %2061 = vmatpush.msra.mxu1 %v1723_v13  ;;  %2082 = vmatpush.msra.mxu2 %v1783_v17  ;;  %v1763_v38 = vld [vmem:[#allocation10 + $0x8e8] sm:$0xff]  ;;  %v1600_v59 = vld [vmem:[#allocation10 + $0x3d0] sm:$0xff] }
 0x1a2   : > { %2042 = vmatpush.msra.mxu0 %v1655_v15  ;;  %2101 = vmatpush.msra.mxu3 %v1851_v18  ;;  %v1831_v47 = vld [vmem:[#allocation10 + $0xb08] sm:$0xff]  ;;  %v1664_v15 = vld [vmem:[#allocation10 + $0x5d0] sm:$0xff] }
 0x1a3   : > { %2062 = vmatpush.msra.mxu1 %v1719_v16  ;;  %1975 = vmatmul.f32.vlgmr.msrb.gmra.mxu0 %v4793_v1  ;;  %v1631_v40 = vld [vmem:[#allocation10 + $0x4c8] sm:$0xff]  ;;  %v1732_v16 = vld [vmem:[#allocation10 + $0x7f0] sm:$0xff] }
 0x1a4   : > { %2043 = vmatpush.msra.mxu0 %v1651_v20  ;;  %2083 = vmatpush.msra.mxu2 %v1779_v21  ;;  %v1759_v46 = vld [vmem:[#allocation10 + $0x8c8] sm:$0xff]  ;;  %v1532_v17 = vld [vmem:[#allocation10 + $0x1b0] sm:$0xff] }
 0x1a5   : > { %2063 = vmatpush.msra.mxu1 %v1715_v19  ;;  %2102 = vmatpush.msra.mxu3 %v1847_v23  ;;  %v1827_v48 = vld [vmem:[#allocation10 + $0xae8] sm:$0xff]  ;;  %v1596_v18 = vld [vmem:[#allocation10 + $0x3b0] sm:$0xff] }
 0x1a6   : > { %1995 = vmatmul.f32.vlgmr.msrb.gmra.mxu1 %v4795_v2  ;;  %2044 = vmatpush.msra.mxu0 %v1647_v24  ;;  %v1627_v49 = vld [vmem:[#allocation10 + $0x4a8] sm:$0xff]  ;;  %v1660_v19 = vld [vmem:[#allocation10 + $0x5b0] sm:$0xff] }
 0x1a7   : > { %2064 = vmatpush.msra.mxu1 %v1711_v25  ;;  %2084 = vmatpush.msra.mxu2 %v1775_v26  ;;  %v1691_v22 = vld [vmem:[#allocation10 + $0x6a8] sm:$0xff]  ;;  %v1728_v20 = vld [vmem:[#allocation10 + $0x7d0] sm:$0xff] }
 0x1a8   : > { %2103 = vmatpush.msra.mxu3 %v1843_v27  ;;  %2045 = vmatpush.msra.mxu0 %v1643_v28  ;;  %v1755_v50 = vld [vmem:[#allocation10 + $0x8a8] sm:$0xff]  ;;  %v1528_v21 = vld [vmem:[#allocation10 + $0x190] sm:$0xff] }
 0x1a9   : > { %2065 = vmatpush.msra.mxu1 %v1707_v29  ;;  %2085 = vmatpush.msra.mxu2 %v1771_v39  ;;  %v1823_v52 = vld [vmem:[#allocation10 + $0xac8] sm:$0xff]  ;;  %v1592_v23 = vld [vmem:[#allocation10 + $0x390] sm:$0xff] }
 0x1aa   : > { %2104 = vmatpush.msra.mxu3 %v1839_v31  ;;  %2046 = vmatpush.msra.mxu0 %v1639_v32  ;;  %v1687_v54 = vld [vmem:[#allocation10 + $0x688] sm:$0xff]  ;;  %v1656_v24 = vld [vmem:[#allocation10 + $0x590] sm:$0xff] }
 0x1ab   : > { %2066 = vmatpush.msra.mxu1 %v1703_v33  ;;  %2086 = vmatpush.msra.mxu2 %v1767_v34  ;;  %v1751_v55 = vld [vmem:[#allocation10 + $0x888] sm:$0xff]  ;;  %v1724_v25 = vld [vmem:[#allocation10 + $0x7b0] sm:$0xff] }
 0x1ac   : > { %2105 = vmatpush.msra.mxu3 %v1835_v35  ;;  %2047 = vmatpush.msra.mxu0 %v1635_v36  ;;  %v1819_v56 = vld [vmem:[#allocation10 + $0xaa8] sm:$0xff]  ;;  %v1524_v26 = vld [vmem:[#allocation10 + $0x170] sm:$0xff] }
 0x1ad   : > { %2067 = vmatpush.msra.mxu1 %v1699_v37  ;;  %2087 = vmatpush.msra.mxu2 %v1763_v38  ;;  %v1619_v57 = vld [vmem:[#allocation10 + $0x468] sm:$0xff]  ;;  %v1588_v27 = vld [vmem:[#allocation10 + $0x370] sm:$0xff] }
 0x1ae   : > { %2106 = vmatpush.msra.mxu3 %v1831_v47  ;;  %2048 = vmatpush.msra.mxu0 %v1631_v40  ;;  %v1683_v58 = vld [vmem:[#allocation10 + $0x668] sm:$0xff]  ;;  %v1652_v28 = vld [vmem:[#allocation10 + $0x570] sm:$0xff] }
 0x1af   : > { %2068 = vmatpush.msra.mxu1 %v1695_v41  ;;  %2088 = vmatpush.msra.mxu2 %v1759_v46  ;;  %v1747_v60 = vld [vmem:[#allocation10 + $0x868] sm:$0xff]  ;;  %v1720_v29 = vld [vmem:[#allocation10 + $0x790] sm:$0xff] }
 0x1b0   : > { %2107 = vmatpush.msra.mxu3 %v1827_v48  ;;  %2049 = vmatpush.msra.mxu0 %v1627_v49  ;;  %v1815_v30 = vld [vmem:[#allocation10 + $0xa88] sm:$0xff]  ;;  %v1520_v39 = vld [vmem:[#allocation10 + $0x150] sm:$0xff] }
 0x1b1   : > { %2069 = vmatpush.msra.mxu1 %v1691_v22  ;;  %2089 = vmatpush.msra.mxu2 %v1755_v50  ;;  %v1615_v61 = vld [vmem:[#allocation10 + $0x448] sm:$0xff]  ;;  %v1584_v31 = vld [vmem:[#allocation10 + $0x350] sm:$0xff] }
 0x1b2   : > { %2108 = vmatpush.msra.mxu3 %v1823_v52  ;;  %2050 = vmatpush.msra.mxu0 %v1623_v53  ;;  %v1679_v62 = vld [vmem:[#allocation10 + $0x648] sm:$0xff]  ;;  %v1648_v32 = vld [vmem:[#allocation10 + $0x550] sm:$0xff] }
 0x1b3   : > { %2070 = vmatpush.msra.mxu1 %v1687_v54  ;;  %2090 = vmatpush.msra.mxu2 %v1751_v55  ;;  %v1743_v63 = vld [vmem:[#allocation10 + $0x848] sm:$0xff]  ;;  %v1716_v33 = vld [vmem:[#allocation10 + $0x770] sm:$0xff] }
 0x1b4   : > { %2109 = vmatpush.msra.mxu3 %v1819_v56  ;;  %2051 = vmatpush.msra.mxu0 %v1619_v57  ;;  %v1811_v51 = vld [vmem:[#allocation10 + $0xa68] sm:$0xff]  ;;  %v1516_v34 = vld [vmem:[#allocation10 + $0x130] sm:$0xff] }
 0x1b5   : > { %2071 = vmatpush.msra.mxu1 %v1683_v58  ;;  %2091 = vmatpush.msra.mxu2 %v1747_v60  ;;  %v1611_v0 = vld [vmem:[#allocation10 + $0x428] sm:$0xff]  ;;  %v1580_v35 = vld [vmem:[#allocation10 + $0x330] sm:$0xff] }
 0x1b6   : > { %2110 = vmatpush.msra.mxu3 %v1815_v30  ;;  %v1675_v3 = vld [vmem:[#allocation10 + $0x628] sm:$0xff]  ;;  %2052 = vmatpush.msra.mxu0 %v1615_v61  ;;  %v1644_v36 = vld [vmem:[#allocation10 + $0x530] sm:$0xff] }
 0x1b7   : > { %2072 = vmatpush.msra.mxu1 %v1679_v62  ;;  %v1739_v4 = vld [vmem:[#allocation10 + $0x828] sm:$0xff]  ;;  %2092 = vmatpush.msra.mxu2 %v1743_v63  ;;  %v1712_v37 = vld [vmem:[#allocation10 + $0x750] sm:$0xff] }
 0x1b8   : > { %v1807_v5 = vld [vmem:[#allocation10 + $0xa48] sm:$0xff]  ;;  %2111 = vmatpush.msra.mxu3 %v1811_v51  ;;  %2053 = vmatpush.msra.mxu0 %v1611_v0  ;;  %v1512_v38 = vld [vmem:[#allocation10 + $0x110] sm:$0xff] }
 0x1b9   : > { %v1607_v6 = vld [vmem:[#allocation10 + $0x408] sm:$0xff]  ;;  %2073 = vmatpush.msra.mxu1 %v1675_v3  ;;  %2093 = vmatpush.msra.mxu2 %v1739_v4  ;;  %v1576_v47 = vld [vmem:[#allocation10 + $0x310] sm:$0xff] }
 0x1ba   : > { %v1671_v7 = vld [vmem:[#allocation10 + $0x608] sm:$0xff]  ;;  %2112 = vmatpush.msra.mxu3 %v1807_v5  ;;  %2015 = vmatmul.f32.vlgmr.msrb.gmra.mxu2 %v4787_v43  ;;  %v1640_v40 = vld [vmem:[#allocation10 + $0x510] sm:$0xff] }
 0x1bb   : > { %v1735_v8 = vld [vmem:[#allocation10 + $0x808] sm:$0xff]  ;;  %2054 = vmatpush.msra.mxu0 %v1607_v6  ;;  %2074 = vmatpush.msra.mxu1 %v1671_v7  ;;  %v1708_v41 = vld [vmem:[#allocation10 + $0x730] sm:$0xff] }
 0x1bc   : > { %v1803_v9 = vld [vmem:[#allocation10 + $0xa28] sm:$0xff]  ;;  %2094 = vmatpush.msra.mxu2 %v1735_v8  ;;  %2035 = vmatmul.f32.vlgmr.msrb.gmra.mxu3 %v4789_v44  ;;  %v1508_v46 = vld [vmem:[#allocation10 + $0xf0] sm:$0xff] }
 0x1bd   : > { %v1799_v13 = vld [vmem:[#allocation10 + $0xa08] sm:$0xff]  ;;  %2113 = vmatpush.msra.mxu3 %v1803_v9  ;;  %2119 = vmatpush.msrb.mxu0 %v1540_v10  ;;  %v1572_v48 = vld [vmem:[#allocation10 + $0x2f0] sm:$0xff] }
 0x1be   : > { %2139 = vmatpush.msrb.mxu1 %v1604_v11  ;;  %2159 = vmatpush.msrb.mxu2 %v1668_v12  ;;  %v1636_v49 = vld [vmem:[#allocation10 + $0x4f0] sm:$0xff] }
 0x1bf   : > { %2114 = vmatpush.msra.mxu3 %v1799_v13  ;;  %2120 = vmatpush.msrb.mxu0 %v1536_v14  ;;  %v1704_v22 = vld [vmem:[#allocation10 + $0x710] sm:$0xff] }
 0x1c0   : > { %2140 = vmatpush.msrb.mxu1 %v1600_v59  ;;  %2160 = vmatpush.msrb.mxu2 %v1664_v15  ;;  %v1504_v50 = vld [vmem:[#allocation10 + $0xd0] sm:$0xff] }
 0x1c1   : > { %2179 = vmatpush.msrb.mxu3 %v1732_v16  ;;  %2121 = vmatpush.msrb.mxu0 %v1532_v17  ;;  %v1568_v52 = vld [vmem:[#allocation10 + $0x2d0] sm:$0xff]  ;;  %v1541_v17 = vld [vmem:[#allocation10 + $0x1f8] sm:$0xff] }
 0x1c2   : > { %2141 = vmatpush.msrb.mxu1 %v1596_v18  ;;  %2161 = vmatpush.msrb.mxu2 %v1660_v19  ;;  %v1632_v53 = vld [vmem:[#allocation10 + $0x4d0] sm:$0xff] }
 0x1c3   : > { %2180 = vmatpush.msrb.mxu3 %v1728_v20  ;;  %2095 = vmatmul.f32.vlgmr.msra.gmra.mxu2 %v4793_v1  ;;  %v1700_v54 = vld [vmem:[#allocation10 + $0x6f0] sm:$0xff] }
 0x1c4   : > { %2122 = vmatpush.msrb.mxu0 %v1528_v21  ;;  %2142 = vmatpush.msrb.mxu1 %v1592_v23  ;;  %v1500_v55 = vld [vmem:[#allocation10 + $0xb0] sm:$0xff]  ;;  %v1537_v21 = vld [vmem:[#allocation10 + $0x1d8] sm:$0xff] }
 0x1c5   : > { %2162 = vmatpush.msrb.mxu2 %v1656_v24  ;;  %2181 = vmatpush.msrb.mxu3 %v1724_v25  ;;  %v1564_v56 = vld [vmem:[#allocation10 + $0x2b0] sm:$0xff]  ;;  %v1605_v23 = vld [vmem:[#allocation10 + $0x3f8] sm:$0xff] }
 0x1c6   : > { %2055 = vmatmul.f32.vlgmr.msra.gmra.mxu0 %v4785_v42  ;;  %2115 = vmatmul.f32.vlgmr.msra.gmra.mxu3 %v4795_v2  ;;  %v1628_v57 = vld [vmem:[#allocation10 + $0x4b0] sm:$0xff] }
 0x1c7   : > { %2123 = vmatpush.msrb.mxu0 %v1524_v26  ;;  %2143 = vmatpush.msrb.mxu1 %v1588_v27  ;;  %v1696_v58 = vld [vmem:[#allocation10 + $0x6d0] sm:$0xff]  ;;  %v1533_v26 = vld [vmem:[#allocation10 + $0x1b8] sm:$0xff] }
 0x1c8   : > { %2163 = vmatpush.msrb.mxu2 %v1652_v28  ;;  %2182 = vmatpush.msrb.mxu3 %v1720_v29  ;;  %v1496_v60 = vld [vmem:[#allocation10 + $0x90] sm:$0xff]  ;;  %v1601_v27 = vld [vmem:[#allocation10 + $0x3d8] sm:$0xff] }
 0x1c9   : > { %2075 = vmatmul.f32.vlgmr.msra.gmra.mxu1 %v4791_v45  ;;  %2124 = vmatpush.msrb.mxu0 %v1520_v39  ;;  %v1560_v30 = vld [vmem:[#allocation10 + $0x290] sm:$0xff]  ;;  %v1529_v39 = vld [vmem:[#allocation10 + $0x198] sm:$0xff] }
 0x1ca   : > { %2144 = vmatpush.msrb.mxu1 %v1584_v31  ;;  %2164 = vmatpush.msrb.mxu2 %v1648_v32  ;;  %v1624_v61 = vld [vmem:[#allocation10 + $0x490] sm:$0xff]  ;;  %v1597_v31 = vld [vmem:[#allocation10 + $0x3b8] sm:$0xff] }
 0x1cb   : > { %2183 = vmatpush.msrb.mxu3 %v1716_v33  ;;  %2125 = vmatpush.msrb.mxu0 %v1516_v34  ;;  %v1692_v62 = vld [vmem:[#allocation10 + $0x6b0] sm:$0xff]  ;;  %v1525_v34 = vld [vmem:[#allocation10 + $0x178] sm:$0xff] }
 0x1cc   : > { %2145 = vmatpush.msrb.mxu1 %v1580_v35  ;;  %2165 = vmatpush.msrb.mxu2 %v1644_v36  ;;  %v1492_v63 = vld [vmem:[#allocation10 + $0x70] sm:$0xff]  ;;  %v1593_v35 = vld [vmem:[#allocation10 + $0x398] sm:$0xff] }
 0x1cd   : > { %2184 = vmatpush.msrb.mxu3 %v1712_v37  ;;  %2126 = vmatpush.msrb.mxu0 %v1512_v38  ;;  %v1556_v51 = vld [vmem:[#allocation10 + $0x270] sm:$0xff]  ;;  %v1521_v38 = vld [vmem:[#allocation10 + $0x158] sm:$0xff] }
 0x1ce   : > { %2146 = vmatpush.msrb.mxu1 %v1576_v47  ;;  %2166 = vmatpush.msrb.mxu2 %v1640_v40  ;;  %v1620_v0 = vld [vmem:[#allocation10 + $0x470] sm:$0xff]  ;;  %v1589_v47 = vld [vmem:[#allocation10 + $0x378] sm:$0xff] }
 0x1cf   : > { %2185 = vmatpush.msrb.mxu3 %v1708_v41  ;;  %2127 = vmatpush.msrb.mxu0 %v1508_v46  ;;  %v1688_v3 = vld [vmem:[#allocation10 + $0x690] sm:$0xff]  ;;  %v1517_v46 = vld [vmem:[#allocation10 + $0x138] sm:$0xff] }
 0x1d0   : > { %2147 = vmatpush.msrb.mxu1 %v1572_v48  ;;  %2167 = vmatpush.msrb.mxu2 %v1636_v49  ;;  %v1488_v4 = vld [vmem:[#allocation10 + $0x50] sm:$0xff]  ;;  %v1585_v48 = vld [vmem:[#allocation10 + $0x358] sm:$0xff] }
 0x1d1   : > { %2186 = vmatpush.msrb.mxu3 %v1704_v22  ;;  %2128 = vmatpush.msrb.mxu0 %v1504_v50  ;;  %v1552_v5 = vld [vmem:[#allocation10 + $0x250] sm:$0xff]  ;;  %v1513_v50 = vld [vmem:[#allocation10 + $0x118] sm:$0xff] }
 0x1d2   : > { %2148 = vmatpush.msrb.mxu1 %v1568_v52  ;;  %2168 = vmatpush.msrb.mxu2 %v1632_v53  ;;  %v1616_v6 = vld [vmem:[#allocation10 + $0x450] sm:$0xff]  ;;  %v1581_v52 = vld [vmem:[#allocation10 + $0x338] sm:$0xff] }
 0x1d3   : > { %2187 = vmatpush.msrb.mxu3 %v1700_v54  ;;  %2129 = vmatpush.msrb.mxu0 %v1500_v55  ;;  %v1684_v7 = vld [vmem:[#allocation10 + $0x670] sm:$0xff]  ;;  %v1509_v55 = vld [vmem:[#allocation10 + $0xf8] sm:$0xff] }
 0x1d4   : > { %2149 = vmatpush.msrb.mxu1 %v1564_v56  ;;  %2169 = vmatpush.msrb.mxu2 %v1628_v57  ;;  %v1484_v8 = vld [vmem:[#allocation10 + $0x30] sm:$0xff]  ;;  %v1577_v56 = vld [vmem:[#allocation10 + $0x318] sm:$0xff] }
 0x1d5   : > { %2188 = vmatpush.msrb.mxu3 %v1696_v58  ;;  %2130 = vmatpush.msrb.mxu0 %v1496_v60  ;;  %v1548_v9 = vld [vmem:[#allocation10 + $0x230] sm:$0xff]  ;;  %v1505_v60 = vld [vmem:[#allocation10 + $0xd8] sm:$0xff] }
 0x1d6   : > { %2150 = vmatpush.msrb.mxu1 %v1560_v30  ;;  %2170 = vmatpush.msrb.mxu2 %v1624_v61  ;;  %v1612_v10 = vld [vmem:[#allocation10 + $0x430] sm:$0xff]  ;;  %v1573_v30 = vld [vmem:[#allocation10 + $0x2f8] sm:$0xff] }
 0x1d7   : > { %2189 = vmatpush.msrb.mxu3 %v1692_v62  ;;  %2131 = vmatpush.msrb.mxu0 %v1492_v63  ;;  %v1680_v11 = vld [vmem:[#allocation10 + $0x650] sm:$0xff]  ;;  %v1501_v63 = vld [vmem:[#allocation10 + $0xb8] sm:$0xff] }
 0x1d8   : > { %2151 = vmatpush.msrb.mxu1 %v1556_v51  ;;  %2171 = vmatpush.msrb.mxu2 %v1620_v0  ;;  %v1480_v12 = vld [vmem:[#allocation10 + $0x10] sm:$0xff]  ;;  %v1569_v51 = vld [vmem:[#allocation10 + $0x2d8] sm:$0xff] }
 0x1d9   : > { %2190 = vmatpush.msrb.mxu3 %v1688_v3  ;;  %2132 = vmatpush.msrb.mxu0 %v1488_v4  ;;  %v1544_v13 = vld [vmem:[#allocation10 + $0x210] sm:$0xff]  ;;  %v1497_v4 = vld [vmem:[#allocation10 + $0x98] sm:$0xff] }
 0x1da   : > { %2152 = vmatpush.msrb.mxu1 %v1552_v5  ;;  %2172 = vmatpush.msrb.mxu2 %v1616_v6  ;;  %v1608_v14 = vld [vmem:[#allocation10 + $0x410] sm:$0xff]  ;;  %v1565_v5 = vld [vmem:[#allocation10 + $0x2b8] sm:$0xff] }
 0x1db   : > { %2191 = vmatpush.msrb.mxu3 %v1684_v7  ;;  %2133 = vmatpush.msrb.mxu0 %v1484_v8  ;;  %v1676_v59 = vld [vmem:[#allocation10 + $0x630] sm:$0xff]  ;;  %v1493_v8 = vld [vmem:[#allocation10 + $0x78] sm:$0xff] }
 0x1dc   : > { %2153 = vmatpush.msrb.mxu1 %v1548_v9  ;;  %2173 = vmatpush.msrb.mxu2 %v1612_v10  ;;  %v1796_v15 = vld [vmem:[#allocation10 + $0x9f0] sm:$0xff]  ;;  %v1561_v9 = vld [vmem:[#allocation10 + $0x298] sm:$0xff] }
 0x1dd   : > { %2192 = vmatpush.msrb.mxu3 %v1680_v11  ;;  %v1860_v16 = vld [vmem:[#allocation10 + $0xbf0] sm:$0xff]  ;;  %2134 = vmatpush.msrb.mxu0 %v1480_v12  ;;  %v1489_v12 = vld [vmem:[#allocation10 + $0x58] sm:$0xff] }
 0x1de   : > { %2154 = vmatpush.msrb.mxu1 %v1544_v13  ;;  %v1672_v18 = vld [vmem:[#allocation10 + $0x610] sm:$0xff]  ;;  %2174 = vmatpush.msrb.mxu2 %v1608_v14  ;;  %v1557_v13 = vld [vmem:[#allocation10 + $0x278] sm:$0xff] }
 0x1df   : > { %2193 = vmatpush.msrb.mxu3 %v1676_v59  ;;  %v1792_v19 = vld [vmem:[#allocation10 + $0x9d0] sm:$0xff]  ;;  %2199 = vmatpush.msra.mxu0 %v1796_v15  ;;  %v1485_v15 = vld [vmem:[#allocation10 + $0x38] sm:$0xff] }
 0x1e0   : > { %v1856_v20 = vld [vmem:[#allocation10 + $0xbd0] sm:$0xff]  ;;  %2219 = vmatpush.msra.mxu1 %v1860_v16  ;;  %2239 = vmatpush.msra.mxu2 %v1541_v17  ;;  %v1553_v16 = vld [vmem:[#allocation10 + $0x258] sm:$0xff] }
 0x1e1   : > { %2194 = vmatpush.msrb.mxu3 %v1672_v18  ;;  %v1788_v24 = vld [vmem:[#allocation10 + $0x9b0] sm:$0xff]  ;;  %2200 = vmatpush.msra.mxu0 %v1792_v19  ;;  %v1481_v19 = vld [vmem:[#allocation10 + $0x18] sm:$0xff] }
 0x1e2   : > { %v1852_v25 = vld [vmem:[#allocation10 + $0xbb0] sm:$0xff]  ;;  %2220 = vmatpush.msra.mxu1 %v1856_v20  ;;  %2240 = vmatpush.msra.mxu2 %v1537_v21  ;;  %v1549_v20 = vld [vmem:[#allocation10 + $0x238] sm:$0xff] }
 0x1e3   : > { %2259 = vmatpush.msra.mxu3 %v1605_v23  ;;  %v1784_v28 = vld [vmem:[#allocation10 + $0x990] sm:$0xff]  ;;  %2201 = vmatpush.msra.mxu0 %v1788_v24  ;;  %v1669_v21 = vld [vmem:[#allocation10 + $0x5f8] sm:$0xff] }
 0x1e4   : > { %v1848_v29 = vld [vmem:[#allocation10 + $0xb90] sm:$0xff]  ;;  %2221 = vmatpush.msra.mxu1 %v1852_v25  ;;  %2241 = vmatpush.msra.mxu2 %v1533_v26  ;;  %v1733_v23 = vld [vmem:[#allocation10 + $0x7f8] sm:$0xff] }
 0x1e5   : > { %2260 = vmatpush.msra.mxu3 %v1601_v27  ;;  %v1780_v32 = vld [vmem:[#allocation10 + $0x970] sm:$0xff]  ;;  %2202 = vmatpush.msra.mxu0 %v1784_v28  ;;  %v1797_v24 = vld [vmem:[#allocation10 + $0x9f8] sm:$0xff] }
 0x1e6   : > { %v1844_v33 = vld [vmem:[#allocation10 + $0xb70] sm:$0xff]  ;;  %2222 = vmatpush.msra.mxu1 %v1848_v29  ;;  %2242 = vmatpush.msra.mxu2 %v1529_v39  ;;  %v1545_v25 = vld [vmem:[#allocation10 + $0x218] sm:$0xff] }
 0x1e7   : > { %2261 = vmatpush.msra.mxu3 %v1597_v31  ;;  %v1776_v36 = vld [vmem:[#allocation10 + $0x950] sm:$0xff]  ;;  %2203 = vmatpush.msra.mxu0 %v1780_v32  ;;  %v1665_v26 = vld [vmem:[#allocation10 + $0x5d8] sm:$0xff] }
 0x1e8   : > { %v1840_v37 = vld [vmem:[#allocation10 + $0xb50] sm:$0xff]  ;;  %2223 = vmatpush.msra.mxu1 %v1844_v33  ;;  %2243 = vmatpush.msra.mxu2 %v1525_v34  ;;  %v1729_v27 = vld [vmem:[#allocation10 + $0x7d8] sm:$0xff] }
 0x1e9   : > { %2262 = vmatpush.msra.mxu3 %v1593_v35  ;;  %v1772_v40 = vld [vmem:[#allocation10 + $0x930] sm:$0xff]  ;;  %2204 = vmatpush.msra.mxu0 %v1776_v36  ;;  %v1793_v28 = vld [vmem:[#allocation10 + $0x9d8] sm:$0xff] }
 0x1ea   : > { %v1836_v41 = vld [vmem:[#allocation10 + $0xb30] sm:$0xff]  ;;  %2224 = vmatpush.msra.mxu1 %v1840_v37  ;;  %2244 = vmatpush.msra.mxu2 %v1521_v38  ;;  %v1861_v29 = vld [vmem:[#allocation10 + $0xbf8] sm:$0xff] }
 0x1eb   : > { %2263 = vmatpush.msra.mxu3 %v1589_v47  ;;  %v1768_v49 = vld [vmem:[#allocation10 + $0x910] sm:$0xff]  ;;  %2205 = vmatpush.msra.mxu0 %v1772_v40  ;;  %v1661_v39 = vld [vmem:[#allocation10 + $0x5b8] sm:$0xff] }
 0x1ec   : > { %v1832_v22 = vld [vmem:[#allocation10 + $0xb10] sm:$0xff]  ;;  %2225 = vmatpush.msra.mxu1 %v1836_v41  ;;  %2245 = vmatpush.msra.mxu2 %v1517_v46  ;;  %v1725_v31 = vld [vmem:[#allocation10 + $0x7b8] sm:$0xff] }
 0x1ed   : > { %2264 = vmatpush.msra.mxu3 %v1585_v48  ;;  %v1764_v53 = vld [vmem:[#allocation10 + $0x8f0] sm:$0xff]  ;;  %2206 = vmatpush.msra.mxu0 %v1768_v49  ;;  %v1789_v32 = vld [vmem:[#allocation10 + $0x9b8] sm:$0xff] }
 0x1ee   : > { %v1828_v54 = vld [vmem:[#allocation10 + $0xaf0] sm:$0xff]  ;;  %2226 = vmatpush.msra.mxu1 %v1832_v22  ;;  %2246 = vmatpush.msra.mxu2 %v1513_v50  ;;  %v1857_v33 = vld [vmem:[#allocation10 + $0xbd8] sm:$0xff] }
 0x1ef   : > { %2265 = vmatpush.msra.mxu3 %v1581_v52  ;;  %v1760_v57 = vld [vmem:[#allocation10 + $0x8d0] sm:$0xff]  ;;  %2207 = vmatpush.msra.mxu0 %v1764_v53  ;;  %v1657_v34 = vld [vmem:[#allocation10 + $0x598] sm:$0xff] }
 0x1f0   : > { %v1824_v58 = vld [vmem:[#allocation10 + $0xad0] sm:$0xff]  ;;  %2227 = vmatpush.msra.mxu1 %v1828_v54  ;;  %2247 = vmatpush.msra.mxu2 %v1509_v55  ;;  %v1721_v35 = vld [vmem:[#allocation10 + $0x798] sm:$0xff] }
 0x1f1   : > { %2266 = vmatpush.msra.mxu3 %v1577_v56  ;;  %v1756_v61 = vld [vmem:[#allocation10 + $0x8b0] sm:$0xff]  ;;  %2208 = vmatpush.msra.mxu0 %v1760_v57  ;;  %v1785_v36 = vld [vmem:[#allocation10 + $0x998] sm:$0xff] }
 0x1f2   : > { %v1820_v62 = vld [vmem:[#allocation10 + $0xab0] sm:$0xff]  ;;  %2228 = vmatpush.msra.mxu1 %v1824_v58  ;;  %2248 = vmatpush.msra.mxu2 %v1505_v60  ;;  %v1853_v37 = vld [vmem:[#allocation10 + $0xbb8] sm:$0xff] }
 0x1f3   : > { %2267 = vmatpush.msra.mxu3 %v1573_v30  ;;  %v1752_v0 = vld [vmem:[#allocation10 + $0x890] sm:$0xff]  ;;  %2209 = vmatpush.msra.mxu0 %v1756_v61  ;;  %v1717_v38 = vld [vmem:[#allocation10 + $0x778] sm:$0xff] }
 0x1f4   : > { %v1816_v3 = vld [vmem:[#allocation10 + $0xa90] sm:$0xff]  ;;  %2229 = vmatpush.msra.mxu1 %v1820_v62  ;;  %2249 = vmatpush.msra.mxu2 %v1501_v63  ;;  %v1653_v47 = vld [vmem:[#allocation10 + $0x578] sm:$0xff] }
 0x1f5   : > { %2268 = vmatpush.msra.mxu3 %v1569_v51  ;;  %v1748_v6 = vld [vmem:[#allocation10 + $0x870] sm:$0xff]  ;;  %2210 = vmatpush.msra.mxu0 %v1752_v0  ;;  %v1781_v40 = vld [vmem:[#allocation10 + $0x978] sm:$0xff] }
 0x1f6   : > { %v1812_v7 = vld [vmem:[#allocation10 + $0xa70] sm:$0xff]  ;;  %2230 = vmatpush.msra.mxu1 %v1816_v3  ;;  %2250 = vmatpush.msra.mxu2 %v1497_v4  ;;  %v1849_v41 = vld [vmem:[#allocation10 + $0xb98] sm:$0xff] }
 0x1f7   : > { %2269 = vmatpush.msra.mxu3 %v1565_v5  ;;  %v1744_v10 = vld [vmem:[#allocation10 + $0x850] sm:$0xff]  ;;  %2211 = vmatpush.msra.mxu0 %v1748_v6  ;;  %v1649_v46 = vld [vmem:[#allocation10 + $0x558] sm:$0xff] }
 0x1f8   : > { %v1808_v11 = vld [vmem:[#allocation10 + $0xa50] sm:$0xff]  ;;  %2231 = vmatpush.msra.mxu1 %v1812_v7  ;;  %2251 = vmatpush.msra.mxu2 %v1493_v8  ;;  %v1713_v48 = vld [vmem:[#allocation10 + $0x758] sm:$0xff] }
 0x1f9   : > { %2270 = vmatpush.msra.mxu3 %v1561_v9  ;;  %v1740_v14 = vld [vmem:[#allocation10 + $0x830] sm:$0xff]  ;;  %2212 = vmatpush.msra.mxu0 %v1744_v10  ;;  %v1777_v49 = vld [vmem:[#allocation10 + $0x958] sm:$0xff] }
 0x1fa   : > { %v1804_v59 = vld [vmem:[#allocation10 + $0xa30] sm:$0xff]  ;;  %2232 = vmatpush.msra.mxu1 %v1808_v11  ;;  %2252 = vmatpush.msra.mxu2 %v1489_v12  ;;  %v1845_v22 = vld [vmem:[#allocation10 + $0xb78] sm:$0xff] }
 0x1fb   : > { %2271 = vmatpush.msra.mxu3 %v1557_v13  ;;  %v1736_v17 = vld [vmem:[#allocation10 + $0x810] sm:$0xff]  ;;  %2213 = vmatpush.msra.mxu0 %v1740_v14  ;;  %v1645_v50 = vld [vmem:[#allocation10 + $0x538] sm:$0xff] }
 0x1fc   : > { %2233 = vmatpush.msra.mxu1 %v1804_v59  ;;  %v1800_v18 = vld [vmem:[#allocation10 + $0xa10] sm:$0xff]  ;;  %2253 = vmatpush.msra.mxu2 %v1485_v15  ;;  %v1709_v52 = vld [vmem:[#allocation10 + $0x738] sm:$0xff] }
 0x1fd   : > { %2272 = vmatpush.msra.mxu3 %v1553_v16  ;;  %2175 = vmatmul.f32.vlgmr.msrb.gmra.mxu2 %v4785_v42  ;;  %v1773_v53 = vld [vmem:[#allocation10 + $0x938] sm:$0xff] }
 0x1fe   : > { %2214 = vmatpush.msra.mxu0 %v1736_v17  ;;  %2234 = vmatpush.msra.mxu1 %v1800_v18  ;;  %v1841_v54 = vld [vmem:[#allocation10 + $0xb58] sm:$0xff] }
 0x1ff   : > { %2254 = vmatpush.msra.mxu2 %v1481_v19  ;;  %2273 = vmatpush.msra.mxu3 %v1549_v20  ;;  %v1641_v55 = vld [vmem:[#allocation10 + $0x518] sm:$0xff] }
 0x200   : > { %2135 = vmatmul.f32.vlgmr.msrb.gmra.mxu0 %v4787_v43  ;;  %2155 = vmatmul.f32.vlgmr.msrb.gmra.mxu1 %v4789_v44  ;;  %v1705_v56 = vld [vmem:[#allocation10 + $0x718] sm:$0xff] }
 0x201   : > { %2195 = vmatmul.f32.vlgmr.msrb.gmra.mxu3 %v4791_v45  ;;  %2279 = vmatpush.msrb.mxu0 %v1669_v21  ;;  %v1769_v57 = vld [vmem:[#allocation10 + $0x918] sm:$0xff] }
 0x202   : > { %2299 = vmatpush.msrb.mxu1 %v1733_v23  ;;  %2319 = vmatpush.msrb.mxu2 %v1797_v24  ;;  %v1837_v58 = vld [vmem:[#allocation10 + $0xb38] sm:$0xff] }
 0x203   : > { %2274 = vmatpush.msra.mxu3 %v1545_v25  ;;  %2280 = vmatpush.msrb.mxu0 %v1665_v26  ;;  %v1637_v60 = vld [vmem:[#allocation10 + $0x4f8] sm:$0xff] }
 0x204   : > { %2300 = vmatpush.msrb.mxu1 %v1729_v27  ;;  %2320 = vmatpush.msrb.mxu2 %v1793_v28  ;;  %v1701_v30 = vld [vmem:[#allocation10 + $0x6f8] sm:$0xff]  ;;  %v1154_v28 = vld [vmem:[#allocation8 + $0x1e0] sm:$0xff] }
 0x205   : > { %2339 = vmatpush.msrb.mxu3 %v1861_v29  ;;  %2281 = vmatpush.msrb.mxu0 %v1661_v39  ;;  %v1765_v61 = vld [vmem:[#allocation10 + $0x8f8] sm:$0xff]  ;;  %v1218_v29 = vld [vmem:[#allocation8 + $0x3e0] sm:$0xff] }
 0x206   : > { %2301 = vmatpush.msrb.mxu1 %v1725_v31  ;;  %2321 = vmatpush.msrb.mxu2 %v1789_v32  ;;  %v1833_v62 = vld [vmem:[#allocation10 + $0xb18] sm:$0xff]  ;;  %v1282_v39 = vld [vmem:[#allocation8 + $0x5e0] sm:$0xff] }
 0x207   : > { %2340 = vmatpush.msrb.mxu3 %v1857_v33  ;;  %2282 = vmatpush.msrb.mxu0 %v1657_v34  ;;  %v1633_v63 = vld [vmem:[#allocation10 + $0x4d8] sm:$0xff]  ;;  %v1150_v32 = vld [vmem:[#allocation8 + $0x1c0] sm:$0xff] }
 0x208   : > { %2302 = vmatpush.msrb.mxu1 %v1721_v35  ;;  %2322 = vmatpush.msrb.mxu2 %v1785_v36  ;;  %v1697_v51 = vld [vmem:[#allocation10 + $0x6d8] sm:$0xff]  ;;  %v1214_v33 = vld [vmem:[#allocation8 + $0x3c0] sm:$0xff] }
 0x209   : > { %2341 = vmatpush.msrb.mxu3 %v1853_v37  ;;  %2215 = vmatmul.f32.vlgmr.msra.gmra.mxu0 %v4793_v1  ;;  %v1761_v0 = vld [vmem:[#allocation10 + $0x8d8] sm:$0xff]  ;;  %v1278_v34 = vld [vmem:[#allocation8 + $0x5c0] sm:$0xff] }
 0x20a   : > { %2303 = vmatpush.msrb.mxu1 %v1717_v38  ;;  %2283 = vmatpush.msrb.mxu0 %v1653_v47  ;;  %v1829_v3 = vld [vmem:[#allocation10 + $0xaf8] sm:$0xff]  ;;  %v1346_v35 = vld [vmem:[#allocation8 + $0x7e0] sm:$0xff] }
 0x20b   : > { %2323 = vmatpush.msrb.mxu2 %v1781_v40  ;;  %2342 = vmatpush.msrb.mxu3 %v1849_v41  ;;  %v1629_v4 = vld [vmem:[#allocation10 + $0x4b8] sm:$0xff]  ;;  %v1146_v36 = vld [vmem:[#allocation8 + $0x1a0] sm:$0xff] }
 0x20c   : > { %2235 = vmatmul.f32.vlgmr.msra.gmra.mxu1 %v4795_v2  ;;  %2284 = vmatpush.msrb.mxu0 %v1649_v46  ;;  %v1693_v5 = vld [vmem:[#allocation10 + $0x6b8] sm:$0xff]  ;;  %v1210_v37 = vld [vmem:[#allocation8 + $0x3a0] sm:$0xff] }
 0x20d   : > { %2304 = vmatpush.msrb.mxu1 %v1713_v48  ;;  %2324 = vmatpush.msrb.mxu2 %v1777_v49  ;;  %v1757_v6 = vld [vmem:[#allocation10 + $0x8b8] sm:$0xff]  ;;  %v1342_v38 = vld [vmem:[#allocation8 + $0x7c0] sm:$0xff] }
 0x20e   : > { %2343 = vmatpush.msrb.mxu3 %v1845_v22  ;;  %2285 = vmatpush.msrb.mxu0 %v1645_v50  ;;  %v1825_v7 = vld [vmem:[#allocation10 + $0xad8] sm:$0xff]  ;;  %v1142_v47 = vld [vmem:[#allocation8 + $0x180] sm:$0xff] }
 0x20f   : > { %2305 = vmatpush.msrb.mxu1 %v1709_v52  ;;  %2325 = vmatpush.msrb.mxu2 %v1773_v53  ;;  %v1625_v8 = vld [vmem:[#allocation10 + $0x498] sm:$0xff]  ;;  %v1206_v40 = vld [vmem:[#allocation8 + $0x380] sm:$0xff] }
 0x210   : > { %2344 = vmatpush.msrb.mxu3 %v1841_v54  ;;  %2286 = vmatpush.msrb.mxu0 %v1641_v55  ;;  %v1689_v9 = vld [vmem:[#allocation10 + $0x698] sm:$0xff]  ;;  %v1270_v41 = vld [vmem:[#allocation8 + $0x580] sm:$0xff] }
 0x211   : > { %2306 = vmatpush.msrb.mxu1 %v1705_v56  ;;  %2326 = vmatpush.msrb.mxu2 %v1769_v57  ;;  %v1753_v10 = vld [vmem:[#allocation10 + $0x898] sm:$0xff]  ;;  %v1138_v46 = vld [vmem:[#allocation8 + $0x160] sm:$0xff] }
 0x212   : > { %2345 = vmatpush.msrb.mxu3 %v1837_v58  ;;  %2287 = vmatpush.msrb.mxu0 %v1637_v60  ;;  %v1821_v11 = vld [vmem:[#allocation10 + $0xab8] sm:$0xff]  ;;  %v1202_v48 = vld [vmem:[#allocation8 + $0x360] sm:$0xff] }
 0x213   : > { %2307 = vmatpush.msrb.mxu1 %v1701_v30  ;;  %2327 = vmatpush.msrb.mxu2 %v1765_v61  ;;  %v1621_v12 = vld [vmem:[#allocation10 + $0x478] sm:$0xff]  ;;  %v1266_v49 = vld [vmem:[#allocation8 + $0x560] sm:$0xff] }
 0x214   : > { %2346 = vmatpush.msrb.mxu3 %v1833_v62  ;;  %2288 = vmatpush.msrb.mxu0 %v1633_v63  ;;  %v1685_v13 = vld [vmem:[#allocation10 + $0x678] sm:$0xff]  ;;  %v1334_v22 = vld [vmem:[#allocation8 + $0x780] sm:$0xff] }
 0x215   : > { %2308 = vmatpush.msrb.mxu1 %v1697_v51  ;;  %2328 = vmatpush.msrb.mxu2 %v1761_v0  ;;  %v1749_v14 = vld [vmem:[#allocation10 + $0x878] sm:$0xff]  ;;  %v1134_v50 = vld [vmem:[#allocation8 + $0x140] sm:$0xff] }
 0x216   : > { %2347 = vmatpush.msrb.mxu3 %v1829_v3  ;;  %2289 = vmatpush.msrb.mxu0 %v1629_v4  ;;  %v1817_v59 = vld [vmem:[#allocation10 + $0xa98] sm:$0xff]  ;;  %v1198_v52 = vld [vmem:[#allocation8 + $0x340] sm:$0xff] }
 0x217   : > { %2309 = vmatpush.msrb.mxu1 %v1693_v5  ;;  %2329 = vmatpush.msrb.mxu2 %v1757_v6  ;;  %v1617_v15 = vld [vmem:[#allocation10 + $0x458] sm:$0xff]  ;;  %v1262_v53 = vld [vmem:[#allocation8 + $0x540] sm:$0xff] }
 0x218   : > { %2348 = vmatpush.msrb.mxu3 %v1825_v7  ;;  %2290 = vmatpush.msrb.mxu0 %v1625_v8  ;;  %v1681_v16 = vld [vmem:[#allocation10 + $0x658] sm:$0xff]  ;;  %v1330_v54 = vld [vmem:[#allocation8 + $0x760] sm:$0xff] }
 0x219   : > { %2310 = vmatpush.msrb.mxu1 %v1689_v9  ;;  %2330 = vmatpush.msrb.mxu2 %v1753_v10  ;;  %v1745_v17 = vld [vmem:[#allocation10 + $0x858] sm:$0xff]  ;;  %v1194_v55 = vld [vmem:[#allocation8 + $0x320] sm:$0xff] }
 0x21a   : > { %2349 = vmatpush.msrb.mxu3 %v1821_v11  ;;  %2291 = vmatpush.msrb.mxu0 %v1621_v12  ;;  %v1813_v18 = vld [vmem:[#allocation10 + $0xa78] sm:$0xff]  ;;  %v1258_v56 = vld [vmem:[#allocation8 + $0x520] sm:$0xff] }
 0x21b   : > { %2311 = vmatpush.msrb.mxu1 %v1685_v13  ;;  %2331 = vmatpush.msrb.mxu2 %v1749_v14  ;;  %v1613_v19 = vld [vmem:[#allocation10 + $0x438] sm:$0xff]  ;;  %v1326_v57 = vld [vmem:[#allocation8 + $0x740] sm:$0xff] }
 0x21c   : > { %2350 = vmatpush.msrb.mxu3 %v1817_v59  ;;  %v1677_v20 = vld [vmem:[#allocation10 + $0x638] sm:$0xff]  ;;  %2292 = vmatpush.msrb.mxu0 %v1617_v15  ;;  %v1254_v58 = vld [vmem:[#allocation8 + $0x500] sm:$0xff] }
 0x21d   : > { %2312 = vmatpush.msrb.mxu1 %v1681_v16  ;;  %v1741_v21 = vld [vmem:[#allocation10 + $0x838] sm:$0xff]  ;;  %2332 = vmatpush.msrb.mxu2 %v1745_v17  ;;  %v1322_v60 = vld [vmem:[#allocation8 + $0x720] sm:$0xff] }
 0x21e   : > { %v1809_v23 = vld [vmem:[#allocation10 + $0xa58] sm:$0xff]  ;;  %2351 = vmatpush.msrb.mxu3 %v1813_v18  ;;  %2293 = vmatpush.msrb.mxu0 %v1613_v19  ;;  %v1122_v30 = vld [vmem:[#allocation8 + $0xe0] sm:$0xff] }
 0x21f   : > { %v1609_v24 = vld [vmem:[#allocation10 + $0x418] sm:$0xff]  ;;  %2313 = vmatpush.msrb.mxu1 %v1677_v20  ;;  %2333 = vmatpush.msrb.mxu2 %v1741_v21  ;;  %v1186_v61 = vld [vmem:[#allocation8 + $0x2e0] sm:$0xff] }
 0x220   : > { %v1673_v25 = vld [vmem:[#allocation10 + $0x618] sm:$0xff]  ;;  %2352 = vmatpush.msrb.mxu3 %v1809_v23  ;;  %2255 = vmatmul.f32.vlgmr.msra.gmra.mxu2 %v4787_v43  ;;  %v1274_v43 = vld [vmem:[#allocation8 + $0x5a0] sm:$0xff] }
 0x221   : > { %v1737_v26 = vld [vmem:[#allocation10 + $0x818] sm:$0xff]  ;;  %2294 = vmatpush.msrb.mxu0 %v1609_v24  ;;  %2314 = vmatpush.msrb.mxu1 %v1673_v25  ;;  %v1318_v62 = vld [vmem:[#allocation8 + $0x700] sm:$0xff] }
 0x222   : > { %v1805_v27 = vld [vmem:[#allocation10 + $0xa38] sm:$0xff]  ;;  %2334 = vmatpush.msrb.mxu2 %v1737_v26  ;;  %2275 = vmatmul.f32.vlgmr.msra.gmra.mxu3 %v4789_v44  ;;  %v1338_v44 = vld [vmem:[#allocation8 + $0x7a0] sm:$0xff] }
 0x223   : > { %v1801_v31 = vld [vmem:[#allocation10 + $0xa18] sm:$0xff]  ;;  %2353 = vmatpush.msrb.mxu3 %v1805_v27  ;;  %2376 = vmatpush.msra.mxu0 %v1154_v28  ;;  %v1118_v63 = vld [vmem:[#allocation8 + $0xc0] sm:$0xff] }
 0x224   : > { %2396 = vmatpush.msra.mxu1 %v1218_v29  ;;  %2416 = vmatpush.msra.mxu2 %v1282_v39  ;;  %v1182_v51 = vld [vmem:[#allocation8 + $0x2c0] sm:$0xff]  ;;  %v4823_v29 = vld.sshfl [vmem:[#allocation1 + $0x10] sm:$0xff pattern:$0x73625140] }
 0x225   : > { %2354 = vmatpush.msrb.mxu3 %v1801_v31  ;;  %2377 = vmatpush.msra.mxu0 %v1150_v32  ;;  %v1246_v0 = vld [vmem:[#allocation8 + $0x4c0] sm:$0xff]  ;;  %v1155_v32 = vld [vmem:[#allocation8 + $0x1e8] sm:$0xff] }
 0x226   : > { %2397 = vmatpush.msra.mxu1 %v1214_v33  ;;  %2417 = vmatpush.msra.mxu2 %v1278_v34  ;;  %v1314_v3 = vld [vmem:[#allocation8 + $0x6e0] sm:$0xff]  ;;  %v4827_v34 = vld.sshfl [vmem:[#allocation1 + $0x8] sm:$0xff pattern:$0x73625140] }
 0x227   : > { %2436 = vmatpush.msra.mxu3 %v1346_v35  ;;  %2378 = vmatpush.msra.mxu0 %v1146_v36  ;;  %v1114_v4 = vld [vmem:[#allocation8 + $0xa0] sm:$0xff]  ;;  %v4829_v35 = vld.sshfl [vmem:[#allocation1 + $0x18] sm:$0xff pattern:$0x73625140] }
 0x228   : > { %2398 = vmatpush.msra.mxu1 %v1210_v37  ;;  %2418 = vmatpush.msra.mxu2 %v1274_v43  ;;  %v1178_v5 = vld [vmem:[#allocation8 + $0x2a0] sm:$0xff]  ;;  %v1151_v43 = vld [vmem:[#allocation8 + $0x1c8] sm:$0xff] }
 0x229   : > { %2437 = vmatpush.msra.mxu3 %v1342_v38  ;;  %2335 = vmatmul.f32.vlgmr.msrb.gmra.mxu2 %v4793_v1  ;;  %v1130_v1 = vld [vmem:[#allocation8 + $0x120] sm:$0xff]  ;;  %v1219_v38 = vld [vmem:[#allocation8 + $0x3e8] sm:$0xff] }
 0x22a   : > { %2379 = vmatpush.msra.mxu0 %v1142_v47  ;;  %2399 = vmatpush.msra.mxu1 %v1206_v40  ;;  %v1242_v6 = vld [vmem:[#allocation8 + $0x4a0] sm:$0xff] }
 0x22b   : > { %2419 = vmatpush.msra.mxu2 %v1270_v41  ;;  %2438 = vmatpush.msra.mxu3 %v1338_v44  ;;  %v1310_v7 = vld [vmem:[#allocation8 + $0x6c0] sm:$0xff]  ;;  %v1147_v41 = vld [vmem:[#allocation8 + $0x1a8] sm:$0xff] }
 0x22c   : > { %2295 = vmatmul.f32.vlgmr.msrb.gmra.mxu0 %v4785_v42  ;;  %2355 = vmatmul.f32.vlgmr.msrb.gmra.mxu3 %v4795_v2  ;;  %v1126_v42 = vld [vmem:[#allocation8 + $0x100] sm:$0xff]  ;;  %v1215_v44 = vld [vmem:[#allocation8 + $0x3c8] sm:$0xff] }
 0x22d   : > { %2380 = vmatpush.msra.mxu0 %v1138_v46  ;;  %2400 = vmatpush.msra.mxu1 %v1202_v48  ;;  %v1190_v2 = vld [vmem:[#allocation8 + $0x300] sm:$0xff] }
 0x22e   : > { %2420 = vmatpush.msra.mxu2 %v1266_v49  ;;  %2439 = vmatpush.msra.mxu3 %v1334_v22  ;;  %v1110_v8 = vld [vmem:[#allocation8 + $0x80] sm:$0xff]  ;;  %v1143_v49 = vld [vmem:[#allocation8 + $0x188] sm:$0xff] }
 0x22f   : > { %2315 = vmatmul.f32.vlgmr.msrb.gmra.mxu1 %v4791_v45  ;;  %2381 = vmatpush.msra.mxu0 %v1134_v50  ;;  %v1250_v45 = vld [vmem:[#allocation8 + $0x4e0] sm:$0xff]  ;;  %v1211_v22 = vld [vmem:[#allocation8 + $0x3a8] sm:$0xff] }
 0x230   : > { %2401 = vmatpush.msra.mxu1 %v1198_v52  ;;  %2421 = vmatpush.msra.mxu2 %v1262_v53  ;;  %v1174_v9 = vld [vmem:[#allocation8 + $0x280] sm:$0xff]  ;;  %v1139_v53 = vld [vmem:[#allocation8 + $0x168] sm:$0xff] }
 0x231   : > { %2440 = vmatpush.msra.mxu3 %v1330_v54  ;;  %2382 = vmatpush.msra.mxu0 %v1130_v1  ;;  %v1238_v10 = vld [vmem:[#allocation8 + $0x480] sm:$0xff]  ;;  %v1207_v54 = vld [vmem:[#allocation8 + $0x388] sm:$0xff] }
 0x232   : > { %2402 = vmatpush.msra.mxu1 %v1194_v55  ;;  %2422 = vmatpush.msra.mxu2 %v1258_v56  ;;  %v1306_v11 = vld [vmem:[#allocation8 + $0x6a0] sm:$0xff]  ;;  %v1135_v56 = vld [vmem:[#allocation8 + $0x148] sm:$0xff] }
 0x233   : > { %2441 = vmatpush.msra.mxu3 %v1326_v57  ;;  %2383 = vmatpush.msra.mxu0 %v1126_v42  ;;  %v1106_v12 = vld [vmem:[#allocation8 + $0x60] sm:$0xff]  ;;  %v1203_v57 = vld [vmem:[#allocation8 + $0x368] sm:$0xff] }
 0x234   : > { %2403 = vmatpush.msra.mxu1 %v1190_v2  ;;  %2423 = vmatpush.msra.mxu2 %v1254_v58  ;;  %v1170_v13 = vld [vmem:[#allocation8 + $0x260] sm:$0xff]  ;;  %v1131_v58 = vld [vmem:[#allocation8 + $0x128] sm:$0xff] }
 0x235   : > { %2442 = vmatpush.msra.mxu3 %v1322_v60  ;;  %2384 = vmatpush.msra.mxu0 %v1122_v30  ;;  %v1234_v14 = vld [vmem:[#allocation8 + $0x460] sm:$0xff]  ;;  %v1199_v60 = vld [vmem:[#allocation8 + $0x348] sm:$0xff] }
 0x236   : > { %2404 = vmatpush.msra.mxu1 %v1186_v61  ;;  %2424 = vmatpush.msra.mxu2 %v1250_v45  ;;  %v1302_v59 = vld [vmem:[#allocation8 + $0x680] sm:$0xff]  ;;  %v1127_v45 = vld [vmem:[#allocation8 + $0x108] sm:$0xff] }
 0x237   : > { %2443 = vmatpush.msra.mxu3 %v1318_v62  ;;  %2385 = vmatpush.msra.mxu0 %v1118_v63  ;;  %v1102_v15 = vld [vmem:[#allocation8 + $0x40] sm:$0xff]  ;;  %v1195_v62 = vld [vmem:[#allocation8 + $0x328] sm:$0xff] }
 0x238   : > { %2405 = vmatpush.msra.mxu1 %v1182_v51  ;;  %2425 = vmatpush.msra.mxu2 %v1246_v0  ;;  %v1166_v16 = vld [vmem:[#allocation8 + $0x240] sm:$0xff]  ;;  %v1123_v0 = vld [vmem:[#allocation8 + $0xe8] sm:$0xff] }
 0x239   : > { %2444 = vmatpush.msra.mxu3 %v1314_v3  ;;  %2386 = vmatpush.msra.mxu0 %v1114_v4  ;;  %v1230_v17 = vld [vmem:[#allocation8 + $0x440] sm:$0xff]  ;;  %v1191_v3 = vld [vmem:[#allocation8 + $0x308] sm:$0xff] }
 0x23a   : > { %2406 = vmatpush.msra.mxu1 %v1178_v5  ;;  %2426 = vmatpush.msra.mxu2 %v1242_v6  ;;  %v1298_v18 = vld [vmem:[#allocation8 + $0x660] sm:$0xff]  ;;  %v1119_v6 = vld [vmem:[#allocation8 + $0xc8] sm:$0xff] }
 0x23b   : > { %2445 = vmatpush.msra.mxu3 %v1310_v7  ;;  %2387 = vmatpush.msra.mxu0 %v1110_v8  ;;  %v1098_v19 = vld [vmem:[#allocation8 + $0x20] sm:$0xff]  ;;  %v1187_v7 = vld [vmem:[#allocation8 + $0x2e8] sm:$0xff] }
 0x23c   : > { %2407 = vmatpush.msra.mxu1 %v1174_v9  ;;  %2427 = vmatpush.msra.mxu2 %v1238_v10  ;;  %v1162_v20 = vld [vmem:[#allocation8 + $0x220] sm:$0xff]  ;;  %v1115_v10 = vld [vmem:[#allocation8 + $0xa8] sm:$0xff] }
 0x23d   : > { %2446 = vmatpush.msra.mxu3 %v1306_v11  ;;  %2388 = vmatpush.msra.mxu0 %v1106_v12  ;;  %v1226_v21 = vld [vmem:[#allocation8 + $0x420] sm:$0xff]  ;;  %v1183_v11 = vld [vmem:[#allocation8 + $0x2c8] sm:$0xff] }
 0x23e   : > { %2408 = vmatpush.msra.mxu1 %v1170_v13  ;;  %2428 = vmatpush.msra.mxu2 %v1234_v14  ;;  %v1294_v23 = vld [vmem:[#allocation8 + $0x640] sm:$0xff]  ;;  %v1111_v14 = vld [vmem:[#allocation8 + $0x88] sm:$0xff] }
 0x23f   : > { %2447 = vmatpush.msra.mxu3 %v1302_v59  ;;  %2389 = vmatpush.msra.mxu0 %v1102_v15  ;;  %v1094_v24 = vld [vmem:[#allocation8] sm:$0xff]  ;;  %v1179_v59 = vld [vmem:[#allocation8 + $0x2a8] sm:$0xff] }
 0x240   : > { %2409 = vmatpush.msra.mxu1 %v1166_v16  ;;  %2429 = vmatpush.msra.mxu2 %v1230_v17  ;;  %v1158_v25 = vld [vmem:[#allocation8 + $0x200] sm:$0xff]  ;;  %v1107_v17 = vld [vmem:[#allocation8 + $0x68] sm:$0xff] }
 0x241   : > { %2448 = vmatpush.msra.mxu3 %v1298_v18  ;;  %2390 = vmatpush.msra.mxu0 %v1098_v19  ;;  %v1222_v26 = vld [vmem:[#allocation8 + $0x400] sm:$0xff]  ;;  %v1175_v18 = vld [vmem:[#allocation8 + $0x288] sm:$0xff] }
 0x242   : > { %2410 = vmatpush.msra.mxu1 %v1162_v20  ;;  %v1290_v27 = vld [vmem:[#allocation8 + $0x620] sm:$0xff]  ;;  %2430 = vmatpush.msra.mxu2 %v1226_v21  ;;  %v1103_v21 = vld [vmem:[#allocation8 + $0x48] sm:$0xff] }
 0x243   : > { %2449 = vmatpush.msra.mxu3 %v1294_v23  ;;  %v4821_v28 = vld.sshfl [vmem:[#allocation1] sm:$0xff pattern:$0x73625140]  ;;  %2391 = vmatpush.msra.mxu0 %v1094_v24  ;;  %v1171_v23 = vld [vmem:[#allocation8 + $0x268] sm:$0xff] }
 0x244   : > { %2411 = vmatpush.msra.mxu1 %v1158_v25  ;;  %v1410_v39 = vld [vmem:[#allocation8 + $0x9e0] sm:$0xff]  ;;  %2431 = vmatpush.msra.mxu2 %v1222_v26  ;;  %v1099_v26 = vld [vmem:[#allocation8 + $0x28] sm:$0xff] }
 0x245   : > { %v1474_v31 = vld [vmem:[#allocation8 + $0xbe0] sm:$0xff]  ;;  %2450 = vmatpush.msra.mxu3 %v1290_v27  ;;  %2392 = vmatmul.f32.vlgmr.msra.gmra.mxu0 %v4821_v28  ;;  %v1167_v27 = vld [vmem:[#allocation8 + $0x248] sm:$0xff] }
 0x246   : > { %v1286_v33 = vld [vmem:[#allocation8 + $0x600] sm:$0xff]  ;;  %2432 = vmatmul.f32.vlgmr.msra.gmra.mxu2 %v4823_v29  ;;  %2456 = vmatpush.msrb.mxu0 %v1410_v39  ;;  %v4833_v39 = vpop.f32.mrf.mxu0 }
 0x247   : > { %2476 = vmatpush.msrb.mxu1 %v1474_v31  ;;  %v1406_v36 = vld [vmem:[#allocation8 + $0x9c0] sm:$0xff]  ;;  %2496 = vmatpush.msrb.mxu2 %v1155_v32 }
 0x248   : > { %v1470_v37 = vld [vmem:[#allocation8 + $0xbc0] sm:$0xff]  ;;  %2451 = vmatpush.msra.mxu3 %v1286_v33  ;;  %2412 = vmatmul.f32.vlgmr.msra.gmra.mxu1 %v4827_v34  ;;  %v4835_v33 = vpop.f32.mrf.mxu1 }
 0x249   : > { %2452 = vmatmul.f32.vlgmr.msra.gmra.mxu3 %v4829_v35  ;;  %v1402_v47 = vld [vmem:[#allocation8 + $0x9a0] sm:$0xff]  ;;  %2457 = vmatpush.msrb.mxu0 %v1406_v36  ;;  %v1095_v36 = vld [vmem:[#allocation8 + $0x8] sm:$0xff] }
 0x24a   : > { %v1466_v40 = vld [vmem:[#allocation8 + $0xba0] sm:$0xff]  ;;  %2477 = vmatpush.msrb.mxu1 %v1470_v37  ;;  %2497 = vmatpush.msrb.mxu2 %v1151_v43  ;;  %v1163_v37 = vld [vmem:[#allocation8 + $0x228] sm:$0xff] }
 0x24b   : > { %2516 = vmatpush.msrb.mxu3 %v1219_v38  ;;  %v1398_v46 = vld [vmem:[#allocation8 + $0x980] sm:$0xff]  ;;  %2458 = vmatpush.msrb.mxu0 %v1402_v47  ;;  %v1283_v38 = vld [vmem:[#allocation8 + $0x5e8] sm:$0xff] }
 0x24c   : > { %v1462_v48 = vld [vmem:[#allocation8 + $0xb80] sm:$0xff]  ;;  %2478 = vmatpush.msrb.mxu1 %v1466_v40  ;;  %2498 = vmatpush.msrb.mxu2 %v1147_v41  ;;  %v1347_v47 = vld [vmem:[#allocation8 + $0x7e8] sm:$0xff]  ;;  %v4839_v40 = vpop.f32.mrf.mxu2 }
 0x24d   : > { %2517 = vmatpush.msrb.mxu3 %v1215_v44  ;;  %v1394_v50 = vld [vmem:[#allocation8 + $0x960] sm:$0xff]  ;;  %2459 = vmatpush.msrb.mxu0 %v1398_v46  ;;  %v1411_v41 = vld [vmem:[#allocation8 + $0x9e8] sm:$0xff] }
 0x24e   : > { %v1458_v52 = vld [vmem:[#allocation8 + $0xb60] sm:$0xff]  ;;  %2479 = vmatpush.msrb.mxu1 %v1462_v48  ;;  %2499 = vmatpush.msrb.mxu2 %v1143_v49  ;;  %v1159_v44 = vld [vmem:[#allocation8 + $0x208] sm:$0xff] }
 0x24f   : > { %2518 = vmatpush.msrb.mxu3 %v1211_v22  ;;  %v1390_v1 = vld [vmem:[#allocation8 + $0x940] sm:$0xff]  ;;  %2460 = vmatpush.msrb.mxu0 %v1394_v50  ;;  %v4843_v46 = vld.sshfl [vmem:[#allocation1 + $0x28] sm:$0xff pattern:$0x73625140]  ;;  %v4845_v22 = vpop.f32.mrf.mxu3 }
 0x250   : > { %v1454_v55 = vld [vmem:[#allocation8 + $0xb40] sm:$0xff]  ;;  %2480 = vmatpush.msrb.mxu1 %v1458_v52  ;;  %2500 = vmatpush.msrb.mxu2 %v1139_v53  ;;  %v1279_v48 = vld [vmem:[#allocation8 + $0x5c8] sm:$0xff] }
 0x251   : > { %2519 = vmatpush.msrb.mxu3 %v1207_v54  ;;  %v1386_v42 = vld [vmem:[#allocation8 + $0x920] sm:$0xff]  ;;  %2461 = vmatpush.msrb.mxu0 %v1390_v1  ;;  %v1343_v49 = vld [vmem:[#allocation8 + $0x7c8] sm:$0xff] }
 0x252   : > { %v1450_v2 = vld [vmem:[#allocation8 + $0xb20] sm:$0xff]  ;;  %2481 = vmatpush.msrb.mxu1 %v1454_v55  ;;  %2501 = vmatpush.msrb.mxu2 %v1135_v56  ;;  %v1407_v50 = vld [vmem:[#allocation8 + $0x9c8] sm:$0xff]  ;;  %v4849_v56 = vpop.f32.mrf.mxu0 }
 0x253   : > { %2520 = vmatpush.msrb.mxu3 %v1203_v57  ;;  %v1382_v30 = vld [vmem:[#allocation8 + $0x900] sm:$0xff]  ;;  %2462 = vmatpush.msrb.mxu0 %v1386_v42  ;;  %v1475_v52 = vld [vmem:[#allocation8 + $0xbe8] sm:$0xff] }
 0x254   : > { %v1446_v61 = vld [vmem:[#allocation8 + $0xb00] sm:$0xff]  ;;  %2482 = vmatpush.msrb.mxu1 %v1450_v2  ;;  %2502 = vmatpush.msrb.mxu2 %v1131_v58  ;;  %v1275_v53 = vld [vmem:[#allocation8 + $0x5a8] sm:$0xff]  ;;  %v4851_v2 = vpop.f32.mrf.mxu1 }
 0x255   : > { %2521 = vmatpush.msrb.mxu3 %v1199_v60  ;;  %v1378_v63 = vld [vmem:[#allocation8 + $0x8e0] sm:$0xff]  ;;  %2463 = vmatpush.msrb.mxu0 %v1382_v30  ;;  %v1339_v54 = vld [vmem:[#allocation8 + $0x7a8] sm:$0xff]  ;;  %v4853_v30 = vpop.f32.mrf.mxu2 }
 0x256   : > { %v1442_v51 = vld [vmem:[#allocation8 + $0xae0] sm:$0xff]  ;;  %2483 = vmatpush.msrb.mxu1 %v1446_v61  ;;  %2503 = vmatpush.msrb.mxu2 %v1127_v45  ;;  %v1403_v1 = vld [vmem:[#allocation8 + $0x9a8] sm:$0xff] }
 0x257   : > { %2522 = vmatpush.msrb.mxu3 %v1195_v62  ;;  %v1374_v4 = vld [vmem:[#allocation8 + $0x8c0] sm:$0xff]  ;;  %2464 = vmatpush.msrb.mxu0 %v1378_v63  ;;  %v1471_v55 = vld [vmem:[#allocation8 + $0xbc8] sm:$0xff] }
 0x258   : > { %v1438_v5 = vld [vmem:[#allocation8 + $0xac0] sm:$0xff]  ;;  %2484 = vmatpush.msrb.mxu1 %v1442_v51  ;;  %2504 = vmatpush.msrb.mxu2 %v1123_v0  ;;  %v1271_v57 = vld [vmem:[#allocation8 + $0x588] sm:$0xff] }
 0x259   : > { %2523 = vmatpush.msrb.mxu3 %v1191_v3  ;;  %v1370_v8 = vld [vmem:[#allocation8 + $0x8a0] sm:$0xff]  ;;  %2465 = vmatpush.msrb.mxu0 %v1374_v4  ;;  %v1335_v42 = vld [vmem:[#allocation8 + $0x788] sm:$0xff]  ;;  %v4855_v3 = vpop.f32.mrf.mxu3 }
 0x25a   : > { %v1434_v9 = vld [vmem:[#allocation8 + $0xaa0] sm:$0xff]  ;;  %2485 = vmatpush.msrb.mxu1 %v1438_v5  ;;  %2505 = vmatpush.msrb.mxu2 %v1119_v6  ;;  %v1399_v58 = vld [vmem:[#allocation8 + $0x988] sm:$0xff] }
 0x25b   : > { %2524 = vmatpush.msrb.mxu3 %v1187_v7  ;;  %v1366_v12 = vld [vmem:[#allocation8 + $0x880] sm:$0xff]  ;;  %2466 = vmatpush.msrb.mxu0 %v1370_v8  ;;  %v1467_v60 = vld [vmem:[#allocation8 + $0xba8] sm:$0xff] }
 0x25c   : > { %v1430_v13 = vld [vmem:[#allocation8 + $0xa80] sm:$0xff]  ;;  %2486 = vmatpush.msrb.mxu1 %v1434_v9  ;;  %2506 = vmatpush.msrb.mxu2 %v1115_v10  ;;  %v1267_v61 = vld [vmem:[#allocation8 + $0x568] sm:$0xff]  ;;  %v4857_v10 = vpop.f32.mrf.mxu0 }
 0x25d   : > { %2525 = vmatpush.msrb.mxu3 %v1183_v11  ;;  %v1362_v15 = vld [vmem:[#allocation8 + $0x860] sm:$0xff]  ;;  %2467 = vmatpush.msrb.mxu0 %v1366_v12  ;;  %v1331_v45 = vld [vmem:[#allocation8 + $0x768] sm:$0xff] }
 0x25e   : > { %v1426_v16 = vld [vmem:[#allocation8 + $0xa60] sm:$0xff]  ;;  %2487 = vmatpush.msrb.mxu1 %v1430_v13  ;;  %2507 = vmatpush.msrb.mxu2 %v1111_v14  ;;  %v1395_v62 = vld [vmem:[#allocation8 + $0x968] sm:$0xff]  ;;  %v4859_v13 = vpop.f32.mrf.mxu1 }
 0x25f   : > { %2526 = vmatpush.msrb.mxu3 %v1179_v59  ;;  %v1358_v19 = vld [vmem:[#allocation8 + $0x840] sm:$0xff]  ;;  %2468 = vmatpush.msrb.mxu0 %v1362_v15  ;;  %v1463_v63 = vld [vmem:[#allocation8 + $0xb88] sm:$0xff] }
 0x260   : > { %v1422_v20 = vld [vmem:[#allocation8 + $0xa40] sm:$0xff]  ;;  %2488 = vmatpush.msrb.mxu1 %v1426_v16  ;;  %2508 = vmatpush.msrb.mxu2 %v1107_v17  ;;  %v1263_v51 = vld [vmem:[#allocation8 + $0x548] sm:$0xff] }
 0x261   : > { %2527 = vmatpush.msrb.mxu3 %v1175_v18  ;;  %v1354_v24 = vld [vmem:[#allocation8 + $0x820] sm:$0xff]  ;;  %2469 = vmatpush.msrb.mxu0 %v1358_v19  ;;  %v1327_v0 = vld [vmem:[#allocation8 + $0x748] sm:$0xff]  ;;  %v4861_v19 = vpop.f32.mrf.mxu2 }
 0x262   : > { %v1418_v25 = vld [vmem:[#allocation8 + $0xa20] sm:$0xff]  ;;  %2489 = vmatpush.msrb.mxu1 %v1422_v20  ;;  %2509 = vmatpush.msrb.mxu2 %v1103_v21  ;;  %v1391_v4 = vld [vmem:[#allocation8 + $0x948] sm:$0xff] }
 0x263   : > { %2528 = vmatpush.msrb.mxu3 %v1171_v23  ;;  %v1350_v31 = vld [vmem:[#allocation8 + $0x800] sm:$0xff]  ;;  %2470 = vmatpush.msrb.mxu0 %v1354_v24  ;;  %v1459_v5 = vld [vmem:[#allocation8 + $0xb68] sm:$0xff] }
 0x264   : > { %v1414_v32 = vld [vmem:[#allocation8 + $0xa00] sm:$0xff]  ;;  %2490 = vmatpush.msrb.mxu1 %v1418_v25  ;;  %2510 = vmatpush.msrb.mxu2 %v1099_v26  ;;  %v1259_v6 = vld [vmem:[#allocation8 + $0x528] sm:$0xff] }
 0x265   : > { %2529 = vmatpush.msrb.mxu3 %v1167_v27  ;;  %v4837_v43 = vld.sshfl [vmem:[#allocation1 + $0x20] sm:$0xff pattern:$0x73625140]  ;;  %2471 = vmatpush.msrb.mxu0 %v1350_v31  ;;  %v1323_v7 = vld [vmem:[#allocation8 + $0x728] sm:$0xff]  ;;  %v4863_v27 = vpop.f32.mrf.mxu3 }
 0x266   : > { %2491 = vmatpush.msrb.mxu1 %v1414_v32  ;;  %2511 = vmatpush.msrb.mxu2 %v1095_v36  ;;  %v1387_v8 = vld [vmem:[#allocation8 + $0x928] sm:$0xff] }
 0x267   : > { %2530 = vmatpush.msrb.mxu3 %v1163_v37  ;;  %2472 = vmatmul.f32.vlgmr.msrb.gmra.mxu0 %v4837_v43  ;;  %v1455_v9 = vld [vmem:[#allocation8 + $0xb48] sm:$0xff] }
 0x268   : > { %2512 = vmatmul.f32.vlgmr.msrb.gmra.mxu2 %v4821_v28  ;;  %2536 = vmatpush.msra.mxu0 %v1283_v38  ;;  %v1255_v11 = vld [vmem:[#allocation8 + $0x508] sm:$0xff] }
 0x269   : > { %2556 = vmatpush.msra.mxu1 %v1347_v47  ;;  %2576 = vmatpush.msra.mxu2 %v1411_v41  ;;  %v1319_v12 = vld [vmem:[#allocation8 + $0x708] sm:$0xff] }
 0x26a   : > { %2531 = vmatpush.msrb.mxu3 %v1159_v44  ;;  %2492 = vmatmul.f32.vlgmr.msrb.gmra.mxu1 %v4843_v46  ;;  %v1383_v14 = vld [vmem:[#allocation8 + $0x908] sm:$0xff] }
 0x26b   : > { %2532 = vmatmul.f32.vlgmr.msrb.gmra.mxu3 %v4827_v34  ;;  %2537 = vmatpush.msra.mxu0 %v1279_v48  ;;  %v1451_v59 = vld [vmem:[#allocation8 + $0xb28] sm:$0xff] }
 0x26c   : > { %2557 = vmatpush.msra.mxu1 %v1343_v49  ;;  %2577 = vmatpush.msra.mxu2 %v1407_v50  ;;  %v1251_v15 = vld [vmem:[#allocation8 + $0x4e8] sm:$0xff] }
 0x26d   : > { %2596 = vmatpush.msra.mxu3 %v1475_v52  ;;  %2538 = vmatpush.msra.mxu0 %v1275_v53  ;;  %v1315_v16 = vld [vmem:[#allocation8 + $0x6e8] sm:$0xff] }
 0x26e   : > { %2558 = vmatpush.msra.mxu1 %v1339_v54  ;;  %2578 = vmatpush.msra.mxu2 %v1403_v1  ;;  %v1379_v17 = vld [vmem:[#allocation8 + $0x8e8] sm:$0xff] }
 0x26f   : > { %2597 = vmatpush.msra.mxu3 %v1471_v55  ;;  %2539 = vmatpush.msra.mxu0 %v1271_v57  ;;  %v1447_v18 = vld [vmem:[#allocation8 + $0xb08] sm:$0xff] }
 0x270   : > { %2559 = vmatpush.msra.mxu1 %v1335_v42  ;;  %2579 = vmatpush.msra.mxu2 %v1399_v58  ;;  %v1247_v20 = vld [vmem:[#allocation8 + $0x4c8] sm:$0xff] }
 0x271   : > { %2598 = vmatpush.msra.mxu3 %v1467_v60  ;;  %2540 = vmatpush.msra.mxu0 %v1267_v61  ;;  %v1311_v21 = vld [vmem:[#allocation8 + $0x6c8] sm:$0xff] }
 0x272   : > { %2560 = vmatpush.msra.mxu1 %v1331_v45  ;;  %2580 = vmatpush.msra.mxu2 %v1395_v62  ;;  %v1375_v23 = vld [vmem:[#allocation8 + $0x8c8] sm:$0xff] }
 0x273   : > { %2599 = vmatpush.msra.mxu3 %v1463_v63  ;;  %2541 = vmatpush.msra.mxu0 %v1263_v51  ;;  %v1443_v24 = vld [vmem:[#allocation8 + $0xae8] sm:$0xff] }
 0x274   : > { %2561 = vmatpush.msra.mxu1 %v1327_v0  ;;  %2581 = vmatpush.msra.mxu2 %v1391_v4  ;;  %v1243_v25 = vld [vmem:[#allocation8 + $0x4a8] sm:$0xff] }
 0x275   : > { %2600 = vmatpush.msra.mxu3 %v1459_v5  ;;  %2542 = vmatpush.msra.mxu0 %v1259_v6  ;;  %v1307_v26 = vld [vmem:[#allocation8 + $0x6a8] sm:$0xff] }
 0x276   : > { %2562 = vmatpush.msra.mxu1 %v1323_v7  ;;  %2582 = vmatpush.msra.mxu2 %v1387_v8  ;;  %v1371_v31 = vld [vmem:[#allocation8 + $0x8a8] sm:$0xff]  ;;  %v1156_v8 = vld [vmem:[#allocation8 + $0x1f0] sm:$0xff] }
 0x277   : > { %2601 = vmatpush.msra.mxu3 %v1455_v9  ;;  %2543 = vmatpush.msra.mxu0 %v1255_v11  ;;  %v1439_v32 = vld [vmem:[#allocation8 + $0xac8] sm:$0xff]  ;;  %v1220_v9 = vld [vmem:[#allocation8 + $0x3f0] sm:$0xff] }
 0x278   : > { %2563 = vmatpush.msra.mxu1 %v1319_v12  ;;  %2583 = vmatpush.msra.mxu2 %v1383_v14  ;;  %v1239_v36 = vld [vmem:[#allocation8 + $0x488] sm:$0xff]  ;;  %v1284_v12 = vld [vmem:[#allocation8 + $0x5f0] sm:$0xff] }
 0x279   : > { %2602 = vmatpush.msra.mxu3 %v1451_v59  ;;  %2544 = vmatpush.msra.mxu0 %v1251_v15  ;;  %v1303_v37 = vld [vmem:[#allocation8 + $0x688] sm:$0xff] }
 0x27a   : > { %2564 = vmatpush.msra.mxu1 %v1315_v16  ;;  %2584 = vmatpush.msra.mxu2 %v1379_v17  ;;  %v1367_v47 = vld [vmem:[#allocation8 + $0x888] sm:$0xff]  ;;  %v1152_v16 = vld [vmem:[#allocation8 + $0x1d0] sm:$0xff] }
 0x27b   : > { %2603 = vmatpush.msra.mxu3 %v1447_v18  ;;  %2545 = vmatpush.msra.mxu0 %v1247_v20  ;;  %v1435_v41 = vld [vmem:[#allocation8 + $0xaa8] sm:$0xff]  ;;  %v1216_v17 = vld [vmem:[#allocation8 + $0x3d0] sm:$0xff] }
 0x27c   : > { %2565 = vmatpush.msra.mxu1 %v1311_v21  ;;  %2585 = vmatpush.msra.mxu2 %v1375_v23  ;;  %v1235_v48 = vld [vmem:[#allocation8 + $0x468] sm:$0xff]  ;;  %v1280_v18 = vld [vmem:[#allocation8 + $0x5d0] sm:$0xff] }
 0x27d   : > { %2604 = vmatpush.msra.mxu3 %v1443_v24  ;;  %v2136_v38 = vpop.f32.mrf.mxu0  ;;  %2546 = vmatpush.msra.mxu0 %v1243_v25  ;;  %v2156_v44 = vpop.f32.mrf.mxu1  ;;  %v1299_v49 = vld [vmem:[#allocation8 + $0x668] sm:$0xff]  ;;  %v1348_v20 = vld [vmem:[#allocation8 + $0x7f0] sm:$0xff] }
 0x27e   : > { %2566 = vmatpush.msra.mxu1 %v1307_v26  ;;  %2586 = vmatpush.msra.mxu2 %v1371_v31  ;;  %v2157_v50 = vadd.f32 %v2156_v44, %v2136_v38  ;;  %v1363_v52 = vld [vmem:[#allocation8 + $0x868] sm:$0xff]  ;;  %v1148_v21 = vld [vmem:[#allocation8 + $0x1b0] sm:$0xff] }
 0x27f   : > { %2605 = vmatpush.msra.mxu3 %v1439_v32  ;;  %2547 = vmatpush.msra.mxu0 %v1239_v36  ;;  %v1431_v53 = vld [vmem:[#allocation8 + $0xa88] sm:$0xff]  ;;  %v1212_v23 = vld [vmem:[#allocation8 + $0x3b0] sm:$0xff] }
 0x280   : > { %2567 = vmatpush.msra.mxu1 %v1303_v37  ;;  %2587 = vmatpush.msra.mxu2 %v1367_v47  ;;  %v1231_v54 = vld [vmem:[#allocation8 + $0x448] sm:$0xff]  ;;  %v2176_v55 = vpop.f32.mrf.mxu2  ;;  %v1276_v24 = vld [vmem:[#allocation8 + $0x5b0] sm:$0xff] }
 0x281   : > { %2606 = vmatpush.msra.mxu3 %v1435_v41  ;;  %v1295_v1 = vld [vmem:[#allocation8 + $0x648] sm:$0xff]  ;;  %2548 = vmatpush.msra.mxu0 %v1235_v48  ;;  %v2177_v58 = vadd.f32 %v2176_v55, %v2157_v50  ;;  %v1344_v25 = vld [vmem:[#allocation8 + $0x7d0] sm:$0xff] }
 0x282   : > { %2568 = vmatpush.msra.mxu1 %v1299_v49  ;;  %v1359_v57 = vld [vmem:[#allocation8 + $0x848] sm:$0xff]  ;;  %2588 = vmatpush.msra.mxu2 %v1363_v52  ;;  %v1144_v26 = vld [vmem:[#allocation8 + $0x190] sm:$0xff] }
 0x283   : > { %v1427_v42 = vld [vmem:[#allocation8 + $0xa68] sm:$0xff]  ;;  %2607 = vmatpush.msra.mxu3 %v1431_v53  ;;  %2549 = vmatpush.msra.mxu0 %v1231_v54  ;;  %v1208_v31 = vld [vmem:[#allocation8 + $0x390] sm:$0xff] }
 0x284   : > { %v1227_v60 = vld [vmem:[#allocation8 + $0x428] sm:$0xff]  ;;  %2569 = vmatpush.msra.mxu1 %v1295_v1  ;;  %v2196_v63 = vpop.f32.mrf.mxu3  ;;  %2589 = vmatpush.msra.mxu2 %v1359_v57  ;;  %v1272_v32 = vld [vmem:[#allocation8 + $0x590] sm:$0xff] }
 0x285   : > { %v1291_v61 = vld [vmem:[#allocation8 + $0x628] sm:$0xff]  ;;  %2608 = vmatpush.msra.mxu3 %v1427_v42  ;;  %v2197_v4 = vadd.f32 %v2196_v63, %v2177_v58  ;;  %2550 = vmatpush.msra.mxu0 %v1227_v60  ;;  %v1340_v36 = vld [vmem:[#allocation8 + $0x7b0] sm:$0xff] }
 0x286   : > { %v1355_v45 = vld [vmem:[#allocation8 + $0x828] sm:$0xff]  ;;  %2570 = vmatpush.msra.mxu1 %v1291_v61  ;;  %v2216_v7 = vpop.f32.mrf.mxu0  ;;  %v1140_v37 = vld [vmem:[#allocation8 + $0x170] sm:$0xff] }
 0x287   : > { %v1423_v62 = vld [vmem:[#allocation8 + $0xa48] sm:$0xff]  ;;  %2590 = vmatpush.msra.mxu2 %v1355_v45  ;;  %v2217_v11 = vadd.f32 %v2216_v7, %v2197_v4  ;;  %v1204_v38 = vld [vmem:[#allocation8 + $0x370] sm:$0xff] }
 0x288   : > { %v1223_v51 = vld [vmem:[#allocation8 + $0x408] sm:$0xff]  ;;  %2609 = vmatpush.msra.mxu3 %v1423_v62  ;;  %v1268_v47 = vld [vmem:[#allocation8 + $0x570] sm:$0xff] }
 0x289   : > { %v1287_v0 = vld [vmem:[#allocation8 + $0x608] sm:$0xff]  ;;  %2551 = vmatpush.msra.mxu0 %v1223_v51  ;;  %v2236_v59 = vpop.f32.mrf.mxu1  ;;  %v1336_v41 = vld [vmem:[#allocation8 + $0x790] sm:$0xff] }
 0x28a   : > { %v1351_v5 = vld [vmem:[#allocation8 + $0x808] sm:$0xff]  ;;  %2571 = vmatpush.msra.mxu1 %v1287_v0  ;;  %2552 = vmatmul.f32.vlgmr.msra.gmra.mxu0 %v4823_v29  ;;  %v4867_v15 = vadd.f32 %v2236_v59, %v2217_v11  ;;  %v1136_v44 = vld [vmem:[#allocation8 + $0x150] sm:$0xff] }
 0x28b   : > { %v1419_v6 = vld [vmem:[#allocation8 + $0xa28] sm:$0xff]  ;;  %2591 = vmatpush.msra.mxu2 %v1351_v5  ;;  %2616 = vmatpush.msrb.mxu0 %v1156_v8  ;;  %v1200_v48 = vld [vmem:[#allocation8 + $0x350] sm:$0xff] }
 0x28c   : > { %2610 = vmatpush.msra.mxu3 %v1419_v6  ;;  %v1415_v14 = vld [vmem:[#allocation8 + $0xa08] sm:$0xff]  ;;  %2592 = vmatmul.f32.vlgmr.msra.gmra.mxu2 %v4837_v43  ;;  %v1264_v49 = vld [vmem:[#allocation8 + $0x550] sm:$0xff] }
 0x28d   : > { %2636 = vmatpush.msrb.mxu1 %v1220_v9  ;;  %2656 = vmatpush.msrb.mxu2 %v1284_v12  ;;  %v1332_v50 = vld [vmem:[#allocation8 + $0x770] sm:$0xff] }
 0x28e   : > { %2611 = vmatpush.msra.mxu3 %v1415_v14  ;;  %2572 = vmatmul.f32.vlgmr.msra.gmra.mxu1 %v4829_v35  ;;  %v1132_v52 = vld [vmem:[#allocation8 + $0x130] sm:$0xff] }
 0x28f   : > { %2612 = vmatmul.f32.vlgmr.msra.gmra.mxu3 %v4843_v46  ;;  %2617 = vmatpush.msrb.mxu0 %v1152_v16  ;;  %v1196_v53 = vld [vmem:[#allocation8 + $0x330] sm:$0xff] }
 0x290   : > { %2637 = vmatpush.msrb.mxu1 %v1216_v17  ;;  %2657 = vmatpush.msrb.mxu2 %v1280_v18  ;;  %v1260_v54 = vld [vmem:[#allocation8 + $0x530] sm:$0xff] }
 0x291   : > { %2676 = vmatpush.msrb.mxu3 %v1348_v20  ;;  %2618 = vmatpush.msrb.mxu0 %v1148_v21  ;;  %v1328_v1 = vld [vmem:[#allocation8 + $0x750] sm:$0xff] }
 0x292   : > { %2638 = vmatpush.msrb.mxu1 %v1212_v23  ;;  %2658 = vmatpush.msrb.mxu2 %v1276_v24  ;;  %v1128_v55 = vld [vmem:[#allocation8 + $0x110] sm:$0xff] }
 0x293   : > { %2677 = vmatpush.msrb.mxu3 %v1344_v25  ;;  %2619 = vmatpush.msrb.mxu0 %v1144_v26  ;;  %v1192_v57 = vld [vmem:[#allocation8 + $0x310] sm:$0xff] }
 0x294   : > { %2639 = vmatpush.msrb.mxu1 %v1208_v31  ;;  %2659 = vmatpush.msrb.mxu2 %v1272_v32  ;;  %v1256_v42 = vld [vmem:[#allocation8 + $0x510] sm:$0xff] }
 0x295   : > { %2678 = vmatpush.msrb.mxu3 %v1340_v36  ;;  %2620 = vmatpush.msrb.mxu0 %v1140_v37  ;;  %v1324_v58 = vld [vmem:[#allocation8 + $0x730] sm:$0xff] }
 0x296   : > { %2640 = vmatpush.msrb.mxu1 %v1204_v38  ;;  %2660 = vmatpush.msrb.mxu2 %v1268_v47  ;;  %v1124_v60 = vld [vmem:[#allocation8 + $0xf0] sm:$0xff] }
 0x297   : > { %2679 = vmatpush.msrb.mxu3 %v1336_v41  ;;  %2621 = vmatpush.msrb.mxu0 %v1136_v44  ;;  %v1188_v61 = vld [vmem:[#allocation8 + $0x2f0] sm:$0xff] }
 0x298   : > { %2641 = vmatpush.msrb.mxu1 %v1200_v48  ;;  %2661 = vmatpush.msrb.mxu2 %v1264_v49  ;;  %v1252_v45 = vld [vmem:[#allocation8 + $0x4f0] sm:$0xff] }
 0x299   : > { %2680 = vmatpush.msrb.mxu3 %v1332_v50  ;;  %2622 = vmatpush.msrb.mxu0 %v1132_v52  ;;  %v1320_v62 = vld [vmem:[#allocation8 + $0x710] sm:$0xff] }
 0x29a   : > { %2642 = vmatpush.msrb.mxu1 %v1196_v53  ;;  %2662 = vmatpush.msrb.mxu2 %v1260_v54  ;;  %v1120_v63 = vld [vmem:[#allocation8 + $0xd0] sm:$0xff]  ;;  %v1157_v54 = vld [vmem:[#allocation8 + $0x1f8] sm:$0xff] }
 0x29b   : > { %2681 = vmatpush.msrb.mxu3 %v1328_v1  ;;  %2623 = vmatpush.msrb.mxu0 %v1128_v55  ;;  %v1184_v51 = vld [vmem:[#allocation8 + $0x2d0] sm:$0xff] }
 0x29c   : > { %2643 = vmatpush.msrb.mxu1 %v1192_v57  ;;  %2663 = vmatpush.msrb.mxu2 %v1256_v42  ;;  %v1248_v0 = vld [vmem:[#allocation8 + $0x4d0] sm:$0xff] }
 0x29d   : > { %2682 = vmatpush.msrb.mxu3 %v1324_v58  ;;  %2624 = vmatpush.msrb.mxu0 %v1124_v60  ;;  %v1316_v4 = vld [vmem:[#allocation8 + $0x6f0] sm:$0xff] }
 0x29e   : > { %2644 = vmatpush.msrb.mxu1 %v1188_v61  ;;  %2664 = vmatpush.msrb.mxu2 %v1252_v45  ;;  %v1116_v5 = vld [vmem:[#allocation8 + $0xb0] sm:$0xff]  ;;  %v1153_v61 = vld [vmem:[#allocation8 + $0x1d8] sm:$0xff] }
 0x29f   : > { %2683 = vmatpush.msrb.mxu3 %v1320_v62  ;;  %v1180_v6 = vld [vmem:[#allocation8 + $0x2b0] sm:$0xff]  ;;  %2625 = vmatpush.msrb.mxu0 %v1120_v63  ;;  %v1221_v45 = vld [vmem:[#allocation8 + $0x3f8] sm:$0xff] }
 0x2a0   : > { %2645 = vmatpush.msrb.mxu1 %v1184_v51  ;;  %v1244_v7 = vld [vmem:[#allocation8 + $0x4b0] sm:$0xff]  ;;  %2665 = vmatpush.msrb.mxu2 %v1248_v0  ;;  %v1217_v51 = vld [vmem:[#allocation8 + $0x3d8] sm:$0xff] }
 0x2a1   : > { %v1312_v8 = vld [vmem:[#allocation8 + $0x6d0] sm:$0xff]  ;;  %2684 = vmatpush.msrb.mxu3 %v1316_v4  ;;  %2626 = vmatpush.msrb.mxu0 %v1116_v5 }
 0x2a2   : > { %v1112_v9 = vld [vmem:[#allocation8 + $0x90] sm:$0xff]  ;;  %2646 = vmatpush.msrb.mxu1 %v1180_v6  ;;  %2666 = vmatpush.msrb.mxu2 %v1244_v7  ;;  %v1145_v7 = vld [vmem:[#allocation8 + $0x198] sm:$0xff] }
 0x2a3   : > { %v1176_v11 = vld [vmem:[#allocation8 + $0x290] sm:$0xff]  ;;  %2685 = vmatpush.msrb.mxu3 %v1312_v8  ;;  %2627 = vmatpush.msrb.mxu0 %v1112_v9  ;;  %v2256_v25 = vpop.f32.mrf.mxu2  ;;  %v1141_v9 = vld [vmem:[#allocation8 + $0x178] sm:$0xff] }
 0x2a4   : > { %v1240_v12 = vld [vmem:[#allocation8 + $0x490] sm:$0xff]  ;;  %2647 = vmatpush.msrb.mxu1 %v1176_v11  ;;  %v1209_v11 = vld [vmem:[#allocation8 + $0x398] sm:$0xff] }
 0x2a5   : > { %v1308_v14 = vld [vmem:[#allocation8 + $0x6b0] sm:$0xff]  ;;  %2667 = vmatpush.msrb.mxu2 %v1240_v12  ;;  %v2276_v47 = vpop.f32.mrf.mxu3 }
 0x2a6   : > { %v1108_v59 = vld [vmem:[#allocation8 + $0x70] sm:$0xff]  ;;  %2686 = vmatpush.msrb.mxu3 %v1308_v14  ;;  %v2277_v48 = vadd.f32 %v2276_v47, %v2256_v25  ;;  %v1129_v25 = vld [vmem:[#allocation8 + $0x118] sm:$0xff] }
 0x2a7   : > { %v1172_v16 = vld [vmem:[#allocation8 + $0x270] sm:$0xff]  ;;  %2628 = vmatpush.msrb.mxu0 %v1108_v59  ;;  %v1137_v59 = vld [vmem:[#allocation8 + $0x158] sm:$0xff] }
 0x2a8   : > { %v1236_v17 = vld [vmem:[#allocation8 + $0x470] sm:$0xff]  ;;  %2648 = vmatpush.msrb.mxu1 %v1172_v16  ;;  %v1205_v16 = vld [vmem:[#allocation8 + $0x378] sm:$0xff] }
 0x2a9   : > { %v1304_v18 = vld [vmem:[#allocation8 + $0x690] sm:$0xff]  ;;  %2668 = vmatpush.msrb.mxu2 %v1236_v17  ;;  %v2296_v49 = vpop.f32.mrf.mxu0 }
 0x2aa   : > { %v1104_v20 = vld [vmem:[#allocation8 + $0x50] sm:$0xff]  ;;  %2687 = vmatpush.msrb.mxu3 %v1304_v18  ;;  %v2297_v53 = vadd.f32 %v2296_v49, %v2277_v48 }
 0x2ab   : > { %v1168_v21 = vld [vmem:[#allocation8 + $0x250] sm:$0xff]  ;;  %2629 = vmatpush.msrb.mxu0 %v1104_v20  ;;  %v1133_v20 = vld [vmem:[#allocation8 + $0x138] sm:$0xff] }
 0x2ac   : > { %v1232_v23 = vld [vmem:[#allocation8 + $0x450] sm:$0xff]  ;;  %2649 = vmatpush.msrb.mxu1 %v1168_v21  ;;  %v2316_v55 = vpop.f32.mrf.mxu1  ;;  %v2336_v60 = vpop.f32.mrf.mxu2  ;;  %v1201_v21 = vld [vmem:[#allocation8 + $0x358] sm:$0xff] }
 0x2ad   : > { %v1300_v24 = vld [vmem:[#allocation8 + $0x670] sm:$0xff]  ;;  %2669 = vmatpush.msrb.mxu2 %v1232_v23  ;;  %v2317_v58 = vadd.f32 %v2316_v55, %v2297_v53  ;;  %v1181_v55 = vld [vmem:[#allocation8 + $0x2b8] sm:$0xff] }
 0x2ae   : > { %v1100_v26 = vld [vmem:[#allocation8 + $0x30] sm:$0xff]  ;;  %2688 = vmatpush.msrb.mxu3 %v1300_v24 }
 0x2af   : > { %v1164_v31 = vld [vmem:[#allocation8 + $0x230] sm:$0xff]  ;;  %2630 = vmatpush.msrb.mxu0 %v1100_v26  ;;  %v2356_v0 = vpop.f32.mrf.mxu3  ;;  %v1197_v26 = vld [vmem:[#allocation8 + $0x338] sm:$0xff] }
 0x2b0   : > { %v1228_v32 = vld [vmem:[#allocation8 + $0x430] sm:$0xff]  ;;  %2650 = vmatpush.msrb.mxu1 %v1164_v31 }
 0x2b1   : > { %v1296_v36 = vld [vmem:[#allocation8 + $0x650] sm:$0xff]  ;;  %2670 = vmatpush.msrb.mxu2 %v1228_v32 }
 0x2b2   : > { %v1096_v37 = vld [vmem:[#allocation8 + $0x10] sm:$0xff]  ;;  %2689 = vmatpush.msrb.mxu3 %v1296_v36  ;;  %v1125_v36 = vld [vmem:[#allocation8 + $0xf8] sm:$0xff] }
 0x2b3   : > { %v1160_v38 = vld [vmem:[#allocation8 + $0x210] sm:$0xff]  ;;  %2631 = vmatpush.msrb.mxu0 %v1096_v37  ;;  %v1193_v37 = vld [vmem:[#allocation8 + $0x318] sm:$0xff] }
 0x2b4   : > { %v1224_v41 = vld [vmem:[#allocation8 + $0x410] sm:$0xff]  ;;  %2651 = vmatpush.msrb.mxu1 %v1160_v38  ;;  %2632 = vmatmul.f32.vlgmr.msrb.gmra.mxu0 %v4821_v28  ;;  %v2337_v28 = vadd.f32 %v2336_v60, %v2317_v58  ;;  %v1109_v58 = vld [vmem:[#allocation8 + $0x78] sm:$0xff] }
 0x2b5   : > { %v1292_v44 = vld [vmem:[#allocation8 + $0x630] sm:$0xff]  ;;  %2671 = vmatpush.msrb.mxu2 %v1224_v41  ;;  %2652 = vmatmul.f32.vlgmr.msrb.gmra.mxu1 %v4827_v34  ;;  %v1213_v34 = vld [vmem:[#allocation8 + $0x3b8] sm:$0xff] }
 0x2b6   : > { %v1412_v50 = vld [vmem:[#allocation8 + $0x9f0] sm:$0xff]  ;;  %2690 = vmatpush.msrb.mxu3 %v1292_v44  ;;  %2672 = vmatmul.f32.vlgmr.msrb.gmra.mxu2 %v4823_v29  ;;  %v1149_v29 = vld [vmem:[#allocation8 + $0x1b8] sm:$0xff]  ;;  %v4875_v6 = vadd.f32 %v2356_v0, %v2337_v28 }
 0x2b7   : > { %v1476_v52 = vld [vmem:[#allocation8 + $0xbf0] sm:$0xff]  ;;  %2696 = vmatpush.msra.mxu0 %v1412_v50  ;;  %2736 = vmatpush.msra.mxu2 %v1157_v54  ;;  %v1121_v41 = vld [vmem:[#allocation8 + $0xd8] sm:$0xff] }
 0x2b8   : > { %v1288_v1 = vld [vmem:[#allocation8 + $0x610] sm:$0xff]  ;;  %2716 = vmatpush.msra.mxu1 %v1476_v52  ;;  %v1189_v44 = vld [vmem:[#allocation8 + $0x2f8] sm:$0xff] }
 0x2b9   : > { %v1408_v57 = vld [vmem:[#allocation8 + $0x9d0] sm:$0xff]  ;;  %2691 = vmatpush.msrb.mxu3 %v1288_v1  ;;  %2737 = vmatpush.msra.mxu2 %v1153_v61  ;;  %v1117_v50 = vld [vmem:[#allocation8 + $0xb8] sm:$0xff] }
 0x2ba   : > { %v1472_v42 = vld [vmem:[#allocation8 + $0xbd0] sm:$0xff]  ;;  %2692 = vmatmul.f32.vlgmr.msrb.gmra.mxu3 %v4829_v35  ;;  %2697 = vmatpush.msra.mxu0 %v1408_v57  ;;  %v1185_v52 = vld [vmem:[#allocation8 + $0x2d8] sm:$0xff] }
 0x2bb   : > { %v1404_v62 = vld [vmem:[#allocation8 + $0x9b0] sm:$0xff]  ;;  %2717 = vmatpush.msra.mxu1 %v1472_v42  ;;  %2756 = vmatpush.msra.mxu3 %v1221_v45  ;;  %v1113_v1 = vld [vmem:[#allocation8 + $0x98] sm:$0xff] }
 0x2bc   : > { %v1468_v63 = vld [vmem:[#allocation8 + $0xbb0] sm:$0xff]  ;;  %2698 = vmatpush.msra.mxu0 %v1404_v62  ;;  %2738 = vmatpush.msra.mxu2 %v1149_v29  ;;  %v1177_v60 = vld [vmem:[#allocation8 + $0x298] sm:$0xff] }
 0x2bd   : > { %v1400_v4 = vld [vmem:[#allocation8 + $0x990] sm:$0xff]  ;;  %2718 = vmatpush.msra.mxu1 %v1468_v63  ;;  %2757 = vmatpush.msra.mxu3 %v1217_v51  ;;  %v1105_v62 = vld [vmem:[#allocation8 + $0x58] sm:$0xff] }
 0x2be   : > { %v1464_v5 = vld [vmem:[#allocation8 + $0xb90] sm:$0xff]  ;;  %2699 = vmatpush.msra.mxu0 %v1400_v4  ;;  %2739 = vmatpush.msra.mxu2 %v1145_v7  ;;  %v1173_v63 = vld [vmem:[#allocation8 + $0x278] sm:$0xff] }
 0x2bf   : > { %v1396_v35 = vld [vmem:[#allocation8 + $0x970] sm:$0xff]  ;;  %2719 = vmatpush.msra.mxu1 %v1464_v5  ;;  %2758 = vmatpush.msra.mxu3 %v1213_v34  ;;  %v1101_v51 = vld [vmem:[#allocation8 + $0x38] sm:$0xff] }
 0x2c0   : > { %v1460_v8 = vld [vmem:[#allocation8 + $0xb70] sm:$0xff]  ;;  %2700 = vmatpush.msra.mxu0 %v1396_v35  ;;  %2740 = vmatpush.msra.mxu2 %v1141_v9  ;;  %v1169_v0 = vld [vmem:[#allocation8 + $0x258] sm:$0xff] }
 0x2c1   : > { %v1392_v12 = vld [vmem:[#allocation8 + $0x950] sm:$0xff]  ;;  %2720 = vmatpush.msra.mxu1 %v1460_v8  ;;  %2759 = vmatpush.msra.mxu3 %v1209_v11  ;;  %v1097_v7 = vld [vmem:[#allocation8 + $0x18] sm:$0xff] }
 0x2c2   : > { %v1456_v14 = vld [vmem:[#allocation8 + $0xb50] sm:$0xff]  ;;  %2701 = vmatpush.msra.mxu0 %v1392_v12  ;;  %2741 = vmatpush.msra.mxu2 %v1137_v59  ;;  %v1165_v34 = vld [vmem:[#allocation8 + $0x238] sm:$0xff]  ;;  %v3756_v12 = vld.sshfl [vmem:[#allocation1] sm:$0xff pattern:$0x73625140] }
 0x2c3   : > { %v1388_v17 = vld [vmem:[#allocation8 + $0x930] sm:$0xff]  ;;  %2721 = vmatpush.msra.mxu1 %v1456_v14  ;;  %2760 = vmatpush.msra.mxu3 %v1205_v16  ;;  %v1285_v35 = vld [vmem:[#allocation8 + $0x5f8] sm:$0xff] }
 0x2c4   : > { %v1452_v18 = vld [vmem:[#allocation8 + $0xb30] sm:$0xff]  ;;  %2702 = vmatpush.msra.mxu0 %v1388_v17  ;;  %2742 = vmatpush.msra.mxu2 %v1133_v20  ;;  %v1349_v8 = vld [vmem:[#allocation8 + $0x7f8] sm:$0xff] }
 0x2c5   : > { %v1384_v23 = vld [vmem:[#allocation8 + $0x910] sm:$0xff]  ;;  %2722 = vmatpush.msra.mxu1 %v1452_v18  ;;  %2761 = vmatpush.msra.mxu3 %v1201_v21  ;;  %v1413_v9 = vld [vmem:[#allocation8 + $0x9f8] sm:$0xff]  ;;  %v3757_v18 = vld.sshfl [vmem:[#allocation1 + $0x8] sm:$0xff pattern:$0x73625140] }
 0x2c6   : > { %v1448_v24 = vld [vmem:[#allocation8 + $0xb10] sm:$0xff]  ;;  %2703 = vmatpush.msra.mxu0 %v1384_v23  ;;  %2743 = vmatpush.msra.mxu2 %v1129_v25  ;;  %v1161_v11 = vld [vmem:[#allocation8 + $0x218] sm:$0xff] }
 0x2c7   : > { %v1380_v31 = vld [vmem:[#allocation8 + $0x8f0] sm:$0xff]  ;;  %2723 = vmatpush.msra.mxu1 %v1448_v24  ;;  %2762 = vmatpush.msra.mxu3 %v1197_v26  ;;  %v1281_v14 = vld [vmem:[#allocation8 + $0x5d8] sm:$0xff] }
 0x2c8   : > { %v1444_v32 = vld [vmem:[#allocation8 + $0xaf0] sm:$0xff]  ;;  %2704 = vmatpush.msra.mxu0 %v1380_v31  ;;  %2744 = vmatpush.msra.mxu2 %v1125_v36  ;;  %v1345_v59 = vld [vmem:[#allocation8 + $0x7d8] sm:$0xff] }
 0x2c9   : > { %v1376_v38 = vld [vmem:[#allocation8 + $0x8d0] sm:$0xff]  ;;  %2724 = vmatpush.msra.mxu1 %v1444_v32  ;;  %2763 = vmatpush.msra.mxu3 %v1193_v37  ;;  %v1409_v16 = vld [vmem:[#allocation8 + $0x9d8] sm:$0xff] }
 0x2ca   : > { %v1440_v47 = vld [vmem:[#allocation8 + $0xad0] sm:$0xff]  ;;  %2705 = vmatpush.msra.mxu0 %v1376_v38  ;;  %2745 = vmatpush.msra.mxu2 %v1121_v41  ;;  %v1477_v17 = vld [vmem:[#allocation8 + $0xbf8] sm:$0xff] }
 0x2cb   : > { %v1372_v48 = vld [vmem:[#allocation8 + $0x8b0] sm:$0xff]  ;;  %2725 = vmatpush.msra.mxu1 %v1440_v47  ;;  %2764 = vmatpush.msra.mxu3 %v1189_v44  ;;  %v1277_v20 = vld [vmem:[#allocation8 + $0x5b8] sm:$0xff] }
 0x2cc   : > { %v1436_v49 = vld [vmem:[#allocation8 + $0xab0] sm:$0xff]  ;;  %2706 = vmatpush.msra.mxu0 %v1372_v48  ;;  %2746 = vmatpush.msra.mxu2 %v1117_v50  ;;  %v1341_v21 = vld [vmem:[#allocation8 + $0x7b8] sm:$0xff] }
 0x2cd   : > { %v1368_v53 = vld [vmem:[#allocation8 + $0x890] sm:$0xff]  ;;  %2726 = vmatpush.msra.mxu1 %v1436_v49  ;;  %2765 = vmatpush.msra.mxu3 %v1185_v52  ;;  %v1405_v23 = vld [vmem:[#allocation8 + $0x9b8] sm:$0xff] }
 0x2ce   : > { %v1432_v54 = vld [vmem:[#allocation8 + $0xa90] sm:$0xff]  ;;  %2707 = vmatpush.msra.mxu0 %v1368_v53  ;;  %2747 = vmatpush.msra.mxu2 %v1113_v1  ;;  %v1273_v24 = vld [vmem:[#allocation8 + $0x598] sm:$0xff] }
 0x2cf   : > { %v1364_v57 = vld [vmem:[#allocation8 + $0x870] sm:$0xff]  ;;  %2727 = vmatpush.msra.mxu1 %v1432_v54  ;;  %2766 = vmatpush.msra.mxu3 %v1181_v55  ;;  %v1337_v25 = vld [vmem:[#allocation8 + $0x798] sm:$0xff] }
 0x2d0   : > { %v1428_v42 = vld [vmem:[#allocation8 + $0xa70] sm:$0xff]  ;;  %2708 = vmatpush.msra.mxu0 %v1364_v57  ;;  %2748 = vmatpush.msra.mxu2 %v1109_v58  ;;  %v1401_v26 = vld [vmem:[#allocation8 + $0x998] sm:$0xff] }
 0x2d1   : > { %v1360_v61 = vld [vmem:[#allocation8 + $0x850] sm:$0xff]  ;;  %2728 = vmatpush.msra.mxu1 %v1428_v42  ;;  %2767 = vmatpush.msra.mxu3 %v1177_v60  ;;  %v1469_v31 = vld [vmem:[#allocation8 + $0xbb8] sm:$0xff] }
 0x2d2   : > { %v1424_v45 = vld [vmem:[#allocation8 + $0xa50] sm:$0xff]  ;;  %2709 = vmatpush.msra.mxu0 %v1360_v61  ;;  %2749 = vmatpush.msra.mxu2 %v1105_v62  ;;  %v1269_v32 = vld [vmem:[#allocation8 + $0x578] sm:$0xff] }
 0x2d3   : > { %v1356_v28 = vld [vmem:[#allocation8 + $0x830] sm:$0xff]  ;;  %2729 = vmatpush.msra.mxu1 %v1424_v45  ;;  %2768 = vmatpush.msra.mxu3 %v1173_v63  ;;  %v1397_v36 = vld [vmem:[#allocation8 + $0x978] sm:$0xff] }
 0x2d4   : > { %v1420_v29 = vld [vmem:[#allocation8 + $0xa30] sm:$0xff]  ;;  %2710 = vmatpush.msra.mxu0 %v1356_v28  ;;  %2750 = vmatpush.msra.mxu2 %v1101_v51  ;;  %v1465_v37 = vld [vmem:[#allocation8 + $0xb98] sm:$0xff]  ;;  %v1917_v28 = vadd.f32 %v4835_v33, %v4833_v39 }
 0x2d5   : > { %v1352_v4 = vld [vmem:[#allocation8 + $0x810] sm:$0xff]  ;;  %2730 = vmatpush.msra.mxu1 %v1420_v29  ;;  %2769 = vmatpush.msra.mxu3 %v1169_v0  ;;  %v1265_v38 = vld [vmem:[#allocation8 + $0x558] sm:$0xff] }
 0x2d6   : > { %v1416_v5 = vld [vmem:[#allocation8 + $0xa10] sm:$0xff]  ;;  %2711 = vmatpush.msra.mxu0 %v1352_v4  ;;  %2751 = vmatpush.msra.mxu2 %v1097_v7  ;;  %v1329_v47 = vld [vmem:[#allocation8 + $0x758] sm:$0xff] }
 0x2d7   : > { %2731 = vmatpush.msra.mxu1 %v1416_v5  ;;  %2770 = vmatpush.msra.mxu3 %v1165_v34  ;;  %v1393_v41 = vld [vmem:[#allocation8 + $0x958] sm:$0xff] }
 0x2d8   : > { %2712 = vmatmul.f32.vlgmr.msra.gmra.mxu0 %v4837_v43  ;;  %2752 = vmatmul.f32.vlgmr.msra.gmra.mxu2 %v3756_v12  ;;  %v1473_v43 = vld [vmem:[#allocation8 + $0xbd8] sm:$0xff] }
 0x2d9   : > { %2776 = vmatpush.msrb.mxu0 %v1285_v35  ;;  %2796 = vmatpush.msrb.mxu1 %v1349_v8  ;;  %v1461_v44 = vld [vmem:[#allocation8 + $0xb78] sm:$0xff]  ;;  %v1937_v8 = vadd.f32 %v4839_v40, %v1917_v28 }
 0x2da   : > { %2816 = vmatpush.msrb.mxu2 %v1413_v9  ;;  %2771 = vmatpush.msra.mxu3 %v1161_v11  ;;  %v1261_v48 = vld [vmem:[#allocation8 + $0x538] sm:$0xff] }
 0x2db   : > { %2732 = vmatmul.f32.vlgmr.msra.gmra.mxu1 %v4843_v46  ;;  %2772 = vmatmul.f32.vlgmr.msra.gmra.mxu3 %v3757_v18  ;;  %v1333_v46 = vld [vmem:[#allocation8 + $0x778] sm:$0xff] }
 0x2dc   : > { %2777 = vmatpush.msrb.mxu0 %v1281_v14  ;;  %2797 = vmatpush.msrb.mxu1 %v1345_v59  ;;  %v1325_v49 = vld [vmem:[#allocation8 + $0x738] sm:$0xff] }
 0x2dd   : > { %2817 = vmatpush.msrb.mxu2 %v1409_v16  ;;  %2836 = vmatpush.msrb.mxu3 %v1477_v17  ;;  %v1389_v50 = vld [vmem:[#allocation8 + $0x938] sm:$0xff]  ;;  %v1957_v17 = vadd.f32 %v4845_v22, %v1937_v8  ;;  %v4891_v8 = vld [vmem:[#allocation11] sm:$0xf] }
 0x2de   : > { %2778 = vmatpush.msrb.mxu0 %v1277_v20  ;;  %2798 = vmatpush.msrb.mxu1 %v1341_v21  ;;  %v1457_v52 = vld [vmem:[#allocation8 + $0xb58] sm:$0xff] }
 0x2df   : > { %2818 = vmatpush.msrb.mxu2 %v1405_v23  ;;  %2837 = vmatpush.msrb.mxu3 %v1473_v43  ;;  %v1257_v53 = vld [vmem:[#allocation8 + $0x518] sm:$0xff] }
 0x2e0   : > { %2779 = vmatpush.msrb.mxu0 %v1273_v24  ;;  %2799 = vmatpush.msrb.mxu1 %v1337_v25  ;;  %v1321_v54 = vld [vmem:[#allocation8 + $0x718] sm:$0xff] }
 0x2e1   : > { %2819 = vmatpush.msrb.mxu2 %v1401_v26  ;;  %2838 = vmatpush.msrb.mxu3 %v1469_v31  ;;  %v1385_v1 = vld [vmem:[#allocation8 + $0x918] sm:$0xff]  ;;  %v1977_v26 = vadd.f32 %v4849_v56, %v1957_v17  ;;  %v2890_v17 = vld [vmem:[#allocation13 + $0x40] sm:$0xff] }
 0x2e2   : > { %2780 = vmatpush.msrb.mxu0 %v1269_v32  ;;  %2800 = vmatpush.msrb.mxu1 %v1333_v46  ;;  %v1453_v55 = vld [vmem:[#allocation8 + $0xb38] sm:$0xff]  ;;  %v2037_v46 = vadd.f32 %v4855_v3, %v4853_v30 }
 0x2e3   : > { %2820 = vmatpush.msrb.mxu2 %v1397_v36  ;;  %2839 = vmatpush.msrb.mxu3 %v1465_v37  ;;  %v1253_v57 = vld [vmem:[#allocation8 + $0x4f8] sm:$0xff]  ;;  %v2393_v36 = vpop.f32.mrf.mxu0  ;;  %v3758_v37 = vld.sshfl [vmem:[#allocation1 + $0x10] sm:$0xff pattern:$0x73625140]  ;;  %v1997_v56 = vadd.f32 %v4851_v2, %v1977_v26  ;;  %v2433_v2 = vpop.f32.mrf.mxu2 }
 0x2e4   : > { %2781 = vmatpush.msrb.mxu0 %v1265_v38  ;;  %2801 = vmatpush.msrb.mxu1 %v1329_v47  ;;  %v1317_v42 = vld [vmem:[#allocation8 + $0x6f8] sm:$0xff]  ;;  %v3759_v38 = vld.sshfl [vmem:[#allocation1 + $0x20] sm:$0xff pattern:$0x73625140]  ;;  %v2057_v3 = vadd.f32 %v4857_v10, %v2037_v46 }
 0x2e5   : > { %2821 = vmatpush.msrb.mxu2 %v1393_v41  ;;  %2840 = vmatpush.msrb.mxu3 %v1461_v44  ;;  %v1381_v58 = vld [vmem:[#allocation8 + $0x8f8] sm:$0xff]  ;;  %v2910_v47 = vld [vmem:[#allocation13 + $0xe0] sm:$0xff] }
 0x2e6   : > { %2782 = vmatpush.msrb.mxu0 %v1261_v48  ;;  %2802 = vmatpush.msrb.mxu1 %v1325_v49  ;;  %v1449_v60 = vld [vmem:[#allocation8 + $0xb18] sm:$0xff]  ;;  %v2942_v41 = vld [vmem:[#allocation13 + $0x1e0] sm:$0xff]  ;;  %v2394_v49 = vadd.f32 %v2393_v36, %v1997_v56 }
 0x2e7   : > { %2822 = vmatpush.msrb.mxu2 %v1389_v50  ;;  %2841 = vmatpush.msrb.mxu3 %v1457_v52  ;;  %v1249_v61 = vld [vmem:[#allocation8 + $0x4d8] sm:$0xff]  ;;  %v3761_v50 = vld.sshfl [vmem:[#allocation1 + $0x28] sm:$0xff pattern:$0x73625140]  ;;  %v2413_v52 = vpop.f32.mrf.mxu1 }
 0x2e8   : > { %2783 = vmatpush.msrb.mxu0 %v1257_v53  ;;  %2803 = vmatpush.msrb.mxu1 %v1321_v54  ;;  %v1313_v45 = vld [vmem:[#allocation8 + $0x6d8] sm:$0xff]  ;;  %v2906_v53 = vld [vmem:[#allocation13 + $0xc0] sm:$0xff] }
 0x2e9   : > { %2823 = vmatpush.msrb.mxu2 %v1385_v1  ;;  %2842 = vmatpush.msrb.mxu3 %v1453_v55  ;;  %v1377_v62 = vld [vmem:[#allocation8 + $0x8d8] sm:$0xff]  ;;  %v2938_v54 = vld [vmem:[#allocation13 + $0x1c0] sm:$0xff]  ;;  %v2414_v55 = vadd.f32 %v2413_v52, %v2394_v49  ;;  %v2859_v52 = vperm.slane %v4891_v8, 1 }
 0x2ea   : > { %2784 = vmatpush.msrb.mxu0 %v1253_v57  ;;  %2804 = vmatpush.msrb.mxu1 %v1317_v42  ;;  %v1445_v63 = vld [vmem:[#allocation8 + $0xaf8] sm:$0xff]  ;;  %v2077_v42 = vadd.f32 %v4859_v13, %v2057_v3 }
 0x2eb   : > { %2824 = vmatpush.msrb.mxu2 %v1381_v58  ;;  %2843 = vmatpush.msrb.mxu3 %v1449_v60  ;;  %v1245_v29 = vld [vmem:[#allocation8 + $0x4b8] sm:$0xff]  ;;  %v2902_v58 = vld [vmem:[#allocation13 + $0xa0] sm:$0xff]  ;;  %v2434_v60 = vadd.f32 %v2433_v2, %v2414_v55  ;;  %v2473_v28 = vpop.f32.mrf.mxu0  ;;  %v2943_v2 = vld [vmem:[#allocation13 + $0x1e8] sm:$0xff] }
 0x2ec   : > { %v1309_v51 = vld [vmem:[#allocation8 + $0x6b8] sm:$0xff]  ;;  %2785 = vmatpush.msrb.mxu0 %v1249_v61  ;;  %2805 = vmatpush.msrb.mxu1 %v1313_v45  ;;  %v2934_v61 = vld [vmem:[#allocation13 + $0x1a0] sm:$0xff]  ;;  %v2453_v45 = vpop.f32.mrf.mxu3 }
 0x2ed   : > { %v1373_v0 = vld [vmem:[#allocation8 + $0x8b8] sm:$0xff]  ;;  %2825 = vmatpush.msrb.mxu2 %v1377_v62  ;;  %2844 = vmatpush.msrb.mxu3 %v1445_v63  ;;  %v2097_v63 = vadd.f32 %v4861_v19, %v2077_v42  ;;  %v2926_v19 = vld [vmem:[#allocation13 + $0x160] sm:$0xff] }
 0x2ee   : > { %v1441_v4 = vld [vmem:[#allocation8 + $0xad8] sm:$0xff]  ;;  %2786 = vmatpush.msrb.mxu0 %v1245_v29  ;;  %2806 = vmatpush.msrb.mxu1 %v1309_v51  ;;  %v2898_v29 = vld [vmem:[#allocation13 + $0x80] sm:$0xff]  ;;  %v2454_v51 = vadd.f32 %v2453_v45, %v2434_v60  ;;  %v2907_v45 = vld [vmem:[#allocation13 + $0xc8] sm:$0xff] }
 0x2ef   : > { %v1241_v5 = vld [vmem:[#allocation8 + $0x498] sm:$0xff]  ;;  %2826 = vmatpush.msrb.mxu2 %v1373_v0  ;;  %2845 = vmatpush.msrb.mxu3 %v1441_v4  ;;  %v2930_v0 = vld [vmem:[#allocation13 + $0x180] sm:$0xff] }
 0x2f0   : > { %v1305_v7 = vld [vmem:[#allocation8 + $0x698] sm:$0xff]  ;;  %2787 = vmatpush.msrb.mxu0 %v1241_v5  ;;  %v2474_v4 = vadd.f32 %v2473_v28, %v2454_v51  ;;  %v2513_v5 = vpop.f32.mrf.mxu2 }
 0x2f1   : > { %v1369_v34 = vld [vmem:[#allocation8 + $0x898] sm:$0xff]  ;;  %2807 = vmatpush.msrb.mxu1 %v1305_v7 }
 0x2f2   : > { %v1437_v35 = vld [vmem:[#allocation8 + $0xab8] sm:$0xff]  ;;  %2827 = vmatpush.msrb.mxu2 %v1369_v34  ;;  %v2117_v34 = vadd.f32 %v4863_v27, %v2097_v63  ;;  %v2922_v27 = vld [vmem:[#allocation13 + $0x140] sm:$0xff] }
 0x2f3   : > { %v1237_v39 = vld [vmem:[#allocation8 + $0x478] sm:$0xff]  ;;  %2846 = vmatpush.msrb.mxu3 %v1437_v35  ;;  %v2493_v35 = vpop.f32.mrf.mxu1  ;;  %v2958_v63 = vld [vmem:[#allocation13 + $0x260] sm:$0xff] }
 0x2f4   : > { %v1301_v33 = vld [vmem:[#allocation8 + $0x678] sm:$0xff]  ;;  %2788 = vmatpush.msrb.mxu0 %v1237_v39  ;;  %v2894_v39 = vld [vmem:[#allocation13 + $0x60] sm:$0xff] }
 0x2f5   : > { %v1365_v9 = vld [vmem:[#allocation8 + $0x878] sm:$0xff]  ;;  %2808 = vmatpush.msrb.mxu1 %v1301_v33  ;;  %v2514_v33 = vadd.f32 %v2513_v5, %v2117_v34  ;;  %v2903_v5 = vld [vmem:[#allocation13 + $0xa8] sm:$0xff]  ;;  %v2954_v34 = vld [vmem:[#allocation13 + $0x240] sm:$0xff] }
 0x2f6   : > { %v1433_v11 = vld [vmem:[#allocation8 + $0xa98] sm:$0xff]  ;;  %2828 = vmatpush.msrb.mxu2 %v1365_v9 }
 0x2f7   : > { %v1233_v12 = vld [vmem:[#allocation8 + $0x458] sm:$0xff]  ;;  %2847 = vmatpush.msrb.mxu3 %v1433_v11  ;;  %v2494_v11 = vadd.f32 %v2493_v35, %v2474_v4  ;;  %v3006_v4 = vld [vmem:[#allocation13 + $0x3e0] sm:$0xff] }
 0x2f8   : > { %v1297_v14 = vld [vmem:[#allocation8 + $0x658] sm:$0xff]  ;;  %2789 = vmatpush.msrb.mxu0 %v1233_v12  ;;  %v2858_v12 = vperm.slane %v4891_v8, 0 }
 0x2f9   : > { %v1361_v59 = vld [vmem:[#allocation8 + $0x858] sm:$0xff]  ;;  %2809 = vmatpush.msrb.mxu1 %v1297_v14  ;;  %v2533_v14 = vpop.f32.mrf.mxu3 }
 0x2fa   : > { %v1429_v16 = vld [vmem:[#allocation8 + $0xa78] sm:$0xff]  ;;  %2829 = vmatpush.msrb.mxu2 %v1361_v59 }
 0x2fb   : > { %v1229_v40 = vld [vmem:[#allocation8 + $0x438] sm:$0xff]  ;;  %2848 = vmatpush.msrb.mxu3 %v1429_v16 }
 0x2fc   : > { %v1293_v18 = vld [vmem:[#allocation8 + $0x638] sm:$0xff]  ;;  %2790 = vmatpush.msrb.mxu0 %v1229_v40  ;;  %v2974_v40 = vld [vmem:[#allocation13 + $0x2e0] sm:$0xff] }
 0x2fd   : > { %v1357_v20 = vld [vmem:[#allocation8 + $0x838] sm:$0xff]  ;;  %2810 = vmatpush.msrb.mxu1 %v1293_v18  ;;  %v2534_v18 = vadd.f32 %v2533_v14, %v2514_v33  ;;  %v2950_v14 = vld [vmem:[#allocation13 + $0x220] sm:$0xff] }
 0x2fe   : > { %v1425_v21 = vld [vmem:[#allocation8 + $0xa58] sm:$0xff]  ;;  %2830 = vmatpush.msrb.mxu2 %v1357_v20 }
 0x2ff   : > { %v1225_v23 = vld [vmem:[#allocation8 + $0x418] sm:$0xff]  ;;  %2849 = vmatpush.msrb.mxu3 %v1425_v21  ;;  %v2866_v21 = vadd.f32 %v2858_v12, %v2494_v11  ;;  %v2899_v11 = vld [vmem:[#allocation13 + $0x88] sm:$0xff] }
 0x300   : > { %v1289_v43 = vld [vmem:[#allocation8 + $0x618] sm:$0xff]  ;;  %2791 = vmatpush.msrb.mxu0 %v1225_v23  ;;  %v2931_v12 = vld [vmem:[#allocation13 + $0x188] sm:$0xff] }
 0x301   : > { %v1353_v24 = vld [vmem:[#allocation8 + $0x818] sm:$0xff]  ;;  %2811 = vmatpush.msrb.mxu1 %v1289_v43  ;;  %2792 = vmatmul.f32.vlgmr.msrb.gmra.mxu0 %v3758_v37  ;;  %v2874_v36 = vmul.f32 0.2, %v2866_v21  ;;  %vm2870_vm11 = vcmp.gt.f32.partialorder %v2866_v21, 0.0 }
 0x302   : > { %v1421_v25 = vld [vmem:[#allocation8 + $0xa38] sm:$0xff]  ;;  %2831 = vmatpush.msrb.mxu2 %v1353_v24 }
 0x303   : > { %v2912_v22 = vld [vmem:[#allocation13 + $0xf0] sm:$0xff]  ;;  %2850 = vmatpush.msrb.mxu3 %v1421_v25  ;;  %2832 = vmatmul.f32.vlgmr.msrb.gmra.mxu2 %v3759_v38  ;;  %v2886_v25 = vld [vmem:[#allocation13 + $0x20] sm:$0xff]  ;;  %v2913_v49 = vld [vmem:[#allocation13 + $0xf8] sm:$0xff]  ;;  %v4894_v3 = vsel %vm2870_vm11, %v2866_v21, %v2874_v36 }
 0x304   : > { %v2944_v31 = vld [vmem:[#allocation13 + $0x1f0] sm:$0xff]  ;;  %3016 = vmatpush.msra.mxu0 %v2912_v22  ;;  %v2918_v22 = vld [vmem:[#allocation13 + $0x120] sm:$0xff]  ;;  %v2909_v42 = vld [vmem:[#allocation13 + $0xd8] sm:$0xff] }
 0x305   : > { %v1417_v32 = vld [vmem:[#allocation8 + $0xa18] sm:$0xff]  ;;  %3036 = vmatpush.msra.mxu1 %v2944_v31  ;;  %v2970_v31 = vld [vmem:[#allocation13 + $0x2c0] sm:$0xff]  ;;  %v2971_v36 = vld [vmem:[#allocation13 + $0x2c8] sm:$0xff] }
 0x306   : > { %2851 = vmatpush.msrb.mxu3 %v1417_v32  ;;  %v3760_v44 = vld.sshfl [vmem:[#allocation1 + $0x18] sm:$0xff pattern:$0x73625140]  ;;  %3017 = vmatpush.msra.mxu0 %v2910_v47  ;;  %v2882_v47 = vld [vmem:[#allocation13] sm:$0xff] }
 0x307   : > { %2812 = vmatmul.f32.vlgmr.msrb.gmra.mxu1 %v3760_v44  ;;  %v2908_v48 = vld [vmem:[#allocation13 + $0xd0] sm:$0xff]  ;;  %2852 = vmatmul.f32.vlgmr.msrb.gmra.mxu3 %v3761_v50  ;;  %v2553_v43 = vpop.f32.mrf.mxu0  ;;  %v2945_v50 = vld [vmem:[#allocation13 + $0x1f8] sm:$0xff] }
 0x308   : > { %v2940_v30 = vld [vmem:[#allocation13 + $0x1d0] sm:$0xff]  ;;  %3037 = vmatpush.msra.mxu1 %v2942_v41  ;;  %3018 = vmatpush.msra.mxu0 %v2908_v48  ;;  %v2554_v26 = vadd.f32 %v2553_v43, %v2534_v18  ;;  %v2914_v41 = vld [vmem:[#allocation13 + $0x100] sm:$0xff]  ;;  %v2937_v51 = vld [vmem:[#allocation13 + $0x1b8] sm:$0xff] }
 0x309   : > { %v2904_v1 = vld [vmem:[#allocation13 + $0xb0] sm:$0xff]  ;;  %v2966_v48 = vld [vmem:[#allocation13 + $0x2a0] sm:$0xff]  ;;  %v2925_v21 = vld [vmem:[#allocation13 + $0x158] sm:$0xff] }
 0x30a   : > { %3038 = vmatpush.msra.mxu1 %v2940_v30  ;;  %3019 = vmatpush.msra.mxu0 %v2906_v53  ;;  %v2936_v57 = vld [vmem:[#allocation13 + $0x1b0] sm:$0xff]  ;;  %v2946_v18 = vld [vmem:[#allocation13 + $0x200] sm:$0xff]  ;;  %v2891_v43 = vld [vmem:[#allocation13 + $0x48] sm:$0xff] }
 0x30b   : > { %v2900_v10 = vld [vmem:[#allocation13 + $0x90] sm:$0xff]  ;;  %v2573_v46 = vpop.f32.mrf.mxu1 }
 0x30c   : > { %3039 = vmatpush.msra.mxu1 %v2938_v54  ;;  %3020 = vmatpush.msra.mxu0 %v2904_v1  ;;  %v2932_v62 = vld [vmem:[#allocation13 + $0x190] sm:$0xff]  ;;  %v2574_v56 = vadd.f32 %v2573_v46, %v2554_v26  ;;  %v2911_v54 = vld [vmem:[#allocation13 + $0xe8] sm:$0xff]  ;;  %v2889_v26 = vld [vmem:[#allocation13 + $0x38] sm:$0xff] }
 0x30d   : > { %v2896_v13 = vld [vmem:[#allocation13 + $0x70] sm:$0xff]  ;;  %v2919_v46 = vld [vmem:[#allocation13 + $0x128] sm:$0xff] }
 0x30e   : > { %3040 = vmatpush.msra.mxu1 %v2936_v57  ;;  %3021 = vmatpush.msra.mxu0 %v2902_v58  ;;  %v2928_v7 = vld [vmem:[#allocation13 + $0x170] sm:$0xff]  ;;  %v2962_v57 = vld [vmem:[#allocation13 + $0x280] sm:$0xff]  ;;  %v2941_v58 = vld [vmem:[#allocation13 + $0x1d8] sm:$0xff] }
 0x30f   : > { %v2892_v9 = vld [vmem:[#allocation13 + $0x50] sm:$0xff]  ;;  %v2593_v44 = vpop.f32.mrf.mxu2 }
 0x310   : > { %3041 = vmatpush.msra.mxu1 %v2934_v61  ;;  %3022 = vmatpush.msra.mxu0 %v2900_v10  ;;  %v2924_v59 = vld [vmem:[#allocation13 + $0x150] sm:$0xff]  ;;  %v2594_v30 = vadd.f32 %v2593_v44, %v2574_v56  ;;  %v2939_v10 = vld [vmem:[#allocation13 + $0x1c8] sm:$0xff] }
 0x311   : > { %v2976_v16 = vld [vmem:[#allocation13 + $0x2f0] sm:$0xff]  ;;  %v2883_v56 = vld [vmem:[#allocation13 + $0x8] sm:$0xff] }
 0x312   : > { %3042 = vmatpush.msra.mxu1 %v2932_v62  ;;  %3023 = vmatpush.msra.mxu0 %v2898_v29  ;;  %v2888_v20 = vld [vmem:[#allocation13 + $0x30] sm:$0xff]  ;;  %v2613_v1 = vpop.f32.mrf.mxu3  ;;  %v2905_v29 = vld [vmem:[#allocation13 + $0xb8] sm:$0xff] }
 0x313   : > { %3056 = vmatpush.msra.mxu2 %v2976_v16  ;;  %v2920_v23 = vld [vmem:[#allocation13 + $0x130] sm:$0xff]  ;;  %v2614_v55 = vadd.f32 %v2613_v1, %v2594_v30  ;;  %v2929_v16 = vld [vmem:[#allocation13 + $0x178] sm:$0xff]  ;;  %v2998_v30 = vld [vmem:[#allocation13 + $0x3a0] sm:$0xff] }
 0x314   : > { %3043 = vmatpush.msra.mxu1 %v2930_v0  ;;  %3024 = vmatpush.msra.mxu0 %v2896_v13  ;;  %v2972_v24 = vld [vmem:[#allocation13 + $0x2d0] sm:$0xff] }
 0x315   : > { %3057 = vmatpush.msra.mxu2 %v2974_v40  ;;  %v2884_v32 = vld [vmem:[#allocation13 + $0x10] sm:$0xff]  ;;  %v2867_v60 = vadd.f32 %v2859_v52, %v2614_v55  ;;  %v2927_v40 = vld [vmem:[#allocation13 + $0x168] sm:$0xff]  ;;  %v2957_v55 = vld [vmem:[#allocation13 + $0x258] sm:$0xff] }
 0x316   : > { %3044 = vmatpush.msra.mxu1 %v2928_v7  ;;  %3025 = vmatpush.msra.mxu0 %v2894_v39  ;;  %v2916_v37 = vld [vmem:[#allocation13 + $0x110] sm:$0xff]  ;;  %v2935_v7 = vld [vmem:[#allocation13 + $0x1a8] sm:$0xff]  ;;  %v2901_v39 = vld [vmem:[#allocation13 + $0x98] sm:$0xff] }
 0x317   : > { %3058 = vmatpush.msra.mxu2 %v2972_v24  ;;  %v2968_v38 = vld [vmem:[#allocation13 + $0x2b0] sm:$0xff]  ;;  %v2875_v62 = vmul.f32 0.2, %v2867_v60  ;;  %vm2871_vm12 = vcmp.gt.f32.partialorder %v2867_v60, 0.0  ;;  %v2923_v24 = vld [vmem:[#allocation13 + $0x148] sm:$0xff] }
 0x318   : > { %3045 = vmatpush.msra.mxu1 %v2926_v19  ;;  %3026 = vmatpush.msra.mxu0 %v2892_v9  ;;  %v2964_v53 = vld [vmem:[#allocation13 + $0x290] sm:$0xff]  ;;  %v2933_v19 = vld [vmem:[#allocation13 + $0x198] sm:$0xff]  ;;  %v3002_v9 = vld [vmem:[#allocation13 + $0x3c0] sm:$0xff] }
 0x319   : > { %3059 = vmatpush.msra.mxu2 %v2970_v31  ;;  %v2960_v61 = vld [vmem:[#allocation13 + $0x270] sm:$0xff]  ;;  %v4898_v0 = vsel %vm2871_vm12, %v2867_v60, %v2875_v62  ;;  %v2973_v31 = vld [vmem:[#allocation13 + $0x2d8] sm:$0xff]  ;;  %v2986_v60 = vld [vmem:[#allocation13 + $0x340] sm:$0xff] }
 0x31a   : > { %3046 = vmatpush.msra.mxu1 %v2924_v59  ;;  %3027 = vmatpush.msra.mxu0 %v2890_v17  ;;  %v3008_v28 = vld [vmem:[#allocation13 + $0x3f0] sm:$0xff]  ;;  %v2897_v59 = vld [vmem:[#allocation13 + $0x78] sm:$0xff] }
 0x31b   : > { %3060 = vmatpush.msra.mxu2 %v2968_v38  ;;  %3076 = vmatpush.msra.mxu3 %v3008_v28  ;;  %v2956_v13 = vld [vmem:[#allocation13 + $0x250] sm:$0xff]  ;;  %v2917_v38 = vld [vmem:[#allocation13 + $0x118] sm:$0xff]  ;;  %v2982_v28 = vld [vmem:[#allocation13 + $0x320] sm:$0xff] }
 0x31c   : > { %3047 = vmatpush.msra.mxu1 %v2922_v27  ;;  %3028 = vmatpush.msra.mxu0 %v2888_v20  ;;  %v3004_v35 = vld [vmem:[#allocation13 + $0x3d0] sm:$0xff]  ;;  %v2895_v27 = vld [vmem:[#allocation13 + $0x68] sm:$0xff]  ;;  %v2893_v20 = vld [vmem:[#allocation13 + $0x58] sm:$0xff] }
 0x31d   : > { %3061 = vmatpush.msra.mxu2 %v2966_v48  ;;  %3077 = vmatpush.msra.mxu3 %v3006_v4  ;;  %v2952_v33 = vld [vmem:[#allocation13 + $0x230] sm:$0xff]  ;;  %v2967_v48 = vld [vmem:[#allocation13 + $0x2a8] sm:$0xff] }
 0x31e   : > { %3048 = vmatpush.msra.mxu1 %v2920_v23  ;;  %3029 = vmatpush.msra.mxu0 %v2886_v25  ;;  %v2948_v17 = vld [vmem:[#allocation13 + $0x210] sm:$0xff]  ;;  %v2977_v23 = vld [vmem:[#allocation13 + $0x2f8] sm:$0xff]  ;;  %v2975_v25 = vld [vmem:[#allocation13 + $0x2e8] sm:$0xff] }
 0x31f   : > { %3062 = vmatpush.msra.mxu2 %v2964_v53  ;;  %3078 = vmatpush.msra.mxu3 %v3004_v35  ;;  %v3000_v44 = vld [vmem:[#allocation13 + $0x3b0] sm:$0xff]  ;;  %v2961_v53 = vld [vmem:[#allocation13 + $0x278] sm:$0xff] }
 0x320   : > { %3049 = vmatpush.msra.mxu1 %v2918_v22  ;;  %3030 = vmatpush.msra.mxu0 %v2884_v32  ;;  %v2921_v22 = vld [vmem:[#allocation13 + $0x138] sm:$0xff]  ;;  %v2887_v32 = vld [vmem:[#allocation13 + $0x28] sm:$0xff]  ;;  %v2996_v52 = vld [vmem:[#allocation13 + $0x390] sm:$0xff] }
 0x321   : > { %3063 = vmatpush.msra.mxu2 %v2962_v57  ;;  %3079 = vmatpush.msra.mxu3 %v3002_v9  ;;  %v2992_v1 = vld [vmem:[#allocation13 + $0x370] sm:$0xff]  ;;  %v2990_v57 = vld [vmem:[#allocation13 + $0x360] sm:$0xff]  ;;  %v3003_v9 = vld [vmem:[#allocation13 + $0x3c8] sm:$0xff] }
 0x322   : > { %3050 = vmatpush.msra.mxu1 %v2916_v37  ;;  %3031 = vmatpush.msra.mxu0 %v2882_v47  ;;  %v2885_v37 = vld [vmem:[#allocation13 + $0x18] sm:$0xff] }
 0x323   : > { %3032 = vmatmul.f32.vlgmr.msra.gmra.mxu0 %v4894_v3  ;;  %3064 = vmatpush.msra.mxu2 %v2960_v61  ;;  %v2969_v47 = vld [vmem:[#allocation13 + $0x2b8] sm:$0xff] }
 0x324   : > { %3051 = vmatpush.msra.mxu1 %v2914_v41  ;;  %3096 = vmatpush.msrb.mxu0 %v2913_v49  ;;  %v2915_v41 = vld [vmem:[#allocation13 + $0x108] sm:$0xff]  ;;  %v2965_v49 = vld [vmem:[#allocation13 + $0x298] sm:$0xff] }
 0x325   : > { %3052 = vmatmul.f32.vlgmr.msra.gmra.mxu1 %v4898_v0  ;;  %3065 = vmatpush.msra.mxu2 %v2958_v63  ;;  %v2949_v63 = vld [vmem:[#allocation13 + $0x218] sm:$0xff] }
 0x326   : > { %3116 = vmatpush.msrb.mxu1 %v2945_v50  ;;  %3097 = vmatpush.msrb.mxu0 %v2911_v54  ;;  %v2963_v50 = vld [vmem:[#allocation13 + $0x288] sm:$0xff]  ;;  %v2994_v54 = vld [vmem:[#allocation13 + $0x380] sm:$0xff] }
 0x327   : > { %3066 = vmatpush.msra.mxu2 %v2956_v13  ;;  %3080 = vmatpush.msra.mxu3 %v3000_v44 }
 0x328   : > { %3117 = vmatpush.msrb.mxu1 %v2943_v2  ;;  %3098 = vmatpush.msrb.mxu0 %v2909_v42  ;;  %v2959_v2 = vld [vmem:[#allocation13 + $0x268] sm:$0xff]  ;;  %v2988_v42 = vld [vmem:[#allocation13 + $0x350] sm:$0xff] }
 0x329   : > { %3067 = vmatpush.msra.mxu2 %v2954_v34  ;;  %3081 = vmatpush.msra.mxu3 %v2998_v30 }
 0x32a   : > { %3118 = vmatpush.msrb.mxu1 %v2941_v58  ;;  %3099 = vmatpush.msrb.mxu0 %v2907_v45  ;;  %v2953_v58 = vld [vmem:[#allocation13 + $0x238] sm:$0xff]  ;;  %v2951_v45 = vld [vmem:[#allocation13 + $0x228] sm:$0xff] }
 0x32b   : > { %3068 = vmatpush.msra.mxu2 %v2952_v33  ;;  %3082 = vmatpush.msra.mxu3 %v2996_v52 }
 0x32c   : > { %3119 = vmatpush.msrb.mxu1 %v2939_v10  ;;  %3100 = vmatpush.msrb.mxu0 %v2905_v29  ;;  %v2984_v10 = vld [vmem:[#allocation13 + $0x330] sm:$0xff] }
 0x32d   : > { %3069 = vmatpush.msra.mxu2 %v2950_v14  ;;  %3083 = vmatpush.msra.mxu3 %v2994_v54 }
 0x32e   : > { %3120 = vmatpush.msrb.mxu1 %v2937_v51  ;;  %3101 = vmatpush.msrb.mxu0 %v2903_v5  ;;  %v2947_v51 = vld [vmem:[#allocation13 + $0x208] sm:$0xff]  ;;  %v2978_v5 = vld [vmem:[#allocation13 + $0x300] sm:$0xff] }
 0x32f   : > { %3070 = vmatpush.msra.mxu2 %v2948_v17  ;;  %3084 = vmatpush.msra.mxu3 %v2992_v1  ;;  %v2999_v17 = vld [vmem:[#allocation13 + $0x3a8] sm:$0xff]  ;;  %v3197_v1 = vld [vmem:[#allocation16 + $0x78] sm:$0xff] }
 0x330   : > { %3121 = vmatpush.msrb.mxu1 %v2935_v7  ;;  %3102 = vmatpush.msrb.mxu0 %v2901_v39  ;;  %v3009_v7 = vld [vmem:[#allocation13 + $0x3f8] sm:$0xff]  ;;  %v3007_v39 = vld [vmem:[#allocation13 + $0x3e8] sm:$0xff] }
 0x331   : > { %3071 = vmatpush.msra.mxu2 %v2946_v18  ;;  %3085 = vmatpush.msra.mxu3 %v2990_v57  ;;  %v2633_v61 = vpop.f32.mrf.mxu0  ;;  %v3195_v57 = vld [vmem:[#allocation16 + $0x68] sm:$0xff] }
 0x332   : > { %3122 = vmatpush.msrb.mxu1 %v2933_v19  ;;  %3103 = vmatpush.msrb.mxu0 %v2899_v11  ;;  %v2634_v62 = vadd.f32 %v2633_v61, %v4867_v15  ;;  %v2653_v29 = vpop.f32.mrf.mxu1  ;;  %v3005_v15 = vld [vmem:[#allocation13 + $0x3d8] sm:$0xff] }
 0x333   : > { %3136 = vmatpush.msrb.mxu2 %v2977_v23  ;;  %3086 = vmatpush.msra.mxu3 %v2988_v42  ;;  %v2993_v23 = vld [vmem:[#allocation13 + $0x378] sm:$0xff]  ;;  %v3211_v42 = vld [vmem:[#allocation16 + $0xe8] sm:$0xff] }
 0x334   : > { %3123 = vmatpush.msrb.mxu1 %v2931_v12  ;;  %3104 = vmatpush.msrb.mxu0 %v2897_v59  ;;  %v2654_v4 = vadd.f32 %v2653_v29, %v2634_v62  ;;  %v2860_v12 = vperm.slane %v4891_v8, 2  ;;  %v3001_v59 = vld [vmem:[#allocation13 + $0x3b8] sm:$0xff]  ;;  %v3191_v62 = vld [vmem:[#allocation16 + $0x48] sm:$0xff]  ;;  %v3206_v29 = vld [vmem:[#allocation16 + $0xc0] sm:$0xff] }
 0x335   : > { %3137 = vmatpush.msrb.mxu2 %v2975_v25  ;;  %3087 = vmatpush.msra.mxu3 %v2986_v60  ;;  %v2987_v25 = vld [vmem:[#allocation13 + $0x348] sm:$0xff]  ;;  %v3193_v60 = vld [vmem:[#allocation16 + $0x58] sm:$0xff] }
 0x336   : > { %3124 = vmatpush.msrb.mxu1 %v2929_v16  ;;  %3105 = vmatpush.msrb.mxu0 %v2895_v27  ;;  %v3209_v61 = vld [vmem:[#allocation16 + $0xd8] sm:$0xff] }
 0x337   : > { %3138 = vmatpush.msrb.mxu2 %v2973_v31  ;;  %3088 = vmatpush.msra.mxu3 %v2984_v10  ;;  %v2981_v31 = vld [vmem:[#allocation13 + $0x318] sm:$0xff] }
 0x338   : > { %3125 = vmatpush.msrb.mxu1 %v2927_v40  ;;  %3106 = vmatpush.msrb.mxu0 %v2893_v20  ;;  %v2997_v40 = vld [vmem:[#allocation13 + $0x398] sm:$0xff]  ;;  %v2995_v20 = vld [vmem:[#allocation13 + $0x388] sm:$0xff] }
 0x339   : > { %3139 = vmatpush.msrb.mxu2 %v2971_v36  ;;  %v2673_v13 = vpop.f32.mrf.mxu2  ;;  %3089 = vmatpush.msra.mxu3 %v2982_v28  ;;  %v3208_v10 = vld [vmem:[#allocation16 + $0xd0] sm:$0xff]  ;;  %v3190_v28 = vld [vmem:[#allocation16 + $0x40] sm:$0xff] }
 0x33a   : > { %3126 = vmatpush.msrb.mxu1 %v2925_v21  ;;  %3107 = vmatpush.msrb.mxu0 %v2891_v43  ;;  %v2674_v34 = vadd.f32 %v2673_v13, %v2654_v4  ;;  %v2991_v43 = vld [vmem:[#allocation13 + $0x368] sm:$0xff]  ;;  %v3188_v13 = vld [vmem:[#allocation16 + $0x30] sm:$0xff] }
 0x33b   : > { %3140 = vmatpush.msrb.mxu2 %v2969_v47  ;;  %v3187_v4 = vld [vmem:[#allocation16 + $0x28] sm:$0xff] }
 0x33c   : > { %3127 = vmatpush.msrb.mxu1 %v2923_v24  ;;  %3108 = vmatpush.msrb.mxu0 %v2889_v26  ;;  %v2989_v24 = vld [vmem:[#allocation13 + $0x358] sm:$0xff] }
 0x33d   : > { %3141 = vmatpush.msrb.mxu2 %v2967_v48  ;;  %v2693_v35 = vpop.f32.mrf.mxu3  ;;  %v2985_v26 = vld [vmem:[#allocation13 + $0x338] sm:$0xff] }
 0x33e   : > { %3128 = vmatpush.msrb.mxu1 %v2921_v22  ;;  %3109 = vmatpush.msrb.mxu0 %v2887_v32  ;;  %v2694_v19 = vadd.f32 %v2693_v35, %v2674_v34  ;;  %v2983_v22 = vld [vmem:[#allocation13 + $0x328] sm:$0xff]  ;;  %v3184_v34 = vld [vmem:[#allocation16 + $0x10] sm:$0xff] }
 0x33f   : > { %3142 = vmatpush.msrb.mxu2 %v2965_v49  ;;  %v2979_v32 = vld [vmem:[#allocation13 + $0x308] sm:$0xff]  ;;  %v3204_v35 = vld [vmem:[#allocation16 + $0xb0] sm:$0xff] }
 0x340   : > { %3129 = vmatpush.msrb.mxu1 %v2919_v46  ;;  %3110 = vmatpush.msrb.mxu0 %v2885_v37 }
 0x341   : > { %3143 = vmatpush.msrb.mxu2 %v2963_v50  ;;  %v2861_v50 = vperm.slane %v4891_v8, 3  ;;  %v3210_v8 = vld [vmem:[#allocation16 + $0xe0] sm:$0xff] }
 0x342   : > { %3130 = vmatpush.msrb.mxu1 %v2917_v38  ;;  %3111 = vmatpush.msrb.mxu0 %v2883_v56 }
 0x343   : > { %3112 = vmatmul.f32.vlgmr.msrb.gmra.mxu0 %v4894_v3  ;;  %3144 = vmatpush.msrb.mxu2 %v2961_v53  ;;  %v2955_v3 = vld [vmem:[#allocation13 + $0x248] sm:$0xff] }
 0x344   : > { %3131 = vmatpush.msrb.mxu1 %v2915_v41  ;;  %3218 = vmatpush.msra.mxu0 %v3197_v1 }
 0x345   : > { %3132 = vmatmul.f32.vlgmr.msrb.gmra.mxu1 %v4898_v0  ;;  %3145 = vmatpush.msrb.mxu2 %v2959_v2  ;;  %v2980_v0 = vld [vmem:[#allocation13 + $0x310] sm:$0xff] }
 0x346   : > { %3090 = vmatpush.msra.mxu3 %v2980_v0  ;;  %v3205_v0 = vld [vmem:[#allocation16 + $0xb8] sm:$0xff] }
 0x347   : > { %3146 = vmatpush.msrb.mxu2 %v2957_v55  ;;  %v3213_v55 = vld [vmem:[#allocation16 + $0xf8] sm:$0xff] }
 0x348   : > { %3091 = vmatpush.msra.mxu3 %v2978_v5  ;;  %3238 = vmatpush.msra.mxu1 %v3213_v55  ;;  %v3186_v5 = vld [vmem:[#allocation16 + $0x20] sm:$0xff] }
 0x349   : > { %3147 = vmatpush.msrb.mxu2 %v2955_v3  ;;  %v3212_v3 = vld [vmem:[#allocation16 + $0xf0] sm:$0xff] }
 0x34a   : > { %3156 = vmatpush.msrb.mxu3 %v3009_v7  ;;  %3239 = vmatpush.msra.mxu1 %v3212_v3  ;;  %v3185_v7 = vld [vmem:[#allocation16 + $0x18] sm:$0xff] }
 0x34b   : > { %3148 = vmatpush.msrb.mxu2 %v2953_v58  ;;  %v3194_v58 = vld [vmem:[#allocation16 + $0x60] sm:$0xff] }
 0x34c   : > { %3157 = vmatpush.msrb.mxu3 %v3007_v39  ;;  %3240 = vmatpush.msra.mxu1 %v3211_v42  ;;  %v3183_v39 = vld [vmem:[#allocation16 + $0x8] sm:$0xff] }
 0x34d   : > { %3149 = vmatpush.msrb.mxu2 %v2951_v45  ;;  %v3192_v45 = vld [vmem:[#allocation16 + $0x50] sm:$0xff] }
 0x34e   : > { %3158 = vmatpush.msrb.mxu3 %v3005_v15  ;;  %3241 = vmatpush.msra.mxu1 %v3210_v8  ;;  %v3203_v15 = vld [vmem:[#allocation16 + $0xa8] sm:$0xff] }
 0x34f   : > { %3150 = vmatpush.msrb.mxu2 %v2949_v63  ;;  %v3207_v63 = vld [vmem:[#allocation16 + $0xc8] sm:$0xff] }
 0x350   : > { %3159 = vmatpush.msrb.mxu3 %v3003_v9  ;;  %3242 = vmatpush.msra.mxu1 %v3209_v61  ;;  %v3201_v9 = vld [vmem:[#allocation16 + $0x98] sm:$0xff] }
 0x351   : > { %3151 = vmatpush.msrb.mxu2 %v2947_v51  ;;  %v3189_v51 = vld [vmem:[#allocation16 + $0x38] sm:$0xff] }
 0x352   : > { %3160 = vmatpush.msrb.mxu3 %v3001_v59  ;;  %3243 = vmatpush.msra.mxu1 %v3208_v10  ;;  %v3010_v59 = vld [vmem:[#allocation14] sm:$0x3] }
 0x354   : > { %3161 = vmatpush.msrb.mxu3 %v2999_v17  ;;  %3244 = vmatpush.msra.mxu1 %v3207_v63  ;;  %v3012_v17 = vperm.slane %v3010_v59, 0 }
 0x355   : > { %v2713_v33 = vpop.f32.mrf.mxu0 }
 0x356   : > { %v2714_v11 = vadd.f32 %v2713_v33, %v2694_v19  ;;  %3162 = vmatpush.msrb.mxu3 %v2997_v40  ;;  %3245 = vmatpush.msra.mxu1 %v3206_v29  ;;  %v3182_v19 = vld [vmem:[#allocation16] sm:$0xff] }
 0x357   : > { %v3202_v33 = vld [vmem:[#allocation16 + $0xa0] sm:$0xff] }
 0x358   : > { %v2733_v14 = vpop.f32.mrf.mxu1  ;;  %3163 = vmatpush.msrb.mxu3 %v2995_v20  ;;  %3246 = vmatpush.msra.mxu1 %v3205_v0 }
 0x359   : > { %v2734_v16 = vadd.f32 %v2733_v14, %v2714_v11  ;;  %v3200_v11 = vld [vmem:[#allocation16 + $0x90] sm:$0xff]  ;;  %v3198_v14 = vld [vmem:[#allocation16 + $0x80] sm:$0xff] }
 0x35a   : > { %3164 = vmatpush.msrb.mxu3 %v2993_v23  ;;  %3247 = vmatpush.msra.mxu1 %v3204_v35 }
 0x35b   : > { %v2868_v27 = vadd.f32 %v2860_v12, %v2734_v16  ;;  %v2753_v46 = vpop.f32.mrf.mxu2  ;;  %v3199_v12 = vld [vmem:[#allocation16 + $0x88] sm:$0xff] }
 0x35c   : > { %3165 = vmatpush.msrb.mxu3 %v2991_v43  ;;  %v2754_v36 = vadd.f32 %v2753_v46, %v4875_v6  ;;  %v3196_v6 = vld [vmem:[#allocation16 + $0x70] sm:$0xff]  ;;  %3248 = vmatpush.msra.mxu1 %v3203_v15 }
 0x35d   : > { %v2876_v18 = vmul.f32 0.2, %v2868_v27  ;;  %vm2872_vm13 = vcmp.gt.f32.partialorder %v2868_v27, 0.0  ;;  %3219 = vmatpush.msra.mxu0 %v3196_v6 }
 0x35e   : > { %3166 = vmatpush.msrb.mxu3 %v2989_v24  ;;  %v2773_v37 = vpop.f32.mrf.mxu3  ;;  %3249 = vmatpush.msra.mxu1 %v3202_v33 }
 0x35f   : > { %v2880_v21 = vsel %vm2872_vm13, %v2868_v27, %v2876_v18  ;;  %v2774_v38 = vadd.f32 %v2773_v37, %v2754_v36  ;;  %3220 = vmatpush.msra.mxu0 %v3195_v57 }
 0x360   : > { %3072 = vmatmul.f32.vlgmr.msra.gmra.mxu2 %v2880_v21  ;;  %3167 = vmatpush.msrb.mxu3 %v2987_v25 }
 0x361   : > { %3221 = vmatpush.msra.mxu0 %v3194_v58  ;;  %3250 = vmatpush.msra.mxu1 %v3201_v9 }
 0x362   : > { %3168 = vmatpush.msrb.mxu3 %v2985_v26 }
 0x363   : > { %3222 = vmatpush.msra.mxu0 %v3193_v60  ;;  %3251 = vmatpush.msra.mxu1 %v3200_v11 }
 0x364   : > { %3169 = vmatpush.msrb.mxu3 %v2983_v22 }
 0x365   : > { %3223 = vmatpush.msra.mxu0 %v3192_v45  ;;  %3252 = vmatpush.msra.mxu1 %v3199_v12 }
 0x366   : > { %3170 = vmatpush.msrb.mxu3 %v2981_v31 }
 0x367   : > { %3224 = vmatpush.msra.mxu0 %v3191_v62  ;;  %3253 = vmatpush.msra.mxu1 %v3198_v14 }
 0x368   : > { %3152 = vmatmul.f32.vlgmr.msrb.gmra.mxu2 %v2880_v21  ;;  %3171 = vmatpush.msrb.mxu3 %v2979_v32  ;;  %v3013_v21 = vperm.slane %v3010_v59, 1 }
 0x369   : > { %3225 = vmatpush.msra.mxu0 %v3190_v28 }
 0x36b   : > { %3226 = vmatpush.msra.mxu0 %v3189_v51 }
 0x36d   : > { %3227 = vmatpush.msra.mxu0 %v3188_v13 }
 0x36f   : > { %3228 = vmatpush.msra.mxu0 %v3187_v4 }
 0x371   : > { %3229 = vmatpush.msra.mxu0 %v3186_v5 }
 0x373   : > { %3230 = vmatpush.msra.mxu0 %v3185_v7 }
 0x375   : > { %3231 = vmatpush.msra.mxu0 %v3184_v34 }
 0x377   : > { %3232 = vmatpush.msra.mxu0 %v3183_v39 }
 0x379   : > { %3233 = vmatpush.msra.mxu0 %v3182_v19 }
 0x37e   : > { %v2793_v47 = vpop.f32.mrf.mxu0 }
 0x37f   : > { %v2794_v56 = vadd.f32 %v2793_v47, %v2774_v38 }
 0x384   : > { %v2813_v41 = vpop.f32.mrf.mxu1 }
 0x385   : > { %v2814_v44 = vadd.f32 %v2813_v41, %v2794_v56 }
 0x386   : > { %v2833_v48 = vpop.f32.mrf.mxu2 }
 0x387   : > { %v2834_v49 = vadd.f32 %v2833_v48, %v2814_v44  ;;  %v3751_v44 = vld [vmem:[#allocation17] ss:$0 sm:$0xff] }
 0x38a   : > { %v2853_v30 = vpop.f32.mrf.mxu3 }
 0x38b   : > { %v2854_v52 = vadd.f32 %v2853_v30, %v2834_v49 }
 0x38d   : > { %v2869_v53 = vadd.f32 %v2861_v50, %v2854_v52 }
 0x38f   : > { %v2877_v54 = vmul.f32 0.2, %v2869_v53  ;;  %vm2873_vm14 = vcmp.gt.f32.partialorder %v2869_v53, 0.0 }
 0x391   : > { %v2881_v2 = vsel %vm2873_vm14, %v2869_v53, %v2877_v54 }
 0x392   : > { %3092 = vmatmul.f32.vlgmr.msra.gmra.mxu3 %v2881_v2 }
 0x39a   : > { %3172 = vmatmul.f32.vlgmr.msrb.gmra.mxu3 %v2881_v2 }
 0x3a0   : > { %v3033_v16 = vpop.f32.mrf.mxu0 }
 0x3a1   : > { %v3034_v18 = vadd.f32 %v3033_v16, %v3012_v17 }
 0x3a2   : > { %v3053_v27 = vpop.f32.mrf.mxu1 }
 0x3a3   : > { %v3054_v20 = vadd.f32 %v3053_v27, %v3034_v18 }
 0x3c0   : > { %v3113_v23 = vpop.f32.mrf.mxu0 }
 0x3c1   : > { %v3114_v25 = vadd.f32 %v3113_v23, %v3013_v21 }
 0x3c2   : > { %v3133_v31 = vpop.f32.mrf.mxu1 }
 0x3c3   : > { %v3134_v46 = vadd.f32 %v3133_v31, %v3114_v25 }
 0x3e3   : > { %v3073_v40 = vpop.f32.mrf.mxu2 }
 0x3e4   : > { %v3074_v43 = vadd.f32 %v3073_v40, %v3054_v20 }
 0x3eb   : > { %v3153_v32 = vpop.f32.mrf.mxu2 }
 0x3ec   : > { %v3154_v37 = vadd.f32 %v3153_v32, %v3134_v46 }
 0x415   : > { %v3093_v24 = vpop.f32.mrf.mxu3 }
 0x416   : > { %v3094_v26 = vadd.f32 %v3093_v24, %v3074_v43 }
 0x418   : > { %vm3176_vm15 = vcmp.gt.f32.partialorder %v3094_v26, 0.0  ;;  %v3178_v22 = vmul.f32 0.2, %v3094_v26 }
 0x41a   : > { %v3180_v36 = vsel %vm3176_vm15, %v3094_v26, %v3178_v22 }
 0x41b   : > { %3234 = vmatmul.f32.vlgmr.msra.gmra.mxu0 %v3180_v36 }
 0x41d   : > { %v3173_v38 = vpop.f32.mrf.mxu3 }
 0x41e   : > { %v3174_v47 = vadd.f32 %v3173_v38, %v3154_v37 }
 0x420   : > { %vm3177_vm0 = vcmp.gt.f32.partialorder %v3174_v47, 0.0  ;;  %v3179_v56 = vmul.f32 0.2, %v3174_v47 }
 0x422   : > { %v3181_v41 = vsel %vm3177_vm0, %v3174_v47, %v3179_v56 }
 0x423   : > { %3254 = vmatmul.f32.vlgmr.msra.gmra.mxu1 %v3181_v41 }
 0x498   : > { %v3235_v48 = vpop.f32.mrf.mxu0 }
 0x499   : > { %v3236_v49 = vadd.f32 %v3751_v44, %v3235_v48 }
 0x4a0   : > { %v3255_v50 = vpop.f32.mrf.mxu1 }
 0x4a1   : > { %v3256_v30 = vadd.f32 %v3255_v50, %v3236_v49 }
 0x4a3   : > { %v3521_v52 = vmul.f32 -1.442695, %v3256_v30 }
 0x4a5   : > { %3752 = vpow2.f32 %v3521_v52 }
 0x4ab   : > { %v3753_v53 = vpop.eup %3752 }
 0x4ac   : > { %v3261_v54 = vadd.f32 1.0, %v3753_v53 }
 0x4ae   : > { %3754 = vrcp.f32 %v3261_v54  ;;  %v3273_v55 = vand.u32 2147483648, %v3261_v54  ;;  %v3271_v3 = vand.u32 2147483647, %v3261_v54  ;;  %vm3267_vm2 = vweird.f32 %v3261_v54 }
 0x4b0   : > { %v3274_v58 = vor.u32 1.1754944e-38, %v3273_v55  ;;  %vm3272_vm4 = vcmp.eq.f32.partialorder %v3271_v3, 8.507059e+37 }
 0x4b4   : > { %v3755_v2 = vpop.eup %3754 }
 0x4b5   : > { %v3263_v1 = vmul.f32 %v3755_v2, %v3261_v54  ;;  %vm3268_vm1 = vweird.f32 %v3755_v2 }
 0x4b6   : > { %vm3269_vm3 = vmor %vm3267_vm2, %vm3268_vm1 }
 0x4b7   : > { %v3264_v6 = vsub.f32 1.0, %v3263_v1 }
 0x4b9   : > { %v3265_v57 = vmul.f32 %v3755_v2, %v3264_v6 }
 0x4bb   : > { %v3266_v42 = vadd.f32 %v3755_v2, %v3265_v57 }
 0x4bd   : > { %v3270_v8 = vsel %vm3269_vm3, %v3755_v2, %v3266_v42 }
 0x4be   : > { %v3275_v60 = vsel %vm3272_vm4, %v3274_v58, %v3270_v8 }
 0x4bf   : > { %3277 = vst [vmem:[#allocation19] sm:$0x3] %v3275_v60 }
 0x4c0 PF: > { %s5003_s30 = sadd.s32 4294967295, %s4118_s16   ;;  %s5004_s25 = sld [smem:[#allocation39_spill]] }
 0x4c1   : > { %p3601_p6 = scmp.eq.s32.totalorder %s5003_s30, 2  ;;  %s4171_s9 = smov [#allocation19]  }
 0x4c2   : > { %s3286_s3 = sshll.u32 %s4171_s9, 4  ;;  %s3287_s3 = int_to_ptr.vmem [resolvable:$true] %s3286_s3 }
 0x4c6   : > { %s3288_s18 = sshll.u32 %s5004_s25, 4  ;;  %s3289_s18 = int_to_ptr.hbm [resolvable:$true] %s3288_s18 }
 0x4c7   : > { %3562 = dma.vmem_to_hbm [thread:$0]  (%p3601_p6), %s3287_s3, 32, %s3289_s18, [#allocation6]  }
 0x4c8   : > { %4085 = dma.done.wait (%p3601_p6), [#allocation6], 32  }
 0x4c9   : > { %4087 = vsyncadd (%p3601_p6), [#allocation6], 4294967264 }
 0x4ca PF: > { %s27_s16 = sadd.s32 1, %s4118_s16   ;;  %s5005_s26 = sld [smem:[#allocation35_spill]] }
 0x4cb   : > { %p24_p7 = scmp.ge.s32.totalorder %s27_s16, 5   ;;  %s5006_s11 = sld [smem:[#allocation29_spill]] }
 0x4cc   : > { %s5007_s27 = sld [smem:[#allocation34_spill]]  ;;  %s5009_s30 = smov %s4094_s10 }
 0x4cd   : > { %s5008_s24 = sld [smem:[#allocation31_spill]]  ;;  %s5011_s12 = smov %s4106_s13 }
 0x4ce   : > { %s5013_s14 = smov %s4114_s15 }
 0x4cf   :  { %26 = sbr.rel (!%p24_p7) target bundleno = 15 (0xf), region = 203 }
 0x4d0   : > { %s5010_s10 = smov %s5005_s26 }
 0x4d2   : > { %s5012_s13 = smov %s5007_s27 }
 0x4d3   : > { %s5014_s15 = smov %s5008_s24 }
 0x4d4   :  { %3302 = vsyncpa [#allocation5], 1 }
 0x4d5   :  { %3304 = vsyncpa [#allocation5 + $0x1], 1 }
 0x4d6   :  { %3305 = vsyncpa [#allocation9], 1 }
 0x4d7   :  { %3306 = vsyncpa [#allocation12], 1 }
 0x4d8   :  { %3307 = vsyncpa [#allocation15], 1 }
 0x4d9   :  { %3308 = vsyncpa [#allocation18], 1 }
 0x4da   :  { %3309 = vsyncpa [#allocation6], 1 }
 0x4db   :  { %3311 = vsyncpa [#allocation6 + $0x1], 1 }

</bundles_post_ra>
